<compile_context>
chip_gen: v6e
topology: v6e:2x2x1
jax: 0.10.0
libtpu: 0.0.40
codegen_flags: <defaults>
</compile_context>

<pallas_src>
import functools
import math

import numpy as np
import jax
import jax.numpy as jnp
from jax import lax
from jax.experimental import pallas as pl
from jax.experimental.pallas import tpu as pltpu

# ------------------- constants (match the PyTorch module defaults) ----------
IN_CHANNELS = 512 * 4 * 4        # SplineFlow in_channels = 8192
NUM_FLOW_BLOCKS = 6
HIDDEN = 128                     # ResidualNet hidden_features
NUM_BINS = 4
P_PARAMS = 3 * NUM_BINS - 1      # 11 raw spline parameters per feature
TAIL_BOUND = 3.0
MIN_BIN_WIDTH = 1e-3
MIN_BIN_HEIGHT = 1e-3
MIN_DERIVATIVE = 1e-3
BN_EPS = 1e-5

TF = 512                               # feature tile for the fused flow kernel
VMEM_LIMIT = 48 * 1024 * 1024          # explicit scoped-VMEM budget (v7x-safe)
_SINGLE_K_BUDGET = 6 * 1024 * 1024     # B tile <= this -> keep full K in one block
_TM_TARGET_BYTES = 3 * 1024 * 1024     # per-grid-step A+out tile volume target


def _round_up(x, m):
    return (x + m - 1) // m * m


def _pick(dim, candidates):
    for t in candidates:
        if dim % t == 0:
            return t
    return candidates[-1]


def _plan(M, K, N, out_bytes):
    """Tile plan for an (M,K)x(K,N) matmul -> (Mp, TM, Kp, TK, Np, TN)."""
    # lane-dense N (never below 128 lanes)
    Np = _round_up(max(N, 128), 128)
    if Np <= 512:
        TN = Np
    else:
        TN = 512
        Np = _round_up(Np, TN)
    # K: one block whenever the B tile fits the budget (backbone always does)
    if K * TN * 2 <= _SINGLE_K_BUDGET:
        Kp, TK = K, K
    else:
        Kp = _round_up(K, 128)
        TK = _pick(Kp, (1024, 768, 512, 384, 256, 128))
    # M: pick the largest power-of-two tile under the per-step volume target
    per_row = TK * 2 + TN * out_bytes
    tm_target = max(_TM_TARGET_BYTES // per_row, 8)
    TM = 0
    for cand in (8192, 4096, 2048, 1024, 512, 256, 128):
        if cand <= tm_target and M % cand == 0:
            TM = cand
            break
    if TM == 0:
        if M <= max(tm_target, 8):
            TM = _round_up(M, 8)
        else:
            TM = 128
    Mp = _round_up(M, TM)
    return Mp, TM, Kp, TK, Np, TN


# =============================================================================
# Pallas kernel 1: tiled matmul (bf16 operands, fp32 accum), fused bias /
#                  residual add / ReLU, bf16 or fp32 output.
# =============================================================================
def _mm_kernel_single(*refs, act, has_add, out_dtype):
    if has_add:
        a_ref, b_ref, bias_ref, add_ref, o_ref = refs
    else:
        a_ref, b_ref, bias_ref, o_ref = refs
        add_ref = None
    r = jnp.dot(a_ref[...], b_ref[...],
                preferred_element_type=jnp.float32) + bias_ref[...]
    if add_ref is not None:
        r = r + add_ref[...].astype(jnp.float32)
    if act == "relu":
        r = jnp.maximum(r, 0.0)
    o_ref[...] = r.astype(out_dtype)


def _mm_kernel_acc(*refs, act, has_add, out_dtype):
    if has_add:
        a_ref, b_ref, bias_ref, add_ref, o_ref, acc_ref = refs
    else:
        a_ref, b_ref, bias_ref, o_ref, acc_ref = refs
        add_ref = None

    @pl.when(pl.program_id(2) == 0)
    def _():
        acc_ref[...] = jnp.zeros_like(acc_ref)

    acc_ref[...] += jnp.dot(a_ref[...], b_ref[...],
                            preferred_element_type=jnp.float32)

    @pl.when(pl.program_id(2) == pl.num_programs(2) - 1)
    def _():
        r = acc_ref[...] + bias_ref[...]
        if add_ref is not None:
            r = r + add_ref[...].astype(jnp.float32)
        if act == "relu":
            r = jnp.maximum(r, 0.0)
        o_ref[...] = r.astype(out_dtype)


@functools.lru_cache(maxsize=None)
def _matmul_callable(M, K, N, act, has_add, out_dtype):
    out_bytes = jnp.dtype(out_dtype).itemsize
    Mp, TM, Kp, TK, Np, TN = _plan(M, K, N, out_bytes)
    nk = Kp // TK
    out_shape = jax.ShapeDtypeStruct((Mp, Np), out_dtype)

    if nk == 1:
        in_specs = [pl.BlockSpec((TM, Kp), lambda i, j: (i, 0)),
                    pl.BlockSpec((Kp, TN), lambda i, j: (0, j)),
                    pl.BlockSpec((1, TN), lambda i, j: (0, j))]
        if has_add:
            in_specs.append(pl.BlockSpec((TM, TN), lambda i, j: (i, j)))
        call = pl.pallas_call(
            functools.partial(_mm_kernel_single, act=act, has_add=has_add,
                              out_dtype=out_dtype),
            out_shape=out_shape,
            grid=(Mp // TM, Np // TN),
            in_specs=in_specs,
            out_specs=pl.BlockSpec((TM, TN), lambda i, j: (i, j)),
            compiler_params=pltpu.CompilerParams(
                dimension_semantics=("parallel", "parallel"),
                vmem_limit_bytes=VMEM_LIMIT))
    else:
        in_specs = [pl.BlockSpec((TM, TK), lambda i, j, k: (i, k)),
                    pl.BlockSpec((TK, TN), lambda i, j, k: (k, j)),
                    pl.BlockSpec((1, TN), lambda i, j, k: (0, j))]
        if has_add:
            in_specs.append(pl.BlockSpec((TM, TN), lambda i, j, k: (i, j)))
        call = pl.pallas_call(
            functools.partial(_mm_kernel_acc, act=act, has_add=has_add,
                              out_dtype=out_dtype),
            out_shape=out_shape,
            grid=(Mp // TM, Np // TN, nk),
            in_specs=in_specs,
            out_specs=pl.BlockSpec((TM, TN), lambda i, j, k: (i, j)),
            scratch_shapes=[pltpu.VMEM((TM, TN), jnp.float32)],
            compiler_params=pltpu.CompilerParams(
                dimension_semantics=("parallel", "parallel", "arbitrary"),
                vmem_limit_bytes=VMEM_LIMIT))

    def fn(a, b_p, bias_p, add=None):
        a = a.astype(jnp.bfloat16)
        if a.shape != (Mp, Kp):
            a = jnp.pad(a, ((0, Mp - a.shape[0]), (0, Kp - a.shape[1])))
        if b_p.shape != (Kp, Np):
            b_p = jnp.pad(b_p, ((0, Kp - b_p.shape[0]), (0, Np - b_p.shape[1])))
        if bias_p.shape != (1, Np):
            bias_p = jnp.pad(bias_p, ((0, 0), (0, Np - bias_p.shape[1])))
        args = [a, b_p, bias_p]
        if has_add:
            add = add.astype(jnp.bfloat16)
            if add.shape != (Mp, Np):
                add = jnp.pad(add, ((0, Mp - add.shape[0]),
                                    (0, Np - add.shape[1])))
            args.append(add)
        out = call(*args)
        if (Mp, Np) != (M, N):
            out = out[:M, :N]
        return out

    return fn


# =============================================================================
# Backbone (ResNet18 conv stack, BN folded) in NHWC on the Pallas matmul kernel
# =============================================================================
@functools.lru_cache(maxsize=None)
def _conv_callable(xshape, kh, kw, stride, padding, Np, relu, has_add):
    Nb, H, W, C = xshape
    OH = (H + 2 * padding - kh) // stride + 1
    OW = (W + 2 * padding - kw) // stride + 1
    M = Nb * OH * OW
    K = kh * kw * C
    mm = _matmul_callable(M, K, Np, "relu" if relu else None, has_add,
                          jnp.bfloat16)

    def fn(x, w_p, bias_p, add=None):
        xp = x.astype(jnp.bfloat16)
        if padding:
            xp = jnp.pad(xp, ((0, 0), (padding, padding),
                              (padding, padding), (0, 0)))
        taps = []
        for dy in range(kh):
            for dx in range(kw):
                taps.append(xp[:, dy:dy + stride * OH:stride,
                               dx:dx + stride * OW:stride, :])
        p = taps[0] if len(taps) == 1 else jnp.concatenate(taps, axis=-1)
        p = p.reshape(M, K)
        if has_add:
            y = mm(p, w_p, bias_p, add.reshape(M, Np))
        else:
            y = mm(p, w_p, bias_p)
        return y.reshape(Nb, OH, OW, Np)

    return jax.jit(fn)


def conv2d(x, cp, stride, padding, relu=False, add=None):
    fn = _conv_callable(tuple(int(d) for d in x.shape), cp["kh"], cp["kw"],
                        stride, padding, cp["Np"], relu, add is not None)
    if add is None:
        return fn(x, cp["wm"], cp["bias"])
    return fn(x, cp["wm"], cp["bias"], add)


def backbone_forward(x_nchw, bp):
    x = jnp.transpose(x_nchw, (0, 2, 3, 1))                  # NCHW -> NHWC once
    x = conv2d(x, bp["conv1"], stride=2, padding=3, relu=True)
    x = lax.reduce_window(x, jnp.array(-jnp.inf, x.dtype), lax.max,
                          (1, 3, 3, 1), (1, 2, 2, 1),
                          ((0, 0), (1, 1), (1, 1), (0, 0)))   # maxpool 3x3 s2 p1
    for blk in bp["blocks"]:
        if "ds" in blk:
            idt = conv2d(x, blk["ds"], stride=blk["stride"], padding=0)
        else:
            idt = x
        out = conv2d(x, blk["c1"], stride=blk["stride"], padding=1, relu=True)
        # residual add + final ReLU fused into the second conv's kernel
        x = conv2d(out, blk["c2"], stride=1, padding=1, relu=True, add=idt)
    x = x.astype(jnp.float32)
    Nb, H, W, C = x.shape
    x = x.reshape(Nb, H // 2, 2, W // 2, 2, C).mean(axis=(2, 4))  # AvgPool2d(2)
    return jnp.transpose(x, (0, 3, 1, 2))                     # back to NCHW


def conv_bn_fold(key, cin, cout, k):
    # TODO(synk): PyTorch default-train BatchNorm uses batch statistics; here BN
    # (frozen running stats, inference semantics) is folded into the conv.
    k1, k2, k3 = jax.random.split(key, 3)
    fan_in = cin * k * k
    w = jax.random.normal(k1, (cout, cin, k, k), jnp.float32) * np.sqrt(2.0 / fan_in)
    gamma = jax.random.uniform(k2, (cout,), minval=0.8, maxval=1.2)
    beta = 0.05 * jax.random.normal(k3, (cout,))
    mean = jnp.zeros((cout,), jnp.float32)
    var = jnp.ones((cout,), jnp.float32)
    scale = gamma / jnp.sqrt(var + BN_EPS)
    return w * scale[:, None, None, None], beta - mean * scale


def prep_conv(w, b, cin_eff=None):
    """(O,C,kh,kw) conv weight -> (kh*kw*cin_eff, Np) bf16 weight + fp32 bias.

    cin_eff is the channel count of the (possibly zero-padded) NHWC input the
    conv will actually see; the output is padded to Np = max(O,128) lanes."""
    O, C, kh, kw = w.shape
    cin_eff = C if cin_eff is None else cin_eff
    if cin_eff > C:
        w = jnp.pad(w, ((0, 0), (0, cin_eff - C), (0, 0), (0, 0)))
    Np = _round_up(max(O, 128), 128)
    wm = jnp.transpose(w, (2, 3, 1, 0)).reshape(kh * kw * cin_eff, O)
    if Np != O:
        wm = jnp.pad(wm, ((0, 0), (0, Np - O)))
    wm = wm.astype(jnp.bfloat16)
    bias = jnp.asarray(b, jnp.float32).reshape(1, O)
    if Np != O:
        bias = jnp.pad(bias, ((0, 0), (0, Np - O)))
    return {"wm": wm, "bias": bias, "Np": Np, "kh": kh, "kw": kw}


def init_backbone(key):
    keys = iter(jax.random.split(key, 40))
    params = {"conv1": prep_conv(*conv_bn_fold(next(keys), 3, 64, 7))}
    cfg = [(64, 64, 1), (64, 64, 1), (64, 128, 2), (128, 128, 1),
           (128, 256, 2), (256, 256, 1), (256, 512, 2), (512, 512, 1)]
    blocks = []
    for cin, cout, stride in cfg:
        cin_eff = max(cin, 128)        # activations carry >=128 (zero-padded) ch
        cout_eff = max(cout, 128)
        blk = {"stride": stride,
               "c1": prep_conv(*conv_bn_fold(next(keys), cin, cout, 3),
                               cin_eff=cin_eff),
               "c2": prep_conv(*conv_bn_fold(next(keys), cout, cout, 3),
                               cin_eff=cout_eff)}
        if stride != 1 or cin != cout:
            blk["ds"] = prep_conv(*conv_bn_fold(next(keys), cin, cout, 1),
                                  cin_eff=cin_eff)
        blocks.append(blk)
    params["blocks"] = blocks
    return params


# =============================================================================
# Pallas kernel 2: fused flow block
#   ResidualNet trunk (once, into VMEM scratch) + final layer streamed by
#   feature tiles + rational-quadratic spline + log|det| accumulation.
# =============================================================================
def _flow_block_kernel(xid_ref, w0_ref, rw_ref, sb_ref, xt_ref, wf_ref, bf_ref,
                       y_ref, lad_ref, h_ref, *, tf):
    K = NUM_BINS
    inv_sqrt_h = 1.0 / math.sqrt(HIDDEN)   # nflows scaling by sqrt(hidden_features)
    sb = sb_ref[...]                        # rows: b0, b1a, b2a, b1b, b2b

    @pl.when(pl.program_id(0) == 0)
    def _():
        # ResidualNet trunk: initial Linear + 2 pre-activation residual blocks.
        h = jnp.dot(xid_ref[...], w0_ref[...],
                    preferred_element_type=jnp.float32) + sb[0]
        for blk in range(2):
            w1 = rw_ref[2 * blk * HIDDEN:(2 * blk + 1) * HIDDEN, :]
            w2 = rw_ref[(2 * blk + 1) * HIDDEN:(2 * blk + 2) * HIDDEN, :]
            t = jnp.maximum(h, 0.0).astype(jnp.bfloat16)
            t = jnp.maximum(
                jnp.dot(t, w1, preferred_element_type=jnp.float32)
                + sb[1 + 2 * blk], 0.0)
            t = jnp.dot(t.astype(jnp.bfloat16), w2,
                        preferred_element_type=jnp.float32) + sb[2 + 2 * blk]
            h = h + t
        h_ref[...] = h
        lad_ref[...] = jnp.zeros(lad_ref.shape, lad_ref.dtype)

    h_bf = h_ref[...].astype(jnp.bfloat16)
    bfull = bf_ref[...]                                    # (1, P_PARAMS*tf)
    x = xt_ref[...]
    inside = (x >= -TAIL_BOUND) & (x <= TAIL_BOUND)
    xc = jnp.clip(x, -TAIL_BOUND, TAIL_BOUND)

    def plane(p):                                          # (8, tf) raw params
        return (jnp.dot(h_bf, wf_ref[:, p * tf:(p + 1) * tf],
                        preferred_element_type=jnp.float32)
                + bfull[:, p * tf:(p + 1) * tf])

    def knots_and_bins(p0, min_size):
        u = [plane(p0 + k) * inv_sqrt_h for k in range(K)]
        m = u[0]
        for v in u[1:]:
            m = jnp.maximum(m, v)
        e = [jnp.exp(v - m) for v in u]
        s = e[0]
        for v in e[1:]:
            s = s + v
        inv_s = 1.0 / s
        sizes = [min_size + (1.0 - min_size * K) * (ek * inv_s) for ek in e]
        knots = [jnp.full_like(x, -TAIL_BOUND)]
        csum = jnp.zeros_like(x)
        for k in range(K - 1):
            csum = csum + sizes[k]
            knots.append(2.0 * TAIL_BOUND * csum - TAIL_BOUND)
        knots.append(jnp.full_like(x, TAIL_BOUND))
        bins = [knots[k + 1] - knots[k] for k in range(K)]
        return knots, bins

    def gather(vals, offset=0):
        out = vals[offset]
        for k in range(1, K):
            out = jnp.where(bidx == k, vals[k + offset], out)
        return out

    # -- widths / bin search -------------------------------------------------
    cw, w = knots_and_bins(0, MIN_BIN_WIDTH)
    bidx = jnp.full(x.shape, -1, jnp.int32)
    for k in range(K + 1):
        loc = cw[k] + (1e-6 if k == K else 0.0)            # nflows searchsorted eps
        bidx = bidx + (xc >= loc).astype(jnp.int32)
    bidx = jnp.clip(bidx, 0, K - 1)
    in_cw = gather(cw)
    in_w = gather(w)
    del cw, w
    # -- heights ---------------------------------------------------------------
    ch, hh = knots_and_bins(K, MIN_BIN_HEIGHT)
    in_ch = gather(ch)
    in_h = gather(hh)
    del ch, hh
    # -- derivatives (boundaries pinned to 1.0, interior via softplus) ---------
    const = math.log(math.exp(1.0 - MIN_DERIVATIVE) - 1.0)
    bound_d = MIN_DERIVATIVE + math.log1p(math.exp(const))   # == 1.0
    d = [jnp.full_like(x, bound_d)]
    for p in range(2 * K, 3 * K - 1):
        u = plane(p)
        d.append(MIN_DERIVATIVE + jnp.maximum(u, 0.0)
                 + jnp.log(1.0 + jnp.exp(-jnp.abs(u))))
    d.append(jnp.full_like(x, bound_d))
    in_d = gather(d)
    in_dp1 = gather(d, 1)
    del d

    # -- rational quadratic spline --------------------------------------------
    in_delta = in_h / in_w
    theta = (xc - in_cw) / in_w
    tomt = theta * (1.0 - theta)
    num = in_h * (in_delta * theta * theta + in_d * tomt)
    den = in_delta + (in_d + in_dp1 - 2.0 * in_delta) * tomt
    y_in = in_ch + num / den
    dnum = (in_delta * in_delta) * (in_dp1 * theta * theta
                                    + 2.0 * in_delta * tomt
                                    + in_d * (1.0 - theta) * (1.0 - theta))
    lad_in = jnp.log(dnum) - 2.0 * jnp.log(den)

    y_ref[...] = jnp.where(inside, y_in, x)                # linear tails = identity
    lad_elem = jnp.where(inside, lad_in, 0.0)
    lad_fold = lad_elem[:, 0:128]
    for c in range(1, tf // 128):
        lad_fold = lad_fold + lad_elem[:, c * 128:(c + 1) * 128]
    lad_ref[...] += lad_fold


@functools.lru_cache(maxsize=None)
def _flow_block_callable(NIP, NTP):
    n_tiles = NTP // TF
    call = pl.pallas_call(
        functools.partial(_flow_block_kernel, tf=TF),
        out_shape=(jax.ShapeDtypeStruct((8, NTP), jnp.float32),
                   jax.ShapeDtypeStruct((8, 128), jnp.float32)),
        grid=(n_tiles,),
        in_specs=[
            pl.BlockSpec((8, NIP), lambda j: (0, 0)),            # x_id (bf16)
            pl.BlockSpec((NIP, HIDDEN), lambda j: (0, 0)),       # W0
            pl.BlockSpec((4 * HIDDEN, HIDDEN), lambda j: (0, 0)),  # residual Ws
            pl.BlockSpec((8, HIDDEN), lambda j: (0, 0)),         # packed biases
            pl.BlockSpec((8, TF), lambda j: (0, j)),             # x_t tile
            pl.BlockSpec((HIDDEN, P_PARAMS * TF), lambda j: (0, j)),  # Wf tile
            pl.BlockSpec((1, P_PARAMS * TF), lambda j: (0, j)),  # bf tile
        ],
        out_specs=(pl.BlockSpec((8, TF), lambda j: (0, j)),
                   pl.BlockSpec((8, 128), lambda j: (0, 0))),
        scratch_shapes=[pltpu.VMEM((8, HIDDEN), jnp.float32)],
        compiler_params=pltpu.CompilerParams(
            dimension_semantics=("arbitrary",),
            vmem_limit_bytes=VMEM_LIMIT),
    )
    return jax.jit(call)


# =============================================================================
# Spline flow (nflows semantics), built on the fused flow-block kernel
# =============================================================================
def linear_init(key, fin, fout):
    kw, kb = jax.random.split(key)
    bound = 1.0 / np.sqrt(fin)
    W = jax.random.uniform(kw, (fin, fout), minval=-bound, maxval=bound)
    b = jax.random.uniform(kb, (fout,), minval=-bound, maxval=bound)
    return W.astype(jnp.float32), b.astype(jnp.float32)


def init_flow(key):
    # TODO(synk): torch.manual_seed(42) RNG stream is not reproducible in JAX;
    # masks/weights are deterministic synthetic equivalents.
    D = IN_CHANNELS
    keys = jax.random.split(key, NUM_FLOW_BLOCKS)
    raw = []
    for b in range(NUM_FLOW_BLOCKS):
        kb = jax.random.split(keys[b], 16)
        mask = np.asarray(jax.random.normal(kb[0], (D,))) > 0.5
        t_idx = np.nonzero(mask)[0]            # transform features (mask > 0)
        id_idx = np.nonzero(~mask)[0]          # identity features  (mask <= 0)
        raw.append((kb, id_idx, t_idx))
    # shared padded sizes -> one compiled fused kernel for all 6 blocks
    NIP = _round_up(max(int(r[1].size) for r in raw), 128)
    NTP = _round_up(max(int(r[2].size) for r in raw), TF)

    blocks = []
    for kb, id_idx, t_idx in raw:
        ni, nt = int(id_idx.size), int(t_idx.size)
        W0, b0 = linear_init(kb[1], ni, HIDDEN)
        res_ws, res_bs = [], []
        for l in range(2):
            W1, b1 = linear_init(kb[2 + 2 * l], HIDDEN, HIDDEN)
            kz1, kz2 = jax.random.split(kb[3 + 2 * l])
            # nflows ResidualBlock zero_initialization of the second linear
            W2 = jax.random.uniform(kz1, (HIDDEN, HIDDEN), minval=-1e-3, maxval=1e-3)
            b2 = jax.random.uniform(kz2, (HIDDEN,), minval=-1e-3, maxval=1e-3)
            res_ws += [W1, W2]
            res_bs += [b1, b2]
        Wf, bf = linear_init(kb[6], HIDDEN, nt * P_PARAMS)

        # ---- pack into the fused-kernel layout ------------------------------
        w0_p = jnp.pad(W0, ((0, NIP - ni), (0, 0))).astype(jnp.bfloat16)
        rw = jnp.concatenate(res_ws, axis=0).astype(jnp.bfloat16)       # (512,128)
        sb = jnp.zeros((8, HIDDEN), jnp.float32).at[0].set(b0)
        for i, bb in enumerate(res_bs):
            sb = sb.at[1 + i].set(bb)
        # Wf: feature-major/param-minor -> [tile][param][feature-in-tile], padded
        wf_np = np.zeros((HIDDEN, NTP, P_PARAMS), np.float32)
        wf_np[:, :nt, :] = np.asarray(Wf).reshape(HIDDEN, nt, P_PARAMS)
        wf_p = wf_np.reshape(HIDDEN, NTP // TF, TF, P_PARAMS)
        wf_p = wf_p.transpose(0, 1, 3, 2).reshape(HIDDEN, P_PARAMS * NTP)
        bf_np = np.zeros((NTP, P_PARAMS), np.float32)
        bf_np[:nt, :] = np.asarray(bf).reshape(nt, P_PARAMS)
        bf_p = bf_np.reshape(NTP // TF, TF, P_PARAMS)
        bf_p = bf_p.transpose(0, 2, 1).reshape(1, P_PARAMS * NTP)

        inv_perm = np.argsort(np.concatenate([id_idx, t_idx]))
        blocks.append(dict(
            id_idx=jnp.asarray(id_idx), t_idx=jnp.asarray(t_idx),
            inv_perm=jnp.asarray(inv_perm), ni=ni, nt=nt,
            w0=w0_p, rw=rw, sb=sb,
            wf=jnp.asarray(wf_p, jnp.bfloat16),
            bf=jnp.asarray(bf_p, jnp.float32)))
    return dict(NIP=NIP, NTP=NTP, blocks=blocks)


def spline_flow_log_prob(x, flow):
    B, D = x.shape
    NIP, NTP = flow["NIP"], flow["NTP"]
    call = _flow_block_callable(NIP, NTP)
    total_lad = jnp.zeros((B,), jnp.float32)
    for blk in flow["blocks"]:
        x = x[:, ::-1]                                       # ReversePermutation
        x_id = jnp.take(x, blk["id_idx"], axis=1)
        x_t = jnp.take(x, blk["t_idx"], axis=1)
        ni, nt = blk["ni"], blk["nt"]
        x_id_p = jnp.pad(x_id, ((0, 8 - B), (0, NIP - ni))).astype(jnp.bfloat16)
        x_t_p = jnp.pad(x_t, ((0, 8 - B), (0, NTP - nt)),
                        constant_values=2.0 * TAIL_BOUND)    # padded = outside tails
        y_p, lad_p = call(x_id_p, blk["w0"], blk["rw"], blk["sb"],
                          x_t_p, blk["wf"], blk["bf"])
        total_lad = total_lad + jnp.sum(lad_p[:B], axis=1)
        x = jnp.concatenate([x_id, y_p[:B, :nt]], axis=1)
        x = jnp.take(x, blk["inv_perm"], axis=1)
    ss = jnp.sum(x * x, axis=1)                              # StandardNormal
    log_z = 0.5 * D * math.log(2.0 * math.pi)
    return -0.5 * ss - log_z + total_lad


# =============================================================================
def image_flow_forward(x, backbone_params, flow_params):
    feats = backbone_forward(x, backbone_params)             # (B, 512, 4, 4) NCHW
    z = feats.reshape(feats.shape[0], -1)                    # (B, 8192)
    return spline_flow_log_prob(z, flow_params)              # (B,)


if __name__ == "__main__":
    # 256x256 input is what the module's forward implies: resnet18 backbone /32,
    # AvgPool2d(2) /2 -> 4x4 spatial, 512*4*4 = 8192 = SplineFlow in_channels.
    key = jax.random.PRNGKey(0)
    x = jax.random.normal(key, (2, 3, 256, 256), jnp.float32)

    backbone_params = init_backbone(jax.random.PRNGKey(1))
    flow_params = init_flow(jax.random.PRNGKey(2))

    log_prob = image_flow_forward(x, backbone_params, flow_params)
    log_prob = jax.block_until_ready(log_prob)

    assert log_prob.shape == (2,)
    assert bool(jnp.all(jnp.isfinite(log_prob)))
    print("KERNEL_OK")
</pallas_src>

<mosaic_0001>
module attributes {stable_mosaic.version = 11 : i64} {
  func.func @_mm_kernel_single(%arg0: i32, %arg1: i32, %arg2: memref<4096x147xbf16, #tpu.memory_space<vmem>>, %arg3: memref<147x128xbf16, #tpu.memory_space<vmem>>, %arg4: memref<1x128xf32, #tpu.memory_space<vmem>>, %arg5: memref<4096x128xbf16, #tpu.memory_space<vmem>>) attributes {dimension_semantics = [#tpu.dimension_semantics<parallel>, #tpu.dimension_semantics<parallel>], iteration_bounds = array<i64: 8, 1>, scalar_prefetch = 0 : i64, scratch_operands = 0 : i64, tpu.core_type = #tpu.core_type<tc>, window_params = [{transform_indices = @transform_0, window_bounds = array<i64: 4096, 147>}, {transform_indices = @transform_1, window_bounds = array<i64: 147, 128>}, {transform_indices = @transform_2, window_bounds = array<i64: 1, 128>}, {transform_indices = @transform_3, window_bounds = array<i64: 4096, 128>}]} {
    %c0 = arith.constant 0 : index
    %c0_0 = arith.constant 0 : index
    %0 = vector.load %arg2[%c0, %c0_0] : memref<4096x147xbf16, #tpu.memory_space<vmem>>, vector<4096x147xbf16>
    %c0_1 = arith.constant 0 : index
    %c0_2 = arith.constant 0 : index
    %1 = vector.load %arg3[%c0_1, %c0_2] : memref<147x128xbf16, #tpu.memory_space<vmem>>, vector<147x128xbf16>
    %cst = arith.constant dense<0.000000e+00> : vector<4096x128xf32>
    %2 = tpu.matmul %0, %1, %cst {dimension_numbers = #tpu.dot_dimension_numbers<[1], [0], [0], [1], [0, 0, 1, 1], [], []>} : vector<4096x147xbf16>, vector<147x128xbf16>, vector<4096x128xf32> -> vector<4096x128xf32>
    %c0_3 = arith.constant 0 : index
    %c0_4 = arith.constant 0 : index
    %3 = vector.load %arg4[%c0_3, %c0_4] : memref<1x128xf32, #tpu.memory_space<vmem>>, vector<1x128xf32>
    %4 = vector.broadcast %3 : vector<1x128xf32> to vector<4096x128xf32>
    %5 = arith.addf %2, %4 : vector<4096x128xf32>
    %cst_5 = arith.constant 0.000000e+00 : f32
    %6 = vector.broadcast %cst_5 : f32 to vector<4096x128xf32>
    %7 = arith.maximumf %5, %6 : vector<4096x128xf32>
    %8 = arith.truncf %7 : vector<4096x128xf32> to vector<4096x128xbf16>
    %c0_6 = arith.constant 0 : index
    %c0_7 = arith.constant 0 : index
    %9 = vector.load %arg5[%c0_6, %c0_7] : memref<4096x128xbf16, #tpu.memory_space<vmem>>, vector<4096x128xbf16>
    tpu.vector_store %arg5[%c0_6, %c0_7], %8 {strides = array<i32>} : memref<4096x128xbf16, #tpu.memory_space<vmem>>, vector<4096x128xbf16>,
    return
  }
  func.func @transform_0(%arg0: i32, %arg1: i32) -> (i32, i32) {
    %c0_i32 = arith.constant 0 : i32
    %c0_i32_0 = arith.constant 0 : i32
    return %arg0, %c0_i32 : i32, i32
  }
  func.func @transform_1(%arg0: i32, %arg1: i32) -> (i32, i32) {
    %c0_i32 = arith.constant 0 : i32
    %c0_i32_0 = arith.constant 0 : i32
    return %c0_i32, %arg1 : i32, i32
  }
  func.func @transform_2(%arg0: i32, %arg1: i32) -> (i32, i32) {
    %c0_i32 = arith.constant 0 : i32
    %c0_i32_0 = arith.constant 0 : i32
    return %c0_i32, %arg1 : i32, i32
  }
  func.func @transform_3(%arg0: i32, %arg1: i32) -> (i32, i32) {
    %c0_i32 = arith.constant 0 : i32
    return %arg0, %arg1 : i32, i32
  }
}

</mosaic_0001>

<bundles_post_ra>
// kernel: fn.1
= control target key start
LH: loop header
LB: loop body
LE: loop exit
PB: predicated region body
PF: predicated region fallthrough
CT: control target
= control target key end

     0   :  { %8 = vsyncpa [#allocation3], 0  ;;  %s15208_s0 = inlined_call_operand.vmem [shape: bf16[32768,147], index: 0, kind: input, shape index: {}]   ;;  %s15209_s1 = inlined_call_operand.vmem [shape: bf16[147,128], index: 1, kind: input, shape index: {}]   ;;  %s15210_s2 = inlined_call_operand.vmem [shape: f32[1,128], index: 2, kind: input, shape index: {}]   ;;  %s15211_s3 = inlined_call_operand.hbm [shape: bf16[32768,128], index: 3, kind: output, shape index: {}]  }
   0x1   :  { %10 = vsyncpa [#allocation3 + $0x1], 0  ;;  %s13485_s12 = smov 0   ;;  %s13487_s13 = smov 0  }
   0x2   :  { %s13489_s14 = smov 0   ;;  %s13491_s15 = smov 0  }
   0x3   :  { %s13493_s16 = smov 0   ;;  %s13495_s17 = smov 0  }
   0x4 LB: > { %s9163_s18 = sadd.s32 4294967295, %s13458_s17   ;;  %s9164_s19 = sadd.s32 4294967294, %s13458_s17   ;;  %s13458_s17 = sphi %s13495_s17, %s16_s17   ;;  %s13454_s16 = sphi %s13493_s16, %s15218_s16   ;;  %s13450_s15 = sphi %s13491_s15, %s15217_s15   ;;  %s13446_s14 = sphi %s13489_s14, %s15216_s14   ;;  %s13442_s13 = sphi %s13487_s13, %s15215_s13   ;;  %s13438_s12 = sphi %s13485_s12, %s15214_s12  }
   0x5   : > { %s28_s20 = sadd.s32 1, %s13454_s16  ;;  %s115_s21 = sadd.s32 1, %s13446_s14 }
   0x6   : > { %p30_p0 = scmp.ge.s32.totalorder %s28_s20, 8  ;;  %p125_p1 = scmp.ne.s32.totalorder %s13446_s14, %s13442_s13 }
   0x7   : > { %p126_p2 = scmp.eq.s32.totalorder %s9163_s18, 7  ;;  %p131_p3 = scmp.ne.s32.totalorder %s13442_s13, %s13438_s12 }
   0x8   : > { %s15220_s20 = smov (%p30_p0, %s28_s20), 0  ;;  %p132_p5 = scmp.eq.s32.totalorder %s9164_s19, 7 }
   0x9   : > { %p13525_p4 = por %p126_p2, %p125_p1  ;;  %s110_s23 = ssub.s32 %s13454_s16, %s15220_s20 }
   0xa   : > { %p9169_p6 = scmp.ge.s32.totalorder %s13458_s17, 1  ;;  %p113_p7 = scmp.eq.s32.totalorder %s110_s23, 0 }
   0xb   : > { %p13532_p8 = por %p132_p5, %p131_p3  ;;  %p173_p9 = scmp.lt.s32.totalorder %s13458_s17, 9 }
   0xc   : > { %s13538_s25 = scalar_select %p113_p7, %s13446_s14, %s115_s21  }
   0xd   : > { %p174_p10 = pnand %p9169_p6, %p173_p9 }
   0xe   : > { %s9171_s5 = sshll.u32 (!%p174_p10), %s13450_s15, 9  ;;  %s202_s9 = sand.u32 (!%p174_p10), 1, %s13442_s13  }
   0xf   : > { %177 = sbr.rel (%p174_p10) target bundleno = 1294 (0x50e), region = 32  ;;  %p206_p11 = scmp.lt.s32.totalorder (!%p174_p10), %s9171_s5, 4095 }
  0x10   : > { %s9170_s10 = sshll.u32 (!%p174_p10), %s202_s9, 11  ;;  %s10983_s7 = sshll.u32 (!%p174_p10), %s13450_s15, 15 }
  0x11   : > { %s13748_s18 = scalar_lea.vmem (!%p174_p10), [#allocation2], %s9170_s10  ;;  %s15155_s21 = scalar_lea.hbm (!%p174_p10), %s15211_s3, %s10983_s7 }
  0x12   : > { %s15163_s15 = scalar_lea.sflag (!%p174_p10), [#allocation3], %s202_s9  ;;  %s13462_s26 = smov (!%p174_p10), [#allocation2]  }
  0x13   : > { %s13386_s27 = sshll.u32 (!%p174_p10), %s13462_s26, 4  ;;  %s13387_s27 = int_to_ptr.vmem [resolvable:$false] %s13386_s27 }
  0x14   : > { %v12598_v0 = vld [vmem:[%s15209_s1 + $0x38] sm:$0xff]   ;;  %v13460_v1 = vmov 0   ;;  %v12599_v2 = vld [vmem:[%s15209_s1 + $0x30] sm:$0xff]   ;;  %v12600_v3 = vld [vmem:[%s15209_s1 + $0x28] sm:$0xff]   ;;  %s15222_s5 = smov (!%p206_p11, %s9171_s5), 4095  ;;  %vm3120_vm0 = vcmask 154624  }
  0x15   : > { %3896 = vmatprep.subr.bf16.mxu0 %v13460_v1  ;;  %12519 = vmatprep.subr.bf16.mxu1 %v13460_v1  ;;  %v12601_v4 = vld [vmem:[%s15209_s1 + $0x20] sm:$0xff]   ;;  %s10470_s8 = sshll.u32 %s15222_s5, 3  ;;  %v12602_v5 = vld [vmem:[%s15209_s1 + $0x18] sm:$0xff]   ;;  %v12603_v8 = vld [vmem:[%s15209_s1 + $0x10] sm:$0xff]   ;;  %vm3889_vm1 = vcmask 1040384   ;;  %vm3890_vm2 = vcmask 1041408  }
  0x16   : > { %3897 = vmatpush1.bf16.msra.mxu0 %v12598_v0  ;;  %12529 = vmatpush1.bf16.msra.mxu1 %v12598_v0  ;;  %s13556_s11 = scalar_lea.vmem %s15208_s0, %s10470_s8  ;;  %v12604_v9 = vld [vmem:[%s15209_s1 + $0x8] sm:$0xff]   ;;  %v13461_v10 = vmov 65535   ;;  %v12605_v12 = vld [vmem:[%s15209_s1] sm:$0xff]   ;;  %s9064_s8 = sshll.u32 %s13748_s18, 4  ;;  %s15157_s8 = int_to_ptr.vmem [resolvable:$true] %s9064_s8 }
  0x17   : > { %3898 = vmatprep.subr.bf16.mxu0 %v13460_v1  ;;  %12520 = vmatprep.subr.bf16.mxu1 %v13460_v1  ;;  %v12610_v6 = vld [vmem:[%s13556_s11 + $0x4] ss:$8 sps:$4 sm:$0xff]   ;;  %v3891_v11 = vsel %vm3889_vm1, 4294967295, %v13461_v10  ;;  %v12606_v13 = vld [vmem:[%s15209_s1 + $0x48] ss:$0 sps:$4 sm:$0x33]   ;;  %p13389_p1 = scmp.lt.s32.totalorder %s15157_s8, %s13387_s27 }
  0x18   : > { %v12613_v7 = vld [vmem:[%s13556_s11 + $0x804] ss:$8 sps:$4 sm:$0xff]   ;;  %9697 = vmatprep.mubr.msk.bf16.mxu0 %vm3120_vm0, %v12610_v6  ;;  %v3892_v14 = vsel %vm3890_vm2, %v3891_v11, 0  ;;  %v12608_v17 = vld [vmem:[%s13556_s11] ss:$8 sps:$4 sm:$0xff]   ;;  %s13382_s23 = scalar_lea.vmem %s15157_s8, 32768 }
  0x19   : > { %9825 = vmatprep.mubr.msk.bf16.mxu1 %vm3120_vm0, %v12613_v7  ;;  %v3894_v15 = vand.u32 %v12606_v13, %v3892_v14  ;;  %v12607_v16 = vld [vmem:[%s15209_s1 + $0x40] sm:$0xff]   ;;  %v12614_v19 = vld [vmem:[%s13556_s11 + $0x14] ss:$8 sps:$4 sm:$0xff]   ;;  %v12618_v21 = vld [vmem:[%s13556_s11 + $0x10] ss:$8 sps:$4 sm:$0xff]   ;;  %p13383_p12 = scmp.ne.s32.totalorder %s15157_s8, %s13382_s23  ;;  %s13388_s28 = scalar_lea.vmem %s13387_s27, 65536 }
  0x1a   : > { %3899 = vmatpush1.bf16.msra.mxu0 %v12599_v2  ;;  %12530 = vmatpush1.bf16.msra.mxu1 %v12599_v2  ;;  %v12611_v18 = vld [vmem:[%s13556_s11 + $0x800] ss:$8 sps:$4 sm:$0xff]   ;;  %v12616_v20 = vld [vmem:[%s13556_s11 + $0x814] ss:$8 sps:$4 sm:$0xff]   ;;  %v12619_v22 = vld [vmem:[%s13556_s11 + $0x810] ss:$8 sps:$4 sm:$0xff]   ;;  %p13390_p2 = scmp.lt.s32.totalorder %s13388_s28, %s13382_s23 }
  0x1b   : > { %3900 = vmatprep.subr.bf16.mxu0 %v13460_v1  ;;  %12521 = vmatprep.subr.bf16.mxu1 %v13460_v1  ;;  %v12620_v23 = vld [vmem:[%s13556_s11 + $0x24] ss:$8 sps:$4 sm:$0xff]   ;;  %v12624_v25 = vld [vmem:[%s13556_s11 + $0x20] ss:$8 sps:$4 sm:$0xff]   ;;  %v12626_v27 = vld [vmem:[%s13556_s11 + $0x34] ss:$8 sps:$4 sm:$0xff]   ;;  %p13384_p13 = pnand %p13383_p12, %p13525_p4 }
  0x1c   : > { %v12622_v24 = vld [vmem:[%s13556_s11 + $0x824] ss:$8 sps:$4 sm:$0xff]   ;;  %v12625_v26 = vld [vmem:[%s13556_s11 + $0x820] ss:$8 sps:$4 sm:$0xff]   ;;  %v12628_v28 = vld [vmem:[%s13556_s11 + $0x834] ss:$8 sps:$4 sm:$0xff]   ;;  %p13391_p3 = por %p13390_p2, %p13389_p1 }
  0x1d   : > { %v12630_v29 = vld [vmem:[%s13556_s11 + $0x30] ss:$8 sps:$4 sm:$0xff]   ;;  %v12632_v31 = vld [vmem:[%s13556_s11 + $0x44] ss:$8 sps:$4 sm:$0xff]   ;;  %v12636_v33 = vld [vmem:[%s13556_s11 + $0x40] ss:$8 sps:$4 sm:$0xff]   ;;  %p13385_p0 = pneg %p13384_p13 }
  0x1e   : > { %3901 = vmatpush1.bf16.msra.mxu0 %v12600_v3  ;;  %12531 = vmatpush1.bf16.msra.mxu1 %v12600_v3  ;;  %v12631_v30 = vld [vmem:[%s13556_s11 + $0x830] ss:$8 sps:$4 sm:$0xff]   ;;  %v12634_v32 = vld [vmem:[%s13556_s11 + $0x844] ss:$8 sps:$4 sm:$0xff]   ;;  %v12637_v34 = vld [vmem:[%s13556_s11 + $0x840] ss:$8 sps:$4 sm:$0xff]  }
  0x1f   : > { %3902 = vmatprep.subr.bf16.mxu0 %v13460_v1  ;;  %12522 = vmatprep.subr.bf16.mxu1 %v13460_v1  ;;  %v12638_v35 = vld [vmem:[%s13556_s11 + $0x54] ss:$8 sps:$4 sm:$0xff]   ;;  %v12642_v37 = vld [vmem:[%s13556_s11 + $0x50] ss:$8 sps:$4 sm:$0xff]   ;;  %v12644_v39 = vld [vmem:[%s13556_s11 + $0x64] ss:$8 sps:$4 sm:$0xff]   ;;  %p13392_p5 = pnand %p13391_p3, %p13385_p0 }
  0x20   : > { %v12640_v36 = vld [vmem:[%s13556_s11 + $0x854] ss:$8 sps:$4 sm:$0xff]   ;;  %v12643_v38 = vld [vmem:[%s13556_s11 + $0x850] ss:$8 sps:$4 sm:$0xff]   ;;  %v12646_v40 = vld [vmem:[%s13556_s11 + $0x864] ss:$8 sps:$4 sm:$0xff]  }
  0x21   : > { %v12648_v41 = vld [vmem:[%s13556_s11 + $0x60] ss:$8 sps:$4 sm:$0xff]   ;;  %v12650_v43 = vld [vmem:[%s13556_s11 + $0x74] ss:$8 sps:$4 sm:$0xff]   ;;  %v12654_v45 = vld [vmem:[%s13556_s11 + $0x70] ss:$8 sps:$4 sm:$0xff]  }
  0x22   : > { %3903 = vmatpush1.bf16.msra.mxu0 %v12601_v4  ;;  %12532 = vmatpush1.bf16.msra.mxu1 %v12601_v4  ;;  %v12649_v42 = vld [vmem:[%s13556_s11 + $0x860] ss:$8 sps:$4 sm:$0xff]   ;;  %v12652_v44 = vld [vmem:[%s13556_s11 + $0x874] ss:$8 sps:$4 sm:$0xff]   ;;  %v12655_v46 = vld [vmem:[%s13556_s11 + $0x870] ss:$8 sps:$4 sm:$0xff]  }
  0x23   : > { %3904 = vmatprep.subr.bf16.mxu0 %v13460_v1  ;;  %12523 = vmatprep.subr.bf16.mxu1 %v13460_v1  ;;  %v12656_v47 = vld [vmem:[%s13556_s11 + $0x84] ss:$8 sps:$4 sm:$0xff]   ;;  %v12660_v49 = vld [vmem:[%s13556_s11 + $0x80] ss:$8 sps:$4 sm:$0xff]   ;;  %v12662_v51 = vld [vmem:[%s13556_s11 + $0x94] ss:$8 sps:$4 sm:$0xff]  }
  0x24   : > { %v12658_v48 = vld [vmem:[%s13556_s11 + $0x884] ss:$8 sps:$4 sm:$0xff]   ;;  %v12661_v50 = vld [vmem:[%s13556_s11 + $0x880] ss:$8 sps:$4 sm:$0xff]   ;;  %v12664_v52 = vld [vmem:[%s13556_s11 + $0x894] ss:$8 sps:$4 sm:$0xff]  }
  0x25   : > { %v12666_v53 = vld [vmem:[%s13556_s11 + $0x90] ss:$8 sps:$4 sm:$0xff]   ;;  %v12668_v55 = vld [vmem:[%s13556_s11 + $0xa4] ss:$8 sps:$4 sm:$0xff]   ;;  %v12672_v57 = vld [vmem:[%s13556_s11 + $0xa0] ss:$8 sps:$4 sm:$0xff]  }
  0x26   : > { %3905 = vmatpush1.bf16.msra.mxu0 %v12602_v5  ;;  %12533 = vmatpush1.bf16.msra.mxu1 %v12602_v5  ;;  %v12667_v54 = vld [vmem:[%s13556_s11 + $0x890] ss:$8 sps:$4 sm:$0xff]   ;;  %v12670_v56 = vld [vmem:[%s13556_s11 + $0x8a4] ss:$8 sps:$4 sm:$0xff]   ;;  %v12673_v58 = vld [vmem:[%s13556_s11 + $0x8a0] ss:$8 sps:$4 sm:$0xff]  }
  0x27   : > { %3906 = vmatprep.subr.bf16.mxu0 %v13460_v1  ;;  %12524 = vmatprep.subr.bf16.mxu1 %v13460_v1  ;;  %v12674_v59 = vld [vmem:[%s13556_s11 + $0xb4] ss:$8 sps:$4 sm:$0xff]   ;;  %v12678_v61 = vld [vmem:[%s13556_s11 + $0xb0] ss:$8 sps:$4 sm:$0xff]   ;;  %v12680_v63 = vld [vmem:[%s13556_s11 + $0xc4] ss:$8 sps:$4 sm:$0xff]  }
  0x28   : > { %v12676_v60 = vld [vmem:[%s13556_s11 + $0x8b4] ss:$8 sps:$4 sm:$0xff]   ;;  %v12679_v62 = vld [vmem:[%s13556_s11 + $0x8b0] ss:$8 sps:$4 sm:$0xff]   ;;  %v12682_v0 = vld [vmem:[%s13556_s11 + $0x8c4] ss:$8 sps:$4 sm:$0xff]  }
  0x29   : > { %v12685_v2 = vld [vmem:[%s13556_s11 + $0x8c0] ss:$8 sps:$4 sm:$0xff]   ;;  %v12686_v3 = vld [vmem:[%s13556_s11 + $0xd4] ss:$8 sps:$4 sm:$0xff]   ;;  %v12690_v5 = vld [vmem:[%s13556_s11 + $0xd0] ss:$8 sps:$4 sm:$0xff]  }
  0x2a   : > { %3907 = vmatpush1.bf16.msra.mxu0 %v12603_v8  ;;  %12534 = vmatpush1.bf16.msra.mxu1 %v12603_v8  ;;  %v12688_v4 = vld [vmem:[%s13556_s11 + $0x8d4] ss:$8 sps:$4 sm:$0xff]   ;;  %v12691_v6 = vld [vmem:[%s13556_s11 + $0x8d0] ss:$8 sps:$4 sm:$0xff]   ;;  %v12692_v7 = vld [vmem:[%s13556_s11 + $0xe4] ss:$8 sps:$4 sm:$0xff]  }
  0x2b   : > { %3908 = vmatprep.subr.bf16.mxu0 %v13460_v1  ;;  %12525 = vmatprep.subr.bf16.mxu1 %v13460_v1  ;;  %v12694_v8 = vld [vmem:[%s13556_s11 + $0x8e4] ss:$8 sps:$4 sm:$0xff]   ;;  %v12697_v10 = vld [vmem:[%s13556_s11 + $0x8e0] ss:$8 sps:$4 sm:$0xff]   ;;  %v12698_v11 = vld [vmem:[%s13556_s11 + $0xf4] ss:$8 sps:$4 sm:$0xff]  }
  0x2c   : > { %v12702_v13 = vld [vmem:[%s13556_s11 + $0xf0] ss:$8 sps:$4 sm:$0xff]  }
  0x2d   : > { %v12703_v14 = vld [vmem:[%s13556_s11 + $0x8f0] ss:$8 sps:$4 sm:$0xff]  }
  0x2e   : > { %3909 = vmatpush1.bf16.msra.mxu0 %v12604_v9  ;;  %12535 = vmatpush1.bf16.msra.mxu1 %v12604_v9  ;;  %v12696_v9 = vld [vmem:[%s13556_s11 + $0xe0] ss:$8 sps:$4 sm:$0xff]  }
  0x2f   : > { %3910 = vmatprep.subr.bf16.mxu0 %v13460_v1  ;;  %12526 = vmatprep.subr.bf16.mxu1 %v13460_v1 }
  0x32   : > { %3911 = vmatpush1.bf16.msra.mxu0 %v12605_v12  ;;  %12536 = vmatpush1.bf16.msra.mxu1 %v12605_v12  ;;  %v12700_v12 = vld [vmem:[%s13556_s11 + $0x8f4] ss:$8 sps:$4 sm:$0xff]  }
  0x33   : > { %3924 = vmatprep.subr.bf16.mxu0 %v13460_v1  ;;  %12527 = vmatprep.subr.bf16.mxu1 %v13460_v1 }
  0x36   : > { %3925 = vmatpush2.bf16.msra.mxu0 %v3894_v15  ;;  %12537 = vmatpush2.bf16.msra.mxu1 %v3894_v15  ;;  %v12704_v15 = vld [vmem:[%s13556_s11 + $0x104] ss:$8 sps:$4 sm:$0xff]  }
  0x37   : > { %3926 = vmatprep.subr.bf16.mxu0 %v13460_v1  ;;  %12528 = vmatprep.subr.bf16.mxu1 %v13460_v1  ;;  %v12684_v1 = vld [vmem:[%s13556_s11 + $0xc0] ss:$8 sps:$4 sm:$0xff]  }
  0x3a   : > { %3927 = vmatpush2.bf16.msra.mxu0 %v12607_v16  ;;  %12538 = vmatpush2.bf16.msra.mxu1 %v12607_v16  ;;  %v12706_v16 = vld [vmem:[%s13556_s11 + $0x904] ss:$8 sps:$4 sm:$0xff]  }
  0x3d   : > { %3929 = vmatmul.mubr.bf16.vlgmr.msra.gmra.mxu0 %v12608_v17  ;;  %4953 = vmatmul.mubr.bf16.vlgmr.msra.gmra.mxu1 %v12611_v18  ;;  %v12708_v17 = vld [vmem:[%s13556_s11 + $0x100] ss:$8 sps:$4 sm:$0xff]  }
  0x3e   : > { %9698 = vmatprep.mubr.msk.bf16.mxu0 %vm3120_vm0, %v12614_v19  ;;  %9826 = vmatprep.mubr.msk.bf16.mxu1 %vm3120_vm0, %v12616_v20  ;;  %v12709_v18 = vld [vmem:[%s13556_s11 + $0x900] ss:$8 sps:$4 sm:$0xff]   ;;  %v12710_v19 = vld [vmem:[%s13556_s11 + $0x114] ss:$8 sps:$4 sm:$0xff]  }
  0x3f   : > { %v12712_v20 = vld [vmem:[%s13556_s11 + $0x914] ss:$8 sps:$4 sm:$0xff]  }
  0x45   : > { %3937 = vmatmul.mubr.bf16.gmra.mxu0 %v12618_v21  ;;  %4961 = vmatmul.mubr.bf16.gmra.mxu1 %v12619_v22  ;;  %v12714_v21 = vld [vmem:[%s13556_s11 + $0x110] ss:$8 sps:$4 sm:$0xff]  }
  0x46   : > { %9699 = vmatprep.mubr.msk.bf16.mxu0 %vm3120_vm0, %v12620_v23  ;;  %9827 = vmatprep.mubr.msk.bf16.mxu1 %vm3120_vm0, %v12622_v24  ;;  %v12715_v22 = vld [vmem:[%s13556_s11 + $0x910] ss:$8 sps:$4 sm:$0xff]   ;;  %v12716_v23 = vld [vmem:[%s13556_s11 + $0x124] ss:$8 sps:$4 sm:$0xff]  }
  0x47   : > { %v12718_v24 = vld [vmem:[%s13556_s11 + $0x924] ss:$8 sps:$4 sm:$0xff]  }
  0x4d   : > { %3945 = vmatmul.mubr.bf16.gmra.mxu0 %v12624_v25  ;;  %4969 = vmatmul.mubr.bf16.gmra.mxu1 %v12625_v26  ;;  %v12720_v25 = vld [vmem:[%s13556_s11 + $0x120] ss:$8 sps:$4 sm:$0xff]  }
  0x4e   : > { %9700 = vmatprep.mubr.msk.bf16.mxu0 %vm3120_vm0, %v12626_v27  ;;  %9828 = vmatprep.mubr.msk.bf16.mxu1 %vm3120_vm0, %v12628_v28  ;;  %v12721_v26 = vld [vmem:[%s13556_s11 + $0x920] ss:$8 sps:$4 sm:$0xff]   ;;  %v12722_v27 = vld [vmem:[%s13556_s11 + $0x134] ss:$8 sps:$4 sm:$0xff]  }
  0x4f   : > { %v12724_v28 = vld [vmem:[%s13556_s11 + $0x934] ss:$8 sps:$4 sm:$0xff]  }
  0x55   : > { %3953 = vmatmul.mubr.bf16.gmra.mxu0 %v12630_v29  ;;  %4977 = vmatmul.mubr.bf16.gmra.mxu1 %v12631_v30  ;;  %v12726_v29 = vld [vmem:[%s13556_s11 + $0x130] ss:$8 sps:$4 sm:$0xff]  }
  0x56   : > { %9701 = vmatprep.mubr.msk.bf16.mxu0 %vm3120_vm0, %v12632_v31  ;;  %9829 = vmatprep.mubr.msk.bf16.mxu1 %vm3120_vm0, %v12634_v32  ;;  %v12727_v30 = vld [vmem:[%s13556_s11 + $0x930] ss:$8 sps:$4 sm:$0xff]   ;;  %v12728_v31 = vld [vmem:[%s13556_s11 + $0x144] ss:$8 sps:$4 sm:$0xff]  }
  0x57   : > { %v12730_v32 = vld [vmem:[%s13556_s11 + $0x944] ss:$8 sps:$4 sm:$0xff]  }
  0x5d   : > { %3961 = vmatmul.mubr.bf16.gmra.mxu0 %v12636_v33  ;;  %4985 = vmatmul.mubr.bf16.gmra.mxu1 %v12637_v34  ;;  %v12732_v33 = vld [vmem:[%s13556_s11 + $0x140] ss:$8 sps:$4 sm:$0xff]  }
  0x5e   : > { %9702 = vmatprep.mubr.msk.bf16.mxu0 %vm3120_vm0, %v12638_v35  ;;  %9830 = vmatprep.mubr.msk.bf16.mxu1 %vm3120_vm0, %v12640_v36  ;;  %v12733_v34 = vld [vmem:[%s13556_s11 + $0x940] ss:$8 sps:$4 sm:$0xff]   ;;  %v12734_v35 = vld [vmem:[%s13556_s11 + $0x154] ss:$8 sps:$4 sm:$0xff]  }
  0x5f   : > { %v12736_v36 = vld [vmem:[%s13556_s11 + $0x954] ss:$8 sps:$4 sm:$0xff]  }
  0x65   : > { %3969 = vmatmul.mubr.bf16.gmra.mxu0 %v12642_v37  ;;  %4993 = vmatmul.mubr.bf16.gmra.mxu1 %v12643_v38  ;;  %v12738_v37 = vld [vmem:[%s13556_s11 + $0x150] ss:$8 sps:$4 sm:$0xff]  }
  0x66   : > { %9703 = vmatprep.mubr.msk.bf16.mxu0 %vm3120_vm0, %v12644_v39  ;;  %9831 = vmatprep.mubr.msk.bf16.mxu1 %vm3120_vm0, %v12646_v40  ;;  %v12739_v38 = vld [vmem:[%s13556_s11 + $0x950] ss:$8 sps:$4 sm:$0xff]   ;;  %v12740_v39 = vld [vmem:[%s13556_s11 + $0x164] ss:$8 sps:$4 sm:$0xff]  }
  0x67   : > { %v12742_v40 = vld [vmem:[%s13556_s11 + $0x964] ss:$8 sps:$4 sm:$0xff]  }
  0x6d   : > { %3977 = vmatmul.mubr.bf16.gmra.mxu0 %v12648_v41  ;;  %5001 = vmatmul.mubr.bf16.gmra.mxu1 %v12649_v42  ;;  %v12744_v41 = vld [vmem:[%s13556_s11 + $0x160] ss:$8 sps:$4 sm:$0xff]  }
  0x6e   : > { %9704 = vmatprep.mubr.msk.bf16.mxu0 %vm3120_vm0, %v12650_v43  ;;  %9832 = vmatprep.mubr.msk.bf16.mxu1 %vm3120_vm0, %v12652_v44  ;;  %v12745_v42 = vld [vmem:[%s13556_s11 + $0x960] ss:$8 sps:$4 sm:$0xff]   ;;  %v12746_v43 = vld [vmem:[%s13556_s11 + $0x174] ss:$8 sps:$4 sm:$0xff]  }
  0x6f   : > { %v12748_v44 = vld [vmem:[%s13556_s11 + $0x974] ss:$8 sps:$4 sm:$0xff]  }
  0x75   : > { %3985 = vmatmul.mubr.bf16.gmra.mxu0 %v12654_v45  ;;  %5009 = vmatmul.mubr.bf16.gmra.mxu1 %v12655_v46  ;;  %v12750_v45 = vld [vmem:[%s13556_s11 + $0x170] ss:$8 sps:$4 sm:$0xff]  }
  0x76   : > { %9705 = vmatprep.mubr.msk.bf16.mxu0 %vm3120_vm0, %v12656_v47  ;;  %9833 = vmatprep.mubr.msk.bf16.mxu1 %vm3120_vm0, %v12658_v48  ;;  %v12751_v46 = vld [vmem:[%s13556_s11 + $0x970] ss:$8 sps:$4 sm:$0xff]   ;;  %v12752_v47 = vld [vmem:[%s13556_s11 + $0x184] ss:$8 sps:$4 sm:$0xff]  }
  0x77   : > { %v12754_v48 = vld [vmem:[%s13556_s11 + $0x984] ss:$8 sps:$4 sm:$0xff]  }
  0x7d   : > { %3993 = vmatmul.mubr.bf16.gmra.mxu0 %v12660_v49  ;;  %5017 = vmatmul.mubr.bf16.gmra.mxu1 %v12661_v50  ;;  %v12756_v49 = vld [vmem:[%s13556_s11 + $0x180] ss:$8 sps:$4 sm:$0xff]  }
  0x7e   : > { %9706 = vmatprep.mubr.msk.bf16.mxu0 %vm3120_vm0, %v12662_v51  ;;  %9834 = vmatprep.mubr.msk.bf16.mxu1 %vm3120_vm0, %v12664_v52  ;;  %v12757_v50 = vld [vmem:[%s13556_s11 + $0x980] ss:$8 sps:$4 sm:$0xff]   ;;  %v12758_v51 = vld [vmem:[%s13556_s11 + $0x194] ss:$8 sps:$4 sm:$0xff]  }
  0x7f   : > { %v12760_v52 = vld [vmem:[%s13556_s11 + $0x994] ss:$8 sps:$4 sm:$0xff]  }
  0x85   : > { %4001 = vmatmul.mubr.bf16.gmra.mxu0 %v12666_v53  ;;  %5025 = vmatmul.mubr.bf16.gmra.mxu1 %v12667_v54  ;;  %v13731_v53 = vld [vmem:[%s15210_s2] ss:$0 sm:$0xff] }
  0x86   : > { %9707 = vmatprep.mubr.msk.bf16.mxu0 %vm3120_vm0, %v12668_v55  ;;  %9835 = vmatprep.mubr.msk.bf16.mxu1 %vm3120_vm0, %v12670_v56 }
  0x8d   : > { %4009 = vmatmul.mubr.bf16.gmra.mxu0 %v12672_v57  ;;  %5033 = vmatmul.mubr.bf16.gmra.mxu1 %v12673_v58  ;;  %v12762_v58 = vld [vmem:[%s13556_s11 + $0x190] ss:$8 sps:$4 sm:$0xff]  }
  0x8e   : > { %9708 = vmatprep.mubr.msk.bf16.mxu0 %vm3120_vm0, %v12674_v59  ;;  %9836 = vmatprep.mubr.msk.bf16.mxu1 %vm3120_vm0, %v12676_v60  ;;  %v12763_v59 = vld [vmem:[%s13556_s11 + $0x990] ss:$8 sps:$4 sm:$0xff]  }
  0x95   : > { %4017 = vmatmul.mubr.bf16.gmra.mxu0 %v12678_v61  ;;  %5041 = vmatmul.mubr.bf16.gmra.mxu1 %v12679_v62 }
  0x96   : > { %9709 = vmatprep.mubr.msk.bf16.mxu0 %vm3120_vm0, %v12680_v63  ;;  %9837 = vmatprep.mubr.msk.bf16.mxu1 %vm3120_vm0, %v12682_v0 }
  0x9d   : > { %4025 = vmatmul.mubr.bf16.gmra.mxu0 %v12684_v1  ;;  %5049 = vmatmul.mubr.bf16.gmra.mxu1 %v12685_v2  ;;  %v12764_v2 = vld [vmem:[%s13556_s11 + $0x1a4] ss:$8 sps:$4 sm:$0xff]  }
  0x9e   : > { %9710 = vmatprep.mubr.msk.bf16.mxu0 %vm3120_vm0, %v12686_v3  ;;  %9838 = vmatprep.mubr.msk.bf16.mxu1 %vm3120_vm0, %v12688_v4 }
  0xa5   : > { %4033 = vmatmul.mubr.bf16.gmra.mxu0 %v12690_v5  ;;  %5057 = vmatmul.mubr.bf16.gmra.mxu1 %v12691_v6  ;;  %v12766_v5 = vld [vmem:[%s13556_s11 + $0x9a4] ss:$8 sps:$4 sm:$0xff]  }
  0xa6   : > { %9711 = vmatprep.mubr.msk.bf16.mxu0 %vm3120_vm0, %v12692_v7  ;;  %9839 = vmatprep.mubr.msk.bf16.mxu1 %vm3120_vm0, %v12694_v8 }
  0xad   : > { %4041 = vmatmul.mubr.bf16.gmra.mxu0 %v12696_v9  ;;  %5065 = vmatmul.mubr.bf16.gmra.mxu1 %v12697_v10 }
  0xae   : > { %9712 = vmatprep.mubr.msk.bf16.mxu0 %vm3120_vm0, %v12698_v11  ;;  %9840 = vmatprep.mubr.msk.bf16.mxu1 %vm3120_vm0, %v12700_v12 }
  0xb5   : > { %4049 = vmatmul.mubr.bf16.gmra.mxu0 %v12702_v13  ;;  %5073 = vmatmul.mubr.bf16.gmra.mxu1 %v12703_v14 }
  0xb6   : > { %9713 = vmatprep.mubr.msk.bf16.mxu0 %vm3120_vm0, %v12704_v15  ;;  %9841 = vmatprep.mubr.msk.bf16.mxu1 %vm3120_vm0, %v12706_v16 }
  0xbd   : > { %4057 = vmatmul.mubr.bf16.gmra.mxu0 %v12708_v17  ;;  %5081 = vmatmul.mubr.bf16.gmra.mxu1 %v12709_v18 }
  0xbe   : > { %9714 = vmatprep.mubr.msk.bf16.mxu0 %vm3120_vm0, %v12710_v19  ;;  %9842 = vmatprep.mubr.msk.bf16.mxu1 %vm3120_vm0, %v12712_v20  ;;  %v12768_v20 = vld [vmem:[%s13556_s11 + $0x1a0] ss:$8 sps:$4 sm:$0xff]  }
  0xc5   : > { %4065 = vmatmul.mubr.bf16.gmra.mxu0 %v12714_v21  ;;  %5089 = vmatmul.mubr.bf16.gmra.mxu1 %v12715_v22  ;;  %v12769_v21 = vld [vmem:[%s13556_s11 + $0x9a0] ss:$8 sps:$4 sm:$0xff]  }
  0xc6   : > { %9715 = vmatprep.mubr.msk.bf16.mxu0 %vm3120_vm0, %v12716_v23  ;;  %9843 = vmatprep.mubr.msk.bf16.mxu1 %vm3120_vm0, %v12718_v24  ;;  %v12770_v24 = vld [vmem:[%s13556_s11 + $0x1b4] ss:$8 sps:$4 sm:$0xff]  }
  0xcd   : > { %4073 = vmatmul.mubr.bf16.gmra.mxu0 %v12720_v25  ;;  %5097 = vmatmul.mubr.bf16.gmra.mxu1 %v12721_v26 }
  0xce   : > { %9716 = vmatprep.mubr.msk.bf16.mxu0 %vm3120_vm0, %v12722_v27  ;;  %9844 = vmatprep.mubr.msk.bf16.mxu1 %vm3120_vm0, %v12724_v28  ;;  %v12772_v27 = vld [vmem:[%s13556_s11 + $0x9b4] ss:$8 sps:$4 sm:$0xff]  }
  0xd5   : > { %4081 = vmatmul.mubr.bf16.gmra.mxu0 %v12726_v29  ;;  %5105 = vmatmul.mubr.bf16.gmra.mxu1 %v12727_v30 }
  0xd6   : > { %9717 = vmatprep.mubr.msk.bf16.mxu0 %vm3120_vm0, %v12728_v31  ;;  %9845 = vmatprep.mubr.msk.bf16.mxu1 %vm3120_vm0, %v12730_v32 }
  0xdd   : > { %4089 = vmatmul.mubr.bf16.gmra.mxu0 %v12732_v33  ;;  %5113 = vmatmul.mubr.bf16.gmra.mxu1 %v12733_v34 }
  0xde   : > { %9718 = vmatprep.mubr.msk.bf16.mxu0 %vm3120_vm0, %v12734_v35  ;;  %9846 = vmatprep.mubr.msk.bf16.mxu1 %vm3120_vm0, %v12736_v36 }
  0xe5   : > { %4097 = vmatmul.mubr.bf16.gmra.mxu0 %v12738_v37  ;;  %5121 = vmatmul.mubr.bf16.gmra.mxu1 %v12739_v38 }
  0xe6   : > { %9719 = vmatprep.mubr.msk.bf16.mxu0 %vm3120_vm0, %v12740_v39  ;;  %9847 = vmatprep.mubr.msk.bf16.mxu1 %vm3120_vm0, %v12742_v40 }
  0xed   : > { %4105 = vmatmul.mubr.bf16.gmra.mxu0 %v12744_v41  ;;  %5129 = vmatmul.mubr.bf16.gmra.mxu1 %v12745_v42  ;;  %v12774_v42 = vld [vmem:[%s13556_s11 + $0x1b0] ss:$8 sps:$4 sm:$0xff]  }
  0xee   : > { %9720 = vmatprep.mubr.msk.bf16.mxu0 %vm3120_vm0, %v12746_v43  ;;  %9848 = vmatprep.mubr.msk.bf16.mxu1 %vm3120_vm0, %v12748_v44  ;;  %v12775_v43 = vld [vmem:[%s13556_s11 + $0x9b0] ss:$8 sps:$4 sm:$0xff]  }
  0xf5   : > { %4113 = vmatmul.mubr.bf16.gmra.mxu0 %v12750_v45  ;;  %5137 = vmatmul.mubr.bf16.gmra.mxu1 %v12751_v46  ;;  %v12776_v46 = vld [vmem:[%s13556_s11 + $0x1c4] ss:$8 sps:$4 sm:$0xff]  }
  0xf6   : > { %9721 = vmatprep.mubr.msk.bf16.mxu0 %vm3120_vm0, %v12752_v47  ;;  %9849 = vmatprep.mubr.msk.bf16.mxu1 %vm3120_vm0, %v12754_v48 }
  0xfd   : > { %v3930_v54 = vpop.f32.mrf.mxu0  ;;  %4121 = vmatmul.mubr.bf16.gmra.mxu0 %v12756_v49  ;;  %v4954_v55 = vpop.f32.mrf.mxu1  ;;  %5145 = vmatmul.mubr.bf16.gmra.mxu1 %v12757_v50  ;;  %v12778_v49 = vld [vmem:[%s13556_s11 + $0x9c4] ss:$8 sps:$4 sm:$0xff]  }
  0xfe   : > { %9722 = vmatprep.mubr.msk.bf16.mxu0 %vm3120_vm0, %v12758_v51  ;;  %9850 = vmatprep.mubr.msk.bf16.mxu1 %vm3120_vm0, %v12760_v52  ;;  %v3931_v60 = vadd.f32 %v13731_v53, %v3930_v54  ;;  %v4955_v61 = vadd.f32 %v13731_v53, %v4954_v55 }
  0xff   : > { %v3932_v56 = vpop.f32.mrf.mxu0  ;;  %v4956_v57 = vpop.f32.mrf.mxu1 }
 0x100   : > { %v5977_v6 = vmax.f32 %v3931_v60, 0.0  ;;  %v6233_v7 = vmax.f32 %v4955_v61, 0.0 }
 0x101   : > { %v3933_v62 = vpop.f32.mrf.mxu0  ;;  %v4957_v63 = vpop.f32.mrf.mxu1 }
 0x102   : > { %v3934_v0 = vadd.f32 %v13731_v53, %v3933_v62  ;;  %v4958_v1 = vadd.f32 %v13731_v53, %v4957_v63 }
 0x103   : > { %v3935_v3 = vpop.f32.mrf.mxu0  ;;  %v4959_v4 = vpop.f32.mrf.mxu1 }
 0x104   : > { %v5978_v8 = vmax.f32 %v3934_v0, 0.0  ;;  %v6234_v9 = vmax.f32 %v4958_v1, 0.0  ;;  %v12780_v1 = vld [vmem:[%s13556_s11 + $0x1c0] ss:$8 sps:$4 sm:$0xff]  }
 0x105   : > { %v3938_v10 = vpop.f32.mrf.mxu0  ;;  %4129 = vmatmul.mubr.bf16.gmra.mxu0 %v12762_v58  ;;  %v4962_v11 = vpop.f32.mrf.mxu1  ;;  %5153 = vmatmul.mubr.bf16.gmra.mxu1 %v12763_v59 }
 0x106   : > { %v10987_v12 = vpack.c.bf16 %v5978_v8, %v5977_v6  ;;  %v11627_v13 = vpack.c.bf16 %v6234_v9, %v6233_v7  ;;  %9723 = vmatprep.mubr.msk.bf16.mxu0 %vm3120_vm0, %v12764_v2  ;;  %9851 = vmatprep.mubr.msk.bf16.mxu1 %vm3120_vm0, %v12766_v5  ;;  %v3939_v16 = vadd.f32 %v13731_v53, %v3938_v10  ;;  %v12781_v2 = vld [vmem:[%s13556_s11 + $0x9c0] ss:$8 sps:$4 sm:$0xff]   ;;  %v12782_v5 = vld [vmem:[%s13556_s11 + $0x1d4] ss:$8 sps:$4 sm:$0xff]  }
 0x107   : > { %v3940_v14 = vpop.f32.mrf.mxu0  ;;  %v4964_v15 = vpop.f32.mrf.mxu1  ;;  %v4963_v17 = vadd.f32 %v13731_v53, %v4962_v11  ;;  %v12784_v8 = vld [vmem:[%s13556_s11 + $0x9d4] ss:$8 sps:$4 sm:$0xff]  }
 0x108   : > { %10988 = vst [vmem:[%s13748_s18] sm:$0xff] %v10987_v12   ;;  %12391 = vst [vmem:[%s13748_s18 + $0x400] sm:$0xff] %v11627_v13   ;;  %v5979_v28 = vmax.f32 %v3939_v16, 0.0 }
 0x109   : > { %v3941_v18 = vpop.f32.mrf.mxu0  ;;  %v4965_v19 = vpop.f32.mrf.mxu1  ;;  %v6235_v29 = vmax.f32 %v4963_v17, 0.0 }
 0x10a   : > { %v3942_v22 = vadd.f32 %v13731_v53, %v3941_v18  ;;  %v4966_v23 = vadd.f32 %v13731_v53, %v4965_v19 }
 0x10b   : > { %v3943_v25 = vpop.f32.mrf.mxu0  ;;  %v4967_v26 = vpop.f32.mrf.mxu1 }
 0x10c   : > { %v5980_v30 = vmax.f32 %v3942_v22, 0.0  ;;  %v6236_v31 = vmax.f32 %v4966_v23, 0.0  ;;  %v12786_v23 = vld [vmem:[%s13556_s11 + $0x1d0] ss:$8 sps:$4 sm:$0xff]  }
 0x10d   : > { %v3946_v32 = vpop.f32.mrf.mxu0  ;;  %4137 = vmatmul.mubr.bf16.gmra.mxu0 %v12768_v20  ;;  %v4970_v33 = vpop.f32.mrf.mxu1  ;;  %5161 = vmatmul.mubr.bf16.gmra.mxu1 %v12769_v21 }
 0x10e   : > { %v10992_v34 = vpack.c.bf16 %v5980_v30, %v5979_v28  ;;  %v11632_v35 = vpack.c.bf16 %v6236_v31, %v6235_v29  ;;  %9724 = vmatprep.mubr.msk.bf16.mxu0 %vm3120_vm0, %v12770_v24  ;;  %9852 = vmatprep.mubr.msk.bf16.mxu1 %vm3120_vm0, %v12772_v27  ;;  %v3947_v38 = vadd.f32 %v13731_v53, %v3946_v32  ;;  %v12787_v24 = vld [vmem:[%s13556_s11 + $0x9d0] ss:$8 sps:$4 sm:$0xff]   ;;  %v12788_v27 = vld [vmem:[%s13556_s11 + $0x1e4] ss:$8 sps:$4 sm:$0xff]  }
 0x10f   : > { %v3948_v36 = vpop.f32.mrf.mxu0  ;;  %v4972_v37 = vpop.f32.mrf.mxu1  ;;  %v4971_v39 = vadd.f32 %v13731_v53, %v4970_v33  ;;  %v12790_v30 = vld [vmem:[%s13556_s11 + $0x9e4] ss:$8 sps:$4 sm:$0xff]  }
 0x110   : > { %12264 = vst [vmem:[%s13748_s18 + $0x8] sm:$0xff] %v10992_v34   ;;  %12392 = vst [vmem:[%s13748_s18 + $0x408] sm:$0xff] %v11632_v35   ;;  %v5981_v50 = vmax.f32 %v3947_v38, 0.0 }
 0x111   : > { %v3949_v40 = vpop.f32.mrf.mxu0  ;;  %v4973_v41 = vpop.f32.mrf.mxu1  ;;  %v6237_v51 = vmax.f32 %v4971_v39, 0.0 }
 0x112   : > { %v3950_v44 = vadd.f32 %v13731_v53, %v3949_v40  ;;  %v4974_v45 = vadd.f32 %v13731_v53, %v4973_v41 }
 0x113   : > { %v3951_v47 = vpop.f32.mrf.mxu0  ;;  %v4975_v48 = vpop.f32.mrf.mxu1 }
 0x114   : > { %v5982_v52 = vmax.f32 %v3950_v44, 0.0  ;;  %v6238_v54 = vmax.f32 %v4974_v45, 0.0  ;;  %v12792_v45 = vld [vmem:[%s13556_s11 + $0x1e0] ss:$8 sps:$4 sm:$0xff]  }
 0x115   : > { %v3954_v55 = vpop.f32.mrf.mxu0  ;;  %4145 = vmatmul.mubr.bf16.gmra.mxu0 %v12774_v42  ;;  %v4978_v56 = vpop.f32.mrf.mxu1  ;;  %5169 = vmatmul.mubr.bf16.gmra.mxu1 %v12775_v43 }
 0x116   : > { %v10997_v57 = vpack.c.bf16 %v5982_v52, %v5981_v50  ;;  %v11637_v58 = vpack.c.bf16 %v6238_v54, %v6237_v51  ;;  %9725 = vmatprep.mubr.msk.bf16.mxu0 %vm3120_vm0, %v12776_v46  ;;  %9853 = vmatprep.mubr.msk.bf16.mxu1 %vm3120_vm0, %v12778_v49  ;;  %v3955_v61 = vadd.f32 %v13731_v53, %v3954_v55  ;;  %v12793_v46 = vld [vmem:[%s13556_s11 + $0x9e0] ss:$8 sps:$4 sm:$0xff]   ;;  %v12794_v49 = vld [vmem:[%s13556_s11 + $0x1f4] ss:$8 sps:$4 sm:$0xff]  }
 0x117   : > { %v3956_v59 = vpop.f32.mrf.mxu0  ;;  %v4980_v60 = vpop.f32.mrf.mxu1  ;;  %v4979_v62 = vadd.f32 %v13731_v53, %v4978_v56  ;;  %v12796_v52 = vld [vmem:[%s13556_s11 + $0x9f4] ss:$8 sps:$4 sm:$0xff]  }
 0x118   : > { %12265 = vst [vmem:[%s13748_s18 + $0x10] sm:$0xff] %v10997_v57   ;;  %12393 = vst [vmem:[%s13748_s18 + $0x410] sm:$0xff] %v11637_v58   ;;  %v5983_v9 = vmax.f32 %v3955_v61, 0.0 }
 0x119   : > { %v3957_v63 = vpop.f32.mrf.mxu0  ;;  %v4981_v0 = vpop.f32.mrf.mxu1  ;;  %v6239_v10 = vmax.f32 %v4979_v62, 0.0 }
 0x11a   : > { %v3958_v3 = vadd.f32 %v13731_v53, %v3957_v63  ;;  %v4982_v4 = vadd.f32 %v13731_v53, %v4981_v0 }
 0x11b   : > { %v3959_v6 = vpop.f32.mrf.mxu0  ;;  %v4983_v7 = vpop.f32.mrf.mxu1 }
 0x11c   : > { %v5984_v11 = vmax.f32 %v3958_v3, 0.0  ;;  %v6240_v12 = vmax.f32 %v4982_v4, 0.0  ;;  %v12798_v4 = vld [vmem:[%s13556_s11 + $0x1f0] ss:$8 sps:$4 sm:$0xff]  }
 0x11d   : > { %v3962_v13 = vpop.f32.mrf.mxu0  ;;  %4153 = vmatmul.mubr.bf16.gmra.mxu0 %v12780_v1  ;;  %v4986_v14 = vpop.f32.mrf.mxu1  ;;  %5177 = vmatmul.mubr.bf16.gmra.mxu1 %v12781_v2 }
 0x11e   : > { %v11002_v15 = vpack.c.bf16 %v5984_v11, %v5983_v9  ;;  %v11642_v16 = vpack.c.bf16 %v6240_v12, %v6239_v10  ;;  %9726 = vmatprep.mubr.msk.bf16.mxu0 %vm3120_vm0, %v12782_v5  ;;  %9854 = vmatprep.mubr.msk.bf16.mxu1 %vm3120_vm0, %v12784_v8  ;;  %v3963_v19 = vadd.f32 %v13731_v53, %v3962_v13  ;;  %v12799_v5 = vld [vmem:[%s13556_s11 + $0x9f0] ss:$8 sps:$4 sm:$0xff]   ;;  %v12800_v8 = vld [vmem:[%s13556_s11 + $0x204] ss:$8 sps:$4 sm:$0xff]  }
 0x11f   : > { %v3964_v17 = vpop.f32.mrf.mxu0  ;;  %v4988_v18 = vpop.f32.mrf.mxu1  ;;  %v4987_v20 = vadd.f32 %v13731_v53, %v4986_v14  ;;  %v12802_v11 = vld [vmem:[%s13556_s11 + $0xa04] ss:$8 sps:$4 sm:$0xff]  }
 0x120   : > { %12266 = vst [vmem:[%s13748_s18 + $0x18] sm:$0xff] %v11002_v15   ;;  %12394 = vst [vmem:[%s13748_s18 + $0x418] sm:$0xff] %v11642_v16   ;;  %v5985_v31 = vmax.f32 %v3963_v19, 0.0 }
 0x121   : > { %v3965_v21 = vpop.f32.mrf.mxu0  ;;  %v4989_v22 = vpop.f32.mrf.mxu1  ;;  %v6241_v32 = vmax.f32 %v4987_v20, 0.0 }
 0x122   : > { %v3966_v25 = vadd.f32 %v13731_v53, %v3965_v21  ;;  %v4990_v26 = vadd.f32 %v13731_v53, %v4989_v22 }
 0x123   : > { %v3967_v28 = vpop.f32.mrf.mxu0  ;;  %v4991_v29 = vpop.f32.mrf.mxu1 }
 0x124   : > { %v5986_v33 = vmax.f32 %v3966_v25, 0.0  ;;  %v6242_v34 = vmax.f32 %v4990_v26, 0.0  ;;  %v12804_v26 = vld [vmem:[%s13556_s11 + $0x200] ss:$8 sps:$4 sm:$0xff]  }
 0x125   : > { %v3970_v35 = vpop.f32.mrf.mxu0  ;;  %4161 = vmatmul.mubr.bf16.gmra.mxu0 %v12786_v23  ;;  %v4994_v36 = vpop.f32.mrf.mxu1  ;;  %5185 = vmatmul.mubr.bf16.gmra.mxu1 %v12787_v24 }
 0x126   : > { %v11007_v37 = vpack.c.bf16 %v5986_v33, %v5985_v31  ;;  %v11647_v38 = vpack.c.bf16 %v6242_v34, %v6241_v32  ;;  %9727 = vmatprep.mubr.msk.bf16.mxu0 %vm3120_vm0, %v12788_v27  ;;  %9855 = vmatprep.mubr.msk.bf16.mxu1 %vm3120_vm0, %v12790_v30  ;;  %v3971_v41 = vadd.f32 %v13731_v53, %v3970_v35  ;;  %v12805_v27 = vld [vmem:[%s13556_s11 + $0xa00] ss:$8 sps:$4 sm:$0xff]   ;;  %v12806_v30 = vld [vmem:[%s13556_s11 + $0x214] ss:$8 sps:$4 sm:$0xff]  }
 0x127   : > { %v3972_v39 = vpop.f32.mrf.mxu0  ;;  %v4996_v40 = vpop.f32.mrf.mxu1  ;;  %v4995_v42 = vadd.f32 %v13731_v53, %v4994_v36  ;;  %v12808_v33 = vld [vmem:[%s13556_s11 + $0xa14] ss:$8 sps:$4 sm:$0xff]  }
 0x128   : > { %12267 = vst [vmem:[%s13748_s18 + $0x20] sm:$0xff] %v11007_v37   ;;  %12395 = vst [vmem:[%s13748_s18 + $0x420] sm:$0xff] %v11647_v38   ;;  %v5987_v54 = vmax.f32 %v3971_v41, 0.0 }
 0x129   : > { %v3973_v43 = vpop.f32.mrf.mxu0  ;;  %v4997_v44 = vpop.f32.mrf.mxu1  ;;  %v6243_v55 = vmax.f32 %v4995_v42, 0.0 }
 0x12a   : > { %v3974_v47 = vadd.f32 %v13731_v53, %v3973_v43  ;;  %v4998_v48 = vadd.f32 %v13731_v53, %v4997_v44 }
 0x12b   : > { %v3975_v50 = vpop.f32.mrf.mxu0  ;;  %v4999_v51 = vpop.f32.mrf.mxu1 }
 0x12c   : > { %v5988_v56 = vmax.f32 %v3974_v47, 0.0  ;;  %v6244_v57 = vmax.f32 %v4998_v48, 0.0  ;;  %v12810_v48 = vld [vmem:[%s13556_s11 + $0x210] ss:$8 sps:$4 sm:$0xff]  }
 0x12d   : > { %v3978_v58 = vpop.f32.mrf.mxu0  ;;  %4169 = vmatmul.mubr.bf16.gmra.mxu0 %v12792_v45  ;;  %v5002_v59 = vpop.f32.mrf.mxu1  ;;  %5193 = vmatmul.mubr.bf16.gmra.mxu1 %v12793_v46 }
 0x12e   : > { %v11012_v60 = vpack.c.bf16 %v5988_v56, %v5987_v54  ;;  %v11652_v61 = vpack.c.bf16 %v6244_v57, %v6243_v55  ;;  %9728 = vmatprep.mubr.msk.bf16.mxu0 %vm3120_vm0, %v12794_v49  ;;  %9856 = vmatprep.mubr.msk.bf16.mxu1 %vm3120_vm0, %v12796_v52  ;;  %v3979_v0 = vadd.f32 %v13731_v53, %v3978_v58  ;;  %v12811_v49 = vld [vmem:[%s13556_s11 + $0xa10] ss:$8 sps:$4 sm:$0xff]   ;;  %v12812_v52 = vld [vmem:[%s13556_s11 + $0x224] ss:$8 sps:$4 sm:$0xff]  }
 0x12f   : > { %v3980_v62 = vpop.f32.mrf.mxu0  ;;  %v5004_v63 = vpop.f32.mrf.mxu1  ;;  %v5003_v1 = vadd.f32 %v13731_v53, %v5002_v59  ;;  %v12814_v56 = vld [vmem:[%s13556_s11 + $0xa24] ss:$8 sps:$4 sm:$0xff]  }
 0x130   : > { %12268 = vst [vmem:[%s13748_s18 + $0x28] sm:$0xff] %v11012_v60   ;;  %12396 = vst [vmem:[%s13748_s18 + $0x428] sm:$0xff] %v11652_v61   ;;  %v5989_v12 = vmax.f32 %v3979_v0, 0.0 }
 0x131   : > { %v3981_v2 = vpop.f32.mrf.mxu0  ;;  %v5005_v3 = vpop.f32.mrf.mxu1  ;;  %v6245_v13 = vmax.f32 %v5003_v1, 0.0 }
 0x132   : > { %v3982_v6 = vadd.f32 %v13731_v53, %v3981_v2  ;;  %v5006_v7 = vadd.f32 %v13731_v53, %v5005_v3 }
 0x133   : > { %v3983_v9 = vpop.f32.mrf.mxu0  ;;  %v5007_v10 = vpop.f32.mrf.mxu1 }
 0x134   : > { %v5990_v14 = vmax.f32 %v3982_v6, 0.0  ;;  %v6246_v15 = vmax.f32 %v5006_v7, 0.0  ;;  %v12816_v7 = vld [vmem:[%s13556_s11 + $0x220] ss:$8 sps:$4 sm:$0xff]  }
 0x135   : > { %v3986_v16 = vpop.f32.mrf.mxu0  ;;  %4177 = vmatmul.mubr.bf16.gmra.mxu0 %v12798_v4  ;;  %v5010_v17 = vpop.f32.mrf.mxu1  ;;  %5201 = vmatmul.mubr.bf16.gmra.mxu1 %v12799_v5 }
 0x136   : > { %v11017_v18 = vpack.c.bf16 %v5990_v14, %v5989_v12  ;;  %v11657_v19 = vpack.c.bf16 %v6246_v15, %v6245_v13  ;;  %9729 = vmatprep.mubr.msk.bf16.mxu0 %vm3120_vm0, %v12800_v8  ;;  %9857 = vmatprep.mubr.msk.bf16.mxu1 %vm3120_vm0, %v12802_v11  ;;  %v3987_v22 = vadd.f32 %v13731_v53, %v3986_v16  ;;  %v12817_v8 = vld [vmem:[%s13556_s11 + $0xa20] ss:$8 sps:$4 sm:$0xff]   ;;  %v12818_v11 = vld [vmem:[%s13556_s11 + $0x234] ss:$8 sps:$4 sm:$0xff]  }
 0x137   : > { %v3988_v20 = vpop.f32.mrf.mxu0  ;;  %v5012_v21 = vpop.f32.mrf.mxu1  ;;  %v5011_v23 = vadd.f32 %v13731_v53, %v5010_v17  ;;  %v12820_v14 = vld [vmem:[%s13556_s11 + $0xa34] ss:$8 sps:$4 sm:$0xff]  }
 0x138   : > { %12269 = vst [vmem:[%s13748_s18 + $0x30] sm:$0xff] %v11017_v18   ;;  %12397 = vst [vmem:[%s13748_s18 + $0x430] sm:$0xff] %v11657_v19   ;;  %v5991_v34 = vmax.f32 %v3987_v22, 0.0 }
 0x139   : > { %v3989_v24 = vpop.f32.mrf.mxu0  ;;  %v5013_v25 = vpop.f32.mrf.mxu1  ;;  %v6247_v35 = vmax.f32 %v5011_v23, 0.0 }
 0x13a   : > { %v3990_v28 = vadd.f32 %v13731_v53, %v3989_v24  ;;  %v5014_v29 = vadd.f32 %v13731_v53, %v5013_v25 }
 0x13b   : > { %v3991_v31 = vpop.f32.mrf.mxu0  ;;  %v5015_v32 = vpop.f32.mrf.mxu1 }
 0x13c   : > { %v5992_v36 = vmax.f32 %v3990_v28, 0.0  ;;  %v6248_v37 = vmax.f32 %v5014_v29, 0.0  ;;  %v12822_v29 = vld [vmem:[%s13556_s11 + $0x230] ss:$8 sps:$4 sm:$0xff]  }
 0x13d   : > { %v3994_v38 = vpop.f32.mrf.mxu0  ;;  %4185 = vmatmul.mubr.bf16.gmra.mxu0 %v12804_v26  ;;  %v5018_v39 = vpop.f32.mrf.mxu1  ;;  %5209 = vmatmul.mubr.bf16.gmra.mxu1 %v12805_v27 }
 0x13e   : > { %v11022_v40 = vpack.c.bf16 %v5992_v36, %v5991_v34  ;;  %v11662_v41 = vpack.c.bf16 %v6248_v37, %v6247_v35  ;;  %9730 = vmatprep.mubr.msk.bf16.mxu0 %vm3120_vm0, %v12806_v30  ;;  %9858 = vmatprep.mubr.msk.bf16.mxu1 %vm3120_vm0, %v12808_v33  ;;  %v3995_v44 = vadd.f32 %v13731_v53, %v3994_v38  ;;  %v12823_v30 = vld [vmem:[%s13556_s11 + $0xa30] ss:$8 sps:$4 sm:$0xff]   ;;  %v12824_v33 = vld [vmem:[%s13556_s11 + $0x244] ss:$8 sps:$4 sm:$0xff]  }
 0x13f   : > { %v3996_v42 = vpop.f32.mrf.mxu0  ;;  %v5020_v43 = vpop.f32.mrf.mxu1  ;;  %v5019_v45 = vadd.f32 %v13731_v53, %v5018_v39  ;;  %v12826_v36 = vld [vmem:[%s13556_s11 + $0xa44] ss:$8 sps:$4 sm:$0xff]  }
 0x140   : > { %12270 = vst [vmem:[%s13748_s18 + $0x38] sm:$0xff] %v11022_v40   ;;  %12398 = vst [vmem:[%s13748_s18 + $0x438] sm:$0xff] %v11662_v41   ;;  %v5993_v57 = vmax.f32 %v3995_v44, 0.0 }
 0x141   : > { %v3997_v46 = vpop.f32.mrf.mxu0  ;;  %v5021_v47 = vpop.f32.mrf.mxu1  ;;  %v6249_v58 = vmax.f32 %v5019_v45, 0.0 }
 0x142   : > { %v3998_v50 = vadd.f32 %v13731_v53, %v3997_v46  ;;  %v5022_v51 = vadd.f32 %v13731_v53, %v5021_v47 }
 0x143   : > { %v3999_v54 = vpop.f32.mrf.mxu0  ;;  %v5023_v55 = vpop.f32.mrf.mxu1 }
 0x144   : > { %v5994_v59 = vmax.f32 %v3998_v50, 0.0  ;;  %v6250_v60 = vmax.f32 %v5022_v51, 0.0  ;;  %v12828_v51 = vld [vmem:[%s13556_s11 + $0x240] ss:$8 sps:$4 sm:$0xff]  }
 0x145   : > { %v4002_v61 = vpop.f32.mrf.mxu0  ;;  %4193 = vmatmul.mubr.bf16.gmra.mxu0 %v12810_v48  ;;  %v5026_v62 = vpop.f32.mrf.mxu1  ;;  %5217 = vmatmul.mubr.bf16.gmra.mxu1 %v12811_v49 }
 0x146   : > { %v11027_v63 = vpack.c.bf16 %v5994_v59, %v5993_v57  ;;  %v11667_v0 = vpack.c.bf16 %v6250_v60, %v6249_v58  ;;  %9731 = vmatprep.mubr.msk.bf16.mxu0 %vm3120_vm0, %v12812_v52  ;;  %9859 = vmatprep.mubr.msk.bf16.mxu1 %vm3120_vm0, %v12814_v56  ;;  %v4003_v3 = vadd.f32 %v13731_v53, %v4002_v61  ;;  %v12829_v52 = vld [vmem:[%s13556_s11 + $0xa40] ss:$8 sps:$4 sm:$0xff]   ;;  %v12830_v56 = vld [vmem:[%s13556_s11 + $0x254] ss:$8 sps:$4 sm:$0xff]  }
 0x147   : > { %v4004_v1 = vpop.f32.mrf.mxu0  ;;  %v5028_v2 = vpop.f32.mrf.mxu1  ;;  %v5027_v4 = vadd.f32 %v13731_v53, %v5026_v62  ;;  %v12832_v59 = vld [vmem:[%s13556_s11 + $0xa54] ss:$8 sps:$4 sm:$0xff]  }
 0x148   : > { %12271 = vst [vmem:[%s13748_s18 + $0x40] sm:$0xff] %v11027_v63   ;;  %12399 = vst [vmem:[%s13748_s18 + $0x440] sm:$0xff] %v11667_v0   ;;  %v5995_v15 = vmax.f32 %v4003_v3, 0.0 }
 0x149   : > { %v4005_v5 = vpop.f32.mrf.mxu0  ;;  %v5029_v6 = vpop.f32.mrf.mxu1  ;;  %v6251_v16 = vmax.f32 %v5027_v4, 0.0 }
 0x14a   : > { %v4006_v9 = vadd.f32 %v13731_v53, %v4005_v5  ;;  %v5030_v10 = vadd.f32 %v13731_v53, %v5029_v6 }
 0x14b   : > { %v4007_v12 = vpop.f32.mrf.mxu0  ;;  %v5031_v13 = vpop.f32.mrf.mxu1 }
 0x14c   : > { %v5996_v17 = vmax.f32 %v4006_v9, 0.0  ;;  %v6252_v18 = vmax.f32 %v5030_v10, 0.0  ;;  %v12834_v10 = vld [vmem:[%s13556_s11 + $0x250] ss:$8 sps:$4 sm:$0xff]  }
 0x14d   : > { %v4010_v19 = vpop.f32.mrf.mxu0  ;;  %4201 = vmatmul.mubr.bf16.gmra.mxu0 %v12816_v7  ;;  %v5034_v20 = vpop.f32.mrf.mxu1  ;;  %5225 = vmatmul.mubr.bf16.gmra.mxu1 %v12817_v8 }
 0x14e   : > { %v11032_v21 = vpack.c.bf16 %v5996_v17, %v5995_v15  ;;  %v11672_v22 = vpack.c.bf16 %v6252_v18, %v6251_v16  ;;  %9732 = vmatprep.mubr.msk.bf16.mxu0 %vm3120_vm0, %v12818_v11  ;;  %9860 = vmatprep.mubr.msk.bf16.mxu1 %vm3120_vm0, %v12820_v14  ;;  %v4011_v25 = vadd.f32 %v13731_v53, %v4010_v19  ;;  %v12835_v11 = vld [vmem:[%s13556_s11 + $0xa50] ss:$8 sps:$4 sm:$0xff]   ;;  %v12836_v14 = vld [vmem:[%s13556_s11 + $0x264] ss:$8 sps:$4 sm:$0xff]  }
 0x14f   : > { %v4012_v23 = vpop.f32.mrf.mxu0  ;;  %v5036_v24 = vpop.f32.mrf.mxu1  ;;  %v5035_v26 = vadd.f32 %v13731_v53, %v5034_v20  ;;  %v12838_v17 = vld [vmem:[%s13556_s11 + $0xa64] ss:$8 sps:$4 sm:$0xff]  }
 0x150   : > { %12272 = vst [vmem:[%s13748_s18 + $0x48] sm:$0xff] %v11032_v21   ;;  %12400 = vst [vmem:[%s13748_s18 + $0x448] sm:$0xff] %v11672_v22   ;;  %v5997_v37 = vmax.f32 %v4011_v25, 0.0 }
 0x151   : > { %v4013_v27 = vpop.f32.mrf.mxu0  ;;  %v5037_v28 = vpop.f32.mrf.mxu1  ;;  %v6253_v38 = vmax.f32 %v5035_v26, 0.0 }
 0x152   : > { %v4014_v31 = vadd.f32 %v13731_v53, %v4013_v27  ;;  %v5038_v32 = vadd.f32 %v13731_v53, %v5037_v28 }
 0x153   : > { %v4015_v34 = vpop.f32.mrf.mxu0  ;;  %v5039_v35 = vpop.f32.mrf.mxu1 }
 0x154   : > { %v5998_v39 = vmax.f32 %v4014_v31, 0.0  ;;  %v6254_v40 = vmax.f32 %v5038_v32, 0.0  ;;  %v12840_v32 = vld [vmem:[%s13556_s11 + $0x260] ss:$8 sps:$4 sm:$0xff]  }
 0x155   : > { %v4018_v41 = vpop.f32.mrf.mxu0  ;;  %4209 = vmatmul.mubr.bf16.gmra.mxu0 %v12822_v29  ;;  %v5042_v42 = vpop.f32.mrf.mxu1  ;;  %5233 = vmatmul.mubr.bf16.gmra.mxu1 %v12823_v30 }
 0x156   : > { %v11037_v43 = vpack.c.bf16 %v5998_v39, %v5997_v37  ;;  %v11677_v44 = vpack.c.bf16 %v6254_v40, %v6253_v38  ;;  %9733 = vmatprep.mubr.msk.bf16.mxu0 %vm3120_vm0, %v12824_v33  ;;  %9861 = vmatprep.mubr.msk.bf16.mxu1 %vm3120_vm0, %v12826_v36  ;;  %v4019_v47 = vadd.f32 %v13731_v53, %v4018_v41  ;;  %v12841_v33 = vld [vmem:[%s13556_s11 + $0xa60] ss:$8 sps:$4 sm:$0xff]   ;;  %v12842_v36 = vld [vmem:[%s13556_s11 + $0x274] ss:$8 sps:$4 sm:$0xff]  }
 0x157   : > { %v4020_v45 = vpop.f32.mrf.mxu0  ;;  %v5044_v46 = vpop.f32.mrf.mxu1  ;;  %v5043_v48 = vadd.f32 %v13731_v53, %v5042_v42  ;;  %v12844_v39 = vld [vmem:[%s13556_s11 + $0xa74] ss:$8 sps:$4 sm:$0xff]  }
 0x158   : > { %12273 = vst [vmem:[%s13748_s18 + $0x50] sm:$0xff] %v11037_v43   ;;  %12401 = vst [vmem:[%s13748_s18 + $0x450] sm:$0xff] %v11677_v44   ;;  %v5999_v60 = vmax.f32 %v4019_v47, 0.0 }
 0x159   : > { %v4021_v49 = vpop.f32.mrf.mxu0  ;;  %v5045_v50 = vpop.f32.mrf.mxu1  ;;  %v6255_v61 = vmax.f32 %v5043_v48, 0.0 }
 0x15a   : > { %v4022_v54 = vadd.f32 %v13731_v53, %v4021_v49  ;;  %v5046_v55 = vadd.f32 %v13731_v53, %v5045_v50 }
 0x15b   : > { %v4023_v57 = vpop.f32.mrf.mxu0  ;;  %v5047_v58 = vpop.f32.mrf.mxu1 }
 0x15c   : > { %v6000_v62 = vmax.f32 %v4022_v54, 0.0  ;;  %v6256_v63 = vmax.f32 %v5046_v55, 0.0  ;;  %v12846_v55 = vld [vmem:[%s13556_s11 + $0x270] ss:$8 sps:$4 sm:$0xff]  }
 0x15d   : > { %v4026_v0 = vpop.f32.mrf.mxu0  ;;  %4217 = vmatmul.mubr.bf16.gmra.mxu0 %v12828_v51  ;;  %v5050_v1 = vpop.f32.mrf.mxu1  ;;  %5241 = vmatmul.mubr.bf16.gmra.mxu1 %v12829_v52 }
 0x15e   : > { %v11042_v2 = vpack.c.bf16 %v6000_v62, %v5999_v60  ;;  %v11682_v3 = vpack.c.bf16 %v6256_v63, %v6255_v61  ;;  %9734 = vmatprep.mubr.msk.bf16.mxu0 %vm3120_vm0, %v12830_v56  ;;  %9862 = vmatprep.mubr.msk.bf16.mxu1 %vm3120_vm0, %v12832_v59  ;;  %v4027_v6 = vadd.f32 %v13731_v53, %v4026_v0  ;;  %v12847_v56 = vld [vmem:[%s13556_s11 + $0xa70] ss:$8 sps:$4 sm:$0xff]   ;;  %v12848_v59 = vld [vmem:[%s13556_s11 + $0x284] ss:$8 sps:$4 sm:$0xff]  }
 0x15f   : > { %v4028_v4 = vpop.f32.mrf.mxu0  ;;  %v5052_v5 = vpop.f32.mrf.mxu1  ;;  %v5051_v7 = vadd.f32 %v13731_v53, %v5050_v1  ;;  %v12850_v62 = vld [vmem:[%s13556_s11 + $0xa84] ss:$8 sps:$4 sm:$0xff]  }
 0x160   : > { %12274 = vst [vmem:[%s13748_s18 + $0x58] sm:$0xff] %v11042_v2   ;;  %12402 = vst [vmem:[%s13748_s18 + $0x458] sm:$0xff] %v11682_v3   ;;  %v6001_v18 = vmax.f32 %v4027_v6, 0.0 }
 0x161   : > { %v4029_v8 = vpop.f32.mrf.mxu0  ;;  %v5053_v9 = vpop.f32.mrf.mxu1  ;;  %v6257_v19 = vmax.f32 %v5051_v7, 0.0 }
 0x162   : > { %v4030_v12 = vadd.f32 %v13731_v53, %v4029_v8  ;;  %v5054_v13 = vadd.f32 %v13731_v53, %v5053_v9 }
 0x163   : > { %v4031_v15 = vpop.f32.mrf.mxu0  ;;  %v5055_v16 = vpop.f32.mrf.mxu1 }
 0x164   : > { %v6002_v20 = vmax.f32 %v4030_v12, 0.0  ;;  %v6258_v21 = vmax.f32 %v5054_v13, 0.0  ;;  %v12852_v13 = vld [vmem:[%s13556_s11 + $0x280] ss:$8 sps:$4 sm:$0xff]  }
 0x165   : > { %v4034_v22 = vpop.f32.mrf.mxu0  ;;  %4225 = vmatmul.mubr.bf16.gmra.mxu0 %v12834_v10  ;;  %v5058_v23 = vpop.f32.mrf.mxu1  ;;  %5249 = vmatmul.mubr.bf16.gmra.mxu1 %v12835_v11 }
 0x166   : > { %v11047_v24 = vpack.c.bf16 %v6002_v20, %v6001_v18  ;;  %v11687_v25 = vpack.c.bf16 %v6258_v21, %v6257_v19  ;;  %9735 = vmatprep.mubr.msk.bf16.mxu0 %vm3120_vm0, %v12836_v14  ;;  %9863 = vmatprep.mubr.msk.bf16.mxu1 %vm3120_vm0, %v12838_v17  ;;  %v4035_v28 = vadd.f32 %v13731_v53, %v4034_v22  ;;  %v12853_v14 = vld [vmem:[%s13556_s11 + $0xa80] ss:$8 sps:$4 sm:$0xff]   ;;  %v12854_v17 = vld [vmem:[%s13556_s11 + $0x294] ss:$8 sps:$4 sm:$0xff]  }
 0x167   : > { %v4036_v26 = vpop.f32.mrf.mxu0  ;;  %v5060_v27 = vpop.f32.mrf.mxu1  ;;  %v5059_v29 = vadd.f32 %v13731_v53, %v5058_v23  ;;  %v12856_v20 = vld [vmem:[%s13556_s11 + $0xa94] ss:$8 sps:$4 sm:$0xff]  }
 0x168   : > { %12275 = vst [vmem:[%s13748_s18 + $0x60] sm:$0xff] %v11047_v24   ;;  %12403 = vst [vmem:[%s13748_s18 + $0x460] sm:$0xff] %v11687_v25   ;;  %v6003_v40 = vmax.f32 %v4035_v28, 0.0 }
 0x169   : > { %v4037_v30 = vpop.f32.mrf.mxu0  ;;  %v5061_v31 = vpop.f32.mrf.mxu1  ;;  %v6259_v41 = vmax.f32 %v5059_v29, 0.0 }
 0x16a   : > { %v4038_v34 = vadd.f32 %v13731_v53, %v4037_v30  ;;  %v5062_v35 = vadd.f32 %v13731_v53, %v5061_v31 }
 0x16b   : > { %v4039_v37 = vpop.f32.mrf.mxu0  ;;  %v5063_v38 = vpop.f32.mrf.mxu1 }
 0x16c   : > { %v6004_v42 = vmax.f32 %v4038_v34, 0.0  ;;  %v6260_v43 = vmax.f32 %v5062_v35, 0.0  ;;  %v12858_v35 = vld [vmem:[%s13556_s11 + $0x290] ss:$8 sps:$4 sm:$0xff]  }
 0x16d   : > { %v4042_v44 = vpop.f32.mrf.mxu0  ;;  %4233 = vmatmul.mubr.bf16.gmra.mxu0 %v12840_v32  ;;  %v5066_v45 = vpop.f32.mrf.mxu1  ;;  %5257 = vmatmul.mubr.bf16.gmra.mxu1 %v12841_v33 }
 0x16e   : > { %v11052_v46 = vpack.c.bf16 %v6004_v42, %v6003_v40  ;;  %v11692_v47 = vpack.c.bf16 %v6260_v43, %v6259_v41  ;;  %9736 = vmatprep.mubr.msk.bf16.mxu0 %vm3120_vm0, %v12842_v36  ;;  %9864 = vmatprep.mubr.msk.bf16.mxu1 %vm3120_vm0, %v12844_v39  ;;  %v4043_v50 = vadd.f32 %v13731_v53, %v4042_v44  ;;  %v12859_v36 = vld [vmem:[%s13556_s11 + $0xa90] ss:$8 sps:$4 sm:$0xff]   ;;  %v12860_v39 = vld [vmem:[%s13556_s11 + $0x2a4] ss:$8 sps:$4 sm:$0xff]  }
 0x16f   : > { %v4044_v48 = vpop.f32.mrf.mxu0  ;;  %v5068_v49 = vpop.f32.mrf.mxu1  ;;  %v5067_v51 = vadd.f32 %v13731_v53, %v5066_v45  ;;  %v12862_v42 = vld [vmem:[%s13556_s11 + $0xaa4] ss:$8 sps:$4 sm:$0xff]  }
 0x170   : > { %12276 = vst [vmem:[%s13748_s18 + $0x68] sm:$0xff] %v11052_v46   ;;  %12404 = vst [vmem:[%s13748_s18 + $0x468] sm:$0xff] %v11692_v47   ;;  %v6005_v63 = vmax.f32 %v4043_v50, 0.0 }
 0x171   : > { %v4045_v52 = vpop.f32.mrf.mxu0  ;;  %v5069_v54 = vpop.f32.mrf.mxu1  ;;  %v6261_v0 = vmax.f32 %v5067_v51, 0.0 }
 0x172   : > { %v4046_v57 = vadd.f32 %v13731_v53, %v4045_v52  ;;  %v5070_v58 = vadd.f32 %v13731_v53, %v5069_v54 }
 0x173   : > { %v4047_v60 = vpop.f32.mrf.mxu0  ;;  %v5071_v61 = vpop.f32.mrf.mxu1 }
 0x174   : > { %v6006_v1 = vmax.f32 %v4046_v57, 0.0  ;;  %v6262_v2 = vmax.f32 %v5070_v58, 0.0  ;;  %v12864_v58 = vld [vmem:[%s13556_s11 + $0x2a0] ss:$8 sps:$4 sm:$0xff]  }
 0x175   : > { %v4050_v3 = vpop.f32.mrf.mxu0  ;;  %4241 = vmatmul.mubr.bf16.gmra.mxu0 %v12846_v55  ;;  %v5074_v4 = vpop.f32.mrf.mxu1  ;;  %5265 = vmatmul.mubr.bf16.gmra.mxu1 %v12847_v56  ;;  %v13951_v60 = vld [vmem:[%s15210_s2] ss:$0 sm:$0xff] }
 0x176   : > { %v11057_v5 = vpack.c.bf16 %v6006_v1, %v6005_v63  ;;  %v11697_v6 = vpack.c.bf16 %v6262_v2, %v6261_v0  ;;  %9737 = vmatprep.mubr.msk.bf16.mxu0 %vm3120_vm0, %v12848_v59  ;;  %9865 = vmatprep.mubr.msk.bf16.mxu1 %vm3120_vm0, %v12850_v62  ;;  %v4051_v9 = vadd.f32 %v13731_v53, %v4050_v3  ;;  %v12865_v59 = vld [vmem:[%s13556_s11 + $0xaa0] ss:$8 sps:$4 sm:$0xff]   ;;  %v12866_v63 = vld [vmem:[%s13556_s11 + $0x2b4] ss:$8 sps:$4 sm:$0xff]  }
 0x177   : > { %v4052_v7 = vpop.f32.mrf.mxu0  ;;  %v5076_v8 = vpop.f32.mrf.mxu1  ;;  %v5075_v10 = vadd.f32 %v13731_v53, %v5074_v4  ;;  %v12868_v2 = vld [vmem:[%s13556_s11 + $0xab4] ss:$8 sps:$4 sm:$0xff]  }
 0x178   : > { %12277 = vst [vmem:[%s13748_s18 + $0x70] sm:$0xff] %v11057_v5   ;;  %12405 = vst [vmem:[%s13748_s18 + $0x470] sm:$0xff] %v11697_v6   ;;  %v6007_v21 = vmax.f32 %v4051_v9, 0.0 }
 0x179   : > { %v4053_v11 = vpop.f32.mrf.mxu0  ;;  %v5077_v12 = vpop.f32.mrf.mxu1  ;;  %v6263_v22 = vmax.f32 %v5075_v10, 0.0 }
 0x17a   : > { %v4054_v15 = vadd.f32 %v13731_v53, %v4053_v11  ;;  %v5078_v16 = vadd.f32 %v13731_v53, %v5077_v12 }
 0x17b   : > { %v4055_v18 = vpop.f32.mrf.mxu0  ;;  %v5079_v19 = vpop.f32.mrf.mxu1 }
 0x17c   : > { %v6008_v23 = vmax.f32 %v4054_v15, 0.0  ;;  %v6264_v24 = vmax.f32 %v5078_v16, 0.0  ;;  %v12870_v16 = vld [vmem:[%s13556_s11 + $0x2b0] ss:$8 sps:$4 sm:$0xff]  }
 0x17d   : > { %v4058_v25 = vpop.f32.mrf.mxu0  ;;  %4249 = vmatmul.mubr.bf16.gmra.mxu0 %v12852_v13  ;;  %v5082_v26 = vpop.f32.mrf.mxu1  ;;  %5273 = vmatmul.mubr.bf16.gmra.mxu1 %v12853_v14 }
 0x17e   : > { %v11062_v27 = vpack.c.bf16 %v6008_v23, %v6007_v21  ;;  %v11702_v28 = vpack.c.bf16 %v6264_v24, %v6263_v22  ;;  %9738 = vmatprep.mubr.msk.bf16.mxu0 %vm3120_vm0, %v12854_v17  ;;  %9866 = vmatprep.mubr.msk.bf16.mxu1 %vm3120_vm0, %v12856_v20  ;;  %v4059_v31 = vadd.f32 %v13731_v53, %v4058_v25  ;;  %v12871_v17 = vld [vmem:[%s13556_s11 + $0xab0] ss:$8 sps:$4 sm:$0xff]   ;;  %v12872_v20 = vld [vmem:[%s13556_s11 + $0x2c4] ss:$8 sps:$4 sm:$0xff]  }
 0x17f   : > { %v4060_v29 = vpop.f32.mrf.mxu0  ;;  %v5084_v30 = vpop.f32.mrf.mxu1  ;;  %v5083_v32 = vadd.f32 %v13731_v53, %v5082_v26  ;;  %v12874_v23 = vld [vmem:[%s13556_s11 + $0xac4] ss:$8 sps:$4 sm:$0xff]  }
 0x180   : > { %12278 = vst [vmem:[%s13748_s18 + $0x78] sm:$0xff] %v11062_v27   ;;  %12406 = vst [vmem:[%s13748_s18 + $0x478] sm:$0xff] %v11702_v28   ;;  %v6009_v43 = vmax.f32 %v4059_v31, 0.0 }
 0x181   : > { %v4061_v33 = vpop.f32.mrf.mxu0  ;;  %v5085_v34 = vpop.f32.mrf.mxu1  ;;  %v6265_v44 = vmax.f32 %v5083_v32, 0.0 }
 0x182   : > { %v4062_v37 = vadd.f32 %v13731_v53, %v4061_v33  ;;  %v5086_v38 = vadd.f32 %v13731_v53, %v5085_v34 }
 0x183   : > { %v4063_v40 = vpop.f32.mrf.mxu0  ;;  %v5087_v41 = vpop.f32.mrf.mxu1 }
 0x184   : > { %v6010_v45 = vmax.f32 %v4062_v37, 0.0  ;;  %v6266_v46 = vmax.f32 %v5086_v38, 0.0  ;;  %v12876_v38 = vld [vmem:[%s13556_s11 + $0x2c0] ss:$8 sps:$4 sm:$0xff]  }
 0x185   : > { %v4066_v47 = vpop.f32.mrf.mxu0  ;;  %4257 = vmatmul.mubr.bf16.gmra.mxu0 %v12858_v35  ;;  %v5090_v48 = vpop.f32.mrf.mxu1  ;;  %5281 = vmatmul.mubr.bf16.gmra.mxu1 %v12859_v36 }
 0x186   : > { %v11067_v49 = vpack.c.bf16 %v6010_v45, %v6009_v43  ;;  %v11707_v50 = vpack.c.bf16 %v6266_v46, %v6265_v44  ;;  %9739 = vmatprep.mubr.msk.bf16.mxu0 %vm3120_vm0, %v12860_v39  ;;  %9867 = vmatprep.mubr.msk.bf16.mxu1 %vm3120_vm0, %v12862_v42  ;;  %v4067_v54 = vadd.f32 %v13731_v53, %v4066_v47  ;;  %v12877_v39 = vld [vmem:[%s13556_s11 + $0xac0] ss:$8 sps:$4 sm:$0xff]   ;;  %v12878_v42 = vld [vmem:[%s13556_s11 + $0x2d4] ss:$8 sps:$4 sm:$0xff]  }
 0x187   : > { %v4068_v51 = vpop.f32.mrf.mxu0  ;;  %v5092_v52 = vpop.f32.mrf.mxu1  ;;  %v5091_v55 = vadd.f32 %v13731_v53, %v5090_v48  ;;  %v12880_v45 = vld [vmem:[%s13556_s11 + $0xad4] ss:$8 sps:$4 sm:$0xff]  }
 0x188   : > { %12279 = vst [vmem:[%s13748_s18 + $0x80] sm:$0xff] %v11067_v49   ;;  %12407 = vst [vmem:[%s13748_s18 + $0x480] sm:$0xff] %v11707_v50   ;;  %v6011_v53 = vmax.f32 %v4067_v54, 0.0 }
 0x189   : > { %v4069_v56 = vpop.f32.mrf.mxu0  ;;  %v5093_v57 = vpop.f32.mrf.mxu1  ;;  %v6267_v3 = vmax.f32 %v5091_v55, 0.0 }
 0x18a   : > { %v4070_v61 = vadd.f32 %v13951_v60, %v4069_v56  ;;  %v5094_v62 = vadd.f32 %v13951_v60, %v5093_v57 }
 0x18b   : > { %v4071_v0 = vpop.f32.mrf.mxu0  ;;  %v5095_v1 = vpop.f32.mrf.mxu1 }
 0x18c   : > { %v6012_v4 = vmax.f32 %v4070_v61, 0.0  ;;  %v6268_v5 = vmax.f32 %v5094_v62, 0.0  ;;  %v12882_v62 = vld [vmem:[%s13556_s11 + $0x2d0] ss:$8 sps:$4 sm:$0xff]  }
 0x18d   : > { %v4074_v6 = vpop.f32.mrf.mxu0  ;;  %4265 = vmatmul.mubr.bf16.gmra.mxu0 %v12864_v58  ;;  %v5098_v7 = vpop.f32.mrf.mxu1  ;;  %5289 = vmatmul.mubr.bf16.gmra.mxu1 %v12865_v59 }
 0x18e   : > { %v11072_v8 = vpack.c.bf16 %v6012_v4, %v6011_v53  ;;  %v11712_v9 = vpack.c.bf16 %v6268_v5, %v6267_v3  ;;  %9740 = vmatprep.mubr.msk.bf16.mxu0 %vm3120_vm0, %v12866_v63  ;;  %9868 = vmatprep.mubr.msk.bf16.mxu1 %vm3120_vm0, %v12868_v2  ;;  %v4075_v12 = vadd.f32 %v13951_v60, %v4074_v6  ;;  %v12883_v63 = vld [vmem:[%s13556_s11 + $0xad0] ss:$8 sps:$4 sm:$0xff]   ;;  %v12884_v2 = vld [vmem:[%s13556_s11 + $0x2e4] ss:$8 sps:$4 sm:$0xff]  }
 0x18f   : > { %v4076_v10 = vpop.f32.mrf.mxu0  ;;  %v5100_v11 = vpop.f32.mrf.mxu1  ;;  %v5099_v13 = vadd.f32 %v13951_v60, %v5098_v7  ;;  %v12886_v4 = vld [vmem:[%s13556_s11 + $0xae4] ss:$8 sps:$4 sm:$0xff]  }
 0x190   : > { %12280 = vst [vmem:[%s13748_s18 + $0x88] sm:$0xff] %v11072_v8   ;;  %12408 = vst [vmem:[%s13748_s18 + $0x488] sm:$0xff] %v11712_v9   ;;  %v6013_v24 = vmax.f32 %v4075_v12, 0.0 }
 0x191   : > { %v4077_v14 = vpop.f32.mrf.mxu0  ;;  %v5101_v15 = vpop.f32.mrf.mxu1  ;;  %v6269_v25 = vmax.f32 %v5099_v13, 0.0 }
 0x192   : > { %v4078_v18 = vadd.f32 %v13951_v60, %v4077_v14  ;;  %v5102_v19 = vadd.f32 %v13951_v60, %v5101_v15 }
 0x193   : > { %v4079_v21 = vpop.f32.mrf.mxu0  ;;  %v5103_v22 = vpop.f32.mrf.mxu1 }
 0x194   : > { %v6014_v26 = vmax.f32 %v4078_v18, 0.0  ;;  %v6270_v27 = vmax.f32 %v5102_v19, 0.0  ;;  %v12888_v19 = vld [vmem:[%s13556_s11 + $0x2e0] ss:$8 sps:$4 sm:$0xff]  }
 0x195   : > { %v4082_v28 = vpop.f32.mrf.mxu0  ;;  %4273 = vmatmul.mubr.bf16.gmra.mxu0 %v12870_v16  ;;  %v5106_v29 = vpop.f32.mrf.mxu1  ;;  %5297 = vmatmul.mubr.bf16.gmra.mxu1 %v12871_v17 }
 0x196   : > { %v11077_v30 = vpack.c.bf16 %v6014_v26, %v6013_v24  ;;  %v11717_v31 = vpack.c.bf16 %v6270_v27, %v6269_v25  ;;  %9741 = vmatprep.mubr.msk.bf16.mxu0 %vm3120_vm0, %v12872_v20  ;;  %9869 = vmatprep.mubr.msk.bf16.mxu1 %vm3120_vm0, %v12874_v23  ;;  %v4083_v34 = vadd.f32 %v13951_v60, %v4082_v28  ;;  %v12889_v20 = vld [vmem:[%s13556_s11 + $0xae0] ss:$8 sps:$4 sm:$0xff]   ;;  %v12890_v23 = vld [vmem:[%s13556_s11 + $0x2f4] ss:$8 sps:$4 sm:$0xff]  }
 0x197   : > { %v4084_v32 = vpop.f32.mrf.mxu0  ;;  %v5108_v33 = vpop.f32.mrf.mxu1  ;;  %v5107_v35 = vadd.f32 %v13951_v60, %v5106_v29  ;;  %v12892_v26 = vld [vmem:[%s13556_s11 + $0xaf4] ss:$8 sps:$4 sm:$0xff]  }
 0x198   : > { %12281 = vst [vmem:[%s13748_s18 + $0x90] sm:$0xff] %v11077_v30   ;;  %12409 = vst [vmem:[%s13748_s18 + $0x490] sm:$0xff] %v11717_v31   ;;  %v6015_v46 = vmax.f32 %v4083_v34, 0.0 }
 0x199   : > { %v4085_v36 = vpop.f32.mrf.mxu0  ;;  %v5109_v37 = vpop.f32.mrf.mxu1  ;;  %v6271_v47 = vmax.f32 %v5107_v35, 0.0 }
 0x19a   : > { %v4086_v40 = vadd.f32 %v13951_v60, %v4085_v36  ;;  %v5110_v41 = vadd.f32 %v13951_v60, %v5109_v37 }
 0x19b   : > { %v4087_v43 = vpop.f32.mrf.mxu0  ;;  %v5111_v44 = vpop.f32.mrf.mxu1 }
 0x19c   : > { %v6016_v48 = vmax.f32 %v4086_v40, 0.0  ;;  %v6272_v49 = vmax.f32 %v5110_v41, 0.0  ;;  %v12894_v41 = vld [vmem:[%s13556_s11 + $0x2f0] ss:$8 sps:$4 sm:$0xff]  }
 0x19d   : > { %v4090_v50 = vpop.f32.mrf.mxu0  ;;  %4281 = vmatmul.mubr.bf16.gmra.mxu0 %v12876_v38  ;;  %v5114_v51 = vpop.f32.mrf.mxu1  ;;  %5305 = vmatmul.mubr.bf16.gmra.mxu1 %v12877_v39 }
 0x19e   : > { %v11082_v52 = vpack.c.bf16 %v6016_v48, %v6015_v46  ;;  %v11722_v54 = vpack.c.bf16 %v6272_v49, %v6271_v47  ;;  %9742 = vmatprep.mubr.msk.bf16.mxu0 %vm3120_vm0, %v12878_v42  ;;  %9870 = vmatprep.mubr.msk.bf16.mxu1 %vm3120_vm0, %v12880_v45  ;;  %v4091_v57 = vadd.f32 %v13951_v60, %v4090_v50  ;;  %v12895_v42 = vld [vmem:[%s13556_s11 + $0xaf0] ss:$8 sps:$4 sm:$0xff]   ;;  %v12896_v45 = vld [vmem:[%s13556_s11 + $0x304] ss:$8 sps:$4 sm:$0xff]  }
 0x19f   : > { %v4092_v55 = vpop.f32.mrf.mxu0  ;;  %v5116_v56 = vpop.f32.mrf.mxu1  ;;  %v5115_v58 = vadd.f32 %v13951_v60, %v5114_v51  ;;  %v12898_v48 = vld [vmem:[%s13556_s11 + $0xb04] ss:$8 sps:$4 sm:$0xff]  }
 0x1a0   : > { %12282 = vst [vmem:[%s13748_s18 + $0x98] sm:$0xff] %v11082_v52   ;;  %12410 = vst [vmem:[%s13748_s18 + $0x498] sm:$0xff] %v11722_v54   ;;  %v6017_v5 = vmax.f32 %v4091_v57, 0.0 }
 0x1a1   : > { %v4093_v59 = vpop.f32.mrf.mxu0  ;;  %v5117_v61 = vpop.f32.mrf.mxu1  ;;  %v6273_v6 = vmax.f32 %v5115_v58, 0.0 }
 0x1a2   : > { %v4094_v0 = vadd.f32 %v13951_v60, %v4093_v59  ;;  %v5118_v1 = vadd.f32 %v13951_v60, %v5117_v61 }
 0x1a3   : > { %v4095_v53 = vpop.f32.mrf.mxu0  ;;  %v5119_v3 = vpop.f32.mrf.mxu1 }
 0x1a4   : > { %v6018_v7 = vmax.f32 %v4094_v0, 0.0  ;;  %v6274_v8 = vmax.f32 %v5118_v1, 0.0  ;;  %v12900_v1 = vld [vmem:[%s13556_s11 + $0x300] ss:$8 sps:$4 sm:$0xff]  }
 0x1a5   : > { %v4098_v9 = vpop.f32.mrf.mxu0  ;;  %4289 = vmatmul.mubr.bf16.gmra.mxu0 %v12882_v62  ;;  %v5122_v10 = vpop.f32.mrf.mxu1  ;;  %5313 = vmatmul.mubr.bf16.gmra.mxu1 %v12883_v63 }
 0x1a6   : > { %v11087_v11 = vpack.c.bf16 %v6018_v7, %v6017_v5  ;;  %v11727_v12 = vpack.c.bf16 %v6274_v8, %v6273_v6  ;;  %9743 = vmatprep.mubr.msk.bf16.mxu0 %vm3120_vm0, %v12884_v2  ;;  %9871 = vmatprep.mubr.msk.bf16.mxu1 %vm3120_vm0, %v12886_v4  ;;  %v4099_v15 = vadd.f32 %v13951_v60, %v4098_v9  ;;  %v12901_v2 = vld [vmem:[%s13556_s11 + $0xb00] ss:$8 sps:$4 sm:$0xff]   ;;  %v12902_v4 = vld [vmem:[%s13556_s11 + $0x314] ss:$8 sps:$4 sm:$0xff]  }
 0x1a7   : > { %v4100_v13 = vpop.f32.mrf.mxu0  ;;  %v5124_v14 = vpop.f32.mrf.mxu1  ;;  %v5123_v16 = vadd.f32 %v13951_v60, %v5122_v10  ;;  %v12904_v7 = vld [vmem:[%s13556_s11 + $0xb14] ss:$8 sps:$4 sm:$0xff]  }
 0x1a8   : > { %12283 = vst [vmem:[%s13748_s18 + $0xa0] sm:$0xff] %v11087_v11   ;;  %12411 = vst [vmem:[%s13748_s18 + $0x4a0] sm:$0xff] %v11727_v12   ;;  %v6019_v27 = vmax.f32 %v4099_v15, 0.0 }
 0x1a9   : > { %v4101_v17 = vpop.f32.mrf.mxu0  ;;  %v5125_v18 = vpop.f32.mrf.mxu1  ;;  %v6275_v28 = vmax.f32 %v5123_v16, 0.0 }
 0x1aa   : > { %v4102_v21 = vadd.f32 %v13951_v60, %v4101_v17  ;;  %v5126_v22 = vadd.f32 %v13951_v60, %v5125_v18 }
 0x1ab   : > { %v4103_v24 = vpop.f32.mrf.mxu0  ;;  %v5127_v25 = vpop.f32.mrf.mxu1 }
 0x1ac   : > { %v6020_v29 = vmax.f32 %v4102_v21, 0.0  ;;  %v6276_v30 = vmax.f32 %v5126_v22, 0.0  ;;  %v12906_v22 = vld [vmem:[%s13556_s11 + $0x310] ss:$8 sps:$4 sm:$0xff]  }
 0x1ad   : > { %v4106_v31 = vpop.f32.mrf.mxu0  ;;  %4297 = vmatmul.mubr.bf16.gmra.mxu0 %v12888_v19  ;;  %v5130_v32 = vpop.f32.mrf.mxu1  ;;  %5321 = vmatmul.mubr.bf16.gmra.mxu1 %v12889_v20 }
 0x1ae   : > { %v11092_v33 = vpack.c.bf16 %v6020_v29, %v6019_v27  ;;  %v11732_v34 = vpack.c.bf16 %v6276_v30, %v6275_v28  ;;  %9744 = vmatprep.mubr.msk.bf16.mxu0 %vm3120_vm0, %v12890_v23  ;;  %9872 = vmatprep.mubr.msk.bf16.mxu1 %vm3120_vm0, %v12892_v26  ;;  %v4107_v37 = vadd.f32 %v13951_v60, %v4106_v31  ;;  %v12907_v23 = vld [vmem:[%s13556_s11 + $0xb10] ss:$8 sps:$4 sm:$0xff]   ;;  %v12908_v26 = vld [vmem:[%s13556_s11 + $0x324] ss:$8 sps:$4 sm:$0xff]  }
 0x1af   : > { %v4108_v35 = vpop.f32.mrf.mxu0  ;;  %v5132_v36 = vpop.f32.mrf.mxu1  ;;  %v5131_v38 = vadd.f32 %v13951_v60, %v5130_v32  ;;  %v12910_v29 = vld [vmem:[%s13556_s11 + $0xb24] ss:$8 sps:$4 sm:$0xff]  }
 0x1b0   : > { %12284 = vst [vmem:[%s13748_s18 + $0xa8] sm:$0xff] %v11092_v33   ;;  %12412 = vst [vmem:[%s13748_s18 + $0x4a8] sm:$0xff] %v11732_v34   ;;  %v6021_v49 = vmax.f32 %v4107_v37, 0.0 }
 0x1b1   : > { %v4109_v39 = vpop.f32.mrf.mxu0  ;;  %v5133_v40 = vpop.f32.mrf.mxu1  ;;  %v6277_v50 = vmax.f32 %v5131_v38, 0.0 }
 0x1b2   : > { %v4110_v43 = vadd.f32 %v13951_v60, %v4109_v39  ;;  %v5134_v44 = vadd.f32 %v13951_v60, %v5133_v40 }
 0x1b3   : > { %v4111_v46 = vpop.f32.mrf.mxu0  ;;  %v5135_v47 = vpop.f32.mrf.mxu1 }
 0x1b4   : > { %v6022_v51 = vmax.f32 %v4110_v43, 0.0  ;;  %v6278_v52 = vmax.f32 %v5134_v44, 0.0  ;;  %v12912_v44 = vld [vmem:[%s13556_s11 + $0x320] ss:$8 sps:$4 sm:$0xff]  }
 0x1b5   : > { %v4114_v54 = vpop.f32.mrf.mxu0  ;;  %4305 = vmatmul.mubr.bf16.gmra.mxu0 %v12894_v41  ;;  %v5138_v55 = vpop.f32.mrf.mxu1  ;;  %5329 = vmatmul.mubr.bf16.gmra.mxu1 %v12895_v42 }
 0x1b6   : > { %v11097_v56 = vpack.c.bf16 %v6022_v51, %v6021_v49  ;;  %v11737_v57 = vpack.c.bf16 %v6278_v52, %v6277_v50  ;;  %9745 = vmatprep.mubr.msk.bf16.mxu0 %vm3120_vm0, %v12896_v45  ;;  %9873 = vmatprep.mubr.msk.bf16.mxu1 %vm3120_vm0, %v12898_v48  ;;  %v4115_v61 = vadd.f32 %v13951_v60, %v4114_v54  ;;  %v12913_v45 = vld [vmem:[%s13556_s11 + $0xb20] ss:$8 sps:$4 sm:$0xff]   ;;  %v12914_v48 = vld [vmem:[%s13556_s11 + $0x334] ss:$8 sps:$4 sm:$0xff]  }
 0x1b7   : > { %v4116_v58 = vpop.f32.mrf.mxu0  ;;  %v5140_v59 = vpop.f32.mrf.mxu1  ;;  %v5139_v62 = vadd.f32 %v13951_v60, %v5138_v55  ;;  %v12916_v51 = vld [vmem:[%s13556_s11 + $0xb34] ss:$8 sps:$4 sm:$0xff]  }
 0x1b8   : > { %12285 = vst [vmem:[%s13748_s18 + $0xb0] sm:$0xff] %v11097_v56   ;;  %12413 = vst [vmem:[%s13748_s18 + $0x4b0] sm:$0xff] %v11737_v57   ;;  %v6023_v8 = vmax.f32 %v4115_v61, 0.0 }
 0x1b9   : > { %v4117_v63 = vpop.f32.mrf.mxu0  ;;  %v5141_v0 = vpop.f32.mrf.mxu1  ;;  %v6279_v9 = vmax.f32 %v5139_v62, 0.0 }
 0x1ba   : > { %v4118_v53 = vadd.f32 %v13951_v60, %v4117_v63  ;;  %v5142_v3 = vadd.f32 %v13951_v60, %v5141_v0 }
 0x1bb   : > { %v4119_v5 = vpop.f32.mrf.mxu0  ;;  %v5143_v6 = vpop.f32.mrf.mxu1 }
 0x1bc   : > { %v6024_v10 = vmax.f32 %v4118_v53, 0.0  ;;  %v6280_v11 = vmax.f32 %v5142_v3, 0.0  ;;  %v12918_v3 = vld [vmem:[%s13556_s11 + $0x330] ss:$8 sps:$4 sm:$0xff]  }
 0x1bd   : > { %v4122_v12 = vpop.f32.mrf.mxu0  ;;  %4313 = vmatmul.mubr.bf16.gmra.mxu0 %v12900_v1  ;;  %v5146_v13 = vpop.f32.mrf.mxu1  ;;  %5337 = vmatmul.mubr.bf16.gmra.mxu1 %v12901_v2 }
 0x1be   : > { %v11102_v14 = vpack.c.bf16 %v6024_v10, %v6023_v8  ;;  %v11742_v15 = vpack.c.bf16 %v6280_v11, %v6279_v9  ;;  %9746 = vmatprep.mubr.msk.bf16.mxu0 %vm3120_vm0, %v12902_v4  ;;  %9874 = vmatprep.mubr.msk.bf16.mxu1 %vm3120_vm0, %v12904_v7  ;;  %v4123_v18 = vadd.f32 %v13951_v60, %v4122_v12  ;;  %v12919_v4 = vld [vmem:[%s13556_s11 + $0xb30] ss:$8 sps:$4 sm:$0xff]   ;;  %v12920_v7 = vld [vmem:[%s13556_s11 + $0x344] ss:$8 sps:$4 sm:$0xff]  }
 0x1bf   : > { %v4124_v16 = vpop.f32.mrf.mxu0  ;;  %v5148_v17 = vpop.f32.mrf.mxu1  ;;  %v5147_v19 = vadd.f32 %v13951_v60, %v5146_v13  ;;  %v12922_v10 = vld [vmem:[%s13556_s11 + $0xb44] ss:$8 sps:$4 sm:$0xff]  }
 0x1c0   : > { %12286 = vst [vmem:[%s13748_s18 + $0xb8] sm:$0xff] %v11102_v14   ;;  %12414 = vst [vmem:[%s13748_s18 + $0x4b8] sm:$0xff] %v11742_v15   ;;  %v6025_v30 = vmax.f32 %v4123_v18, 0.0 }
 0x1c1   : > { %v4125_v20 = vpop.f32.mrf.mxu0  ;;  %v5149_v21 = vpop.f32.mrf.mxu1  ;;  %v6281_v31 = vmax.f32 %v5147_v19, 0.0 }
 0x1c2   : > { %v4126_v24 = vadd.f32 %v13951_v60, %v4125_v20  ;;  %v5150_v25 = vadd.f32 %v13951_v60, %v5149_v21 }
 0x1c3   : > { %v4127_v27 = vpop.f32.mrf.mxu0  ;;  %v5151_v28 = vpop.f32.mrf.mxu1 }
 0x1c4   : > { %v6026_v32 = vmax.f32 %v4126_v24, 0.0  ;;  %v6282_v33 = vmax.f32 %v5150_v25, 0.0  ;;  %v12924_v25 = vld [vmem:[%s13556_s11 + $0x340] ss:$8 sps:$4 sm:$0xff]  }
 0x1c5   : > { %v4130_v34 = vpop.f32.mrf.mxu0  ;;  %4321 = vmatmul.mubr.bf16.gmra.mxu0 %v12906_v22  ;;  %v5154_v35 = vpop.f32.mrf.mxu1  ;;  %5345 = vmatmul.mubr.bf16.gmra.mxu1 %v12907_v23 }
 0x1c6   : > { %v11107_v36 = vpack.c.bf16 %v6026_v32, %v6025_v30  ;;  %v11747_v37 = vpack.c.bf16 %v6282_v33, %v6281_v31  ;;  %9747 = vmatprep.mubr.msk.bf16.mxu0 %vm3120_vm0, %v12908_v26  ;;  %9875 = vmatprep.mubr.msk.bf16.mxu1 %vm3120_vm0, %v12910_v29  ;;  %v4131_v40 = vadd.f32 %v13951_v60, %v4130_v34  ;;  %v12925_v26 = vld [vmem:[%s13556_s11 + $0xb40] ss:$8 sps:$4 sm:$0xff]   ;;  %v12926_v29 = vld [vmem:[%s13556_s11 + $0x354] ss:$8 sps:$4 sm:$0xff]  }
 0x1c7   : > { %v4132_v38 = vpop.f32.mrf.mxu0  ;;  %v5156_v39 = vpop.f32.mrf.mxu1  ;;  %v5155_v41 = vadd.f32 %v13951_v60, %v5154_v35  ;;  %v12928_v32 = vld [vmem:[%s13556_s11 + $0xb54] ss:$8 sps:$4 sm:$0xff]  }
 0x1c8   : > { %12287 = vst [vmem:[%s13748_s18 + $0xc0] sm:$0xff] %v11107_v36   ;;  %12415 = vst [vmem:[%s13748_s18 + $0x4c0] sm:$0xff] %v11747_v37   ;;  %v6027_v52 = vmax.f32 %v4131_v40, 0.0 }
 0x1c9   : > { %v4133_v42 = vpop.f32.mrf.mxu0  ;;  %v5157_v43 = vpop.f32.mrf.mxu1  ;;  %v6283_v54 = vmax.f32 %v5155_v41, 0.0 }
 0x1ca   : > { %v4134_v46 = vadd.f32 %v13951_v60, %v4133_v42  ;;  %v5158_v47 = vadd.f32 %v13951_v60, %v5157_v43 }
 0x1cb   : > { %v4135_v49 = vpop.f32.mrf.mxu0  ;;  %v5159_v50 = vpop.f32.mrf.mxu1 }
 0x1cc   : > { %v6028_v55 = vmax.f32 %v4134_v46, 0.0  ;;  %v6284_v56 = vmax.f32 %v5158_v47, 0.0  ;;  %v12930_v47 = vld [vmem:[%s13556_s11 + $0x350] ss:$8 sps:$4 sm:$0xff]  }
 0x1cd   : > { %v4138_v57 = vpop.f32.mrf.mxu0  ;;  %4329 = vmatmul.mubr.bf16.gmra.mxu0 %v12912_v44  ;;  %v5162_v58 = vpop.f32.mrf.mxu1  ;;  %5353 = vmatmul.mubr.bf16.gmra.mxu1 %v12913_v45 }
 0x1ce   : > { %v11112_v59 = vpack.c.bf16 %v6028_v55, %v6027_v52  ;;  %v11752_v61 = vpack.c.bf16 %v6284_v56, %v6283_v54  ;;  %9748 = vmatprep.mubr.msk.bf16.mxu0 %vm3120_vm0, %v12914_v48  ;;  %9876 = vmatprep.mubr.msk.bf16.mxu1 %vm3120_vm0, %v12916_v51  ;;  %v4139_v0 = vadd.f32 %v13951_v60, %v4138_v57  ;;  %v12931_v48 = vld [vmem:[%s13556_s11 + $0xb50] ss:$8 sps:$4 sm:$0xff]   ;;  %v12932_v51 = vld [vmem:[%s13556_s11 + $0x364] ss:$8 sps:$4 sm:$0xff]  }
 0x1cf   : > { %v4140_v62 = vpop.f32.mrf.mxu0  ;;  %v5164_v63 = vpop.f32.mrf.mxu1  ;;  %v5163_v1 = vadd.f32 %v13951_v60, %v5162_v58  ;;  %v12934_v55 = vld [vmem:[%s13556_s11 + $0xb64] ss:$8 sps:$4 sm:$0xff]  }
 0x1d0   : > { %12288 = vst [vmem:[%s13748_s18 + $0xc8] sm:$0xff] %v11112_v59   ;;  %12416 = vst [vmem:[%s13748_s18 + $0x4c8] sm:$0xff] %v11752_v61   ;;  %v6029_v11 = vmax.f32 %v4139_v0, 0.0 }
 0x1d1   : > { %v4141_v2 = vpop.f32.mrf.mxu0  ;;  %v5165_v53 = vpop.f32.mrf.mxu1  ;;  %v6285_v12 = vmax.f32 %v5163_v1, 0.0 }
 0x1d2   : > { %v4142_v5 = vadd.f32 %v13951_v60, %v4141_v2  ;;  %v5166_v6 = vadd.f32 %v13951_v60, %v5165_v53 }
 0x1d3   : > { %v4143_v8 = vpop.f32.mrf.mxu0  ;;  %v5167_v9 = vpop.f32.mrf.mxu1 }
 0x1d4   : > { %v6030_v13 = vmax.f32 %v4142_v5, 0.0  ;;  %v6286_v14 = vmax.f32 %v5166_v6, 0.0  ;;  %v12936_v6 = vld [vmem:[%s13556_s11 + $0x360] ss:$8 sps:$4 sm:$0xff]  }
 0x1d5   : > { %v4146_v15 = vpop.f32.mrf.mxu0  ;;  %4337 = vmatmul.mubr.bf16.gmra.mxu0 %v12918_v3  ;;  %v5170_v16 = vpop.f32.mrf.mxu1  ;;  %5361 = vmatmul.mubr.bf16.gmra.mxu1 %v12919_v4 }
 0x1d6   : > { %v11117_v17 = vpack.c.bf16 %v6030_v13, %v6029_v11  ;;  %v11757_v18 = vpack.c.bf16 %v6286_v14, %v6285_v12  ;;  %9749 = vmatprep.mubr.msk.bf16.mxu0 %vm3120_vm0, %v12920_v7  ;;  %9877 = vmatprep.mubr.msk.bf16.mxu1 %vm3120_vm0, %v12922_v10  ;;  %v4147_v21 = vadd.f32 %v13951_v60, %v4146_v15  ;;  %v12937_v7 = vld [vmem:[%s13556_s11 + $0xb60] ss:$8 sps:$4 sm:$0xff]   ;;  %v12938_v10 = vld [vmem:[%s13556_s11 + $0x374] ss:$8 sps:$4 sm:$0xff]  }
 0x1d7   : > { %v4148_v19 = vpop.f32.mrf.mxu0  ;;  %v5172_v20 = vpop.f32.mrf.mxu1  ;;  %v5171_v22 = vadd.f32 %v13951_v60, %v5170_v16  ;;  %v12940_v13 = vld [vmem:[%s13556_s11 + $0xb74] ss:$8 sps:$4 sm:$0xff]  }
 0x1d8   : > { %12289 = vst [vmem:[%s13748_s18 + $0xd0] sm:$0xff] %v11117_v17   ;;  %12417 = vst [vmem:[%s13748_s18 + $0x4d0] sm:$0xff] %v11757_v18   ;;  %v6031_v33 = vmax.f32 %v4147_v21, 0.0 }
 0x1d9   : > { %v4149_v23 = vpop.f32.mrf.mxu0  ;;  %v5173_v24 = vpop.f32.mrf.mxu1  ;;  %v6287_v34 = vmax.f32 %v5171_v22, 0.0 }
 0x1da   : > { %v4150_v27 = vadd.f32 %v13951_v60, %v4149_v23  ;;  %v5174_v28 = vadd.f32 %v13951_v60, %v5173_v24 }
 0x1db   : > { %v4151_v30 = vpop.f32.mrf.mxu0  ;;  %v5175_v31 = vpop.f32.mrf.mxu1 }
 0x1dc   : > { %v6032_v35 = vmax.f32 %v4150_v27, 0.0  ;;  %v6288_v36 = vmax.f32 %v5174_v28, 0.0  ;;  %v12942_v28 = vld [vmem:[%s13556_s11 + $0x370] ss:$8 sps:$4 sm:$0xff]  }
 0x1dd   : > { %v4154_v37 = vpop.f32.mrf.mxu0  ;;  %4345 = vmatmul.mubr.bf16.gmra.mxu0 %v12924_v25  ;;  %v5178_v38 = vpop.f32.mrf.mxu1  ;;  %5369 = vmatmul.mubr.bf16.gmra.mxu1 %v12925_v26 }
 0x1de   : > { %v11122_v39 = vpack.c.bf16 %v6032_v35, %v6031_v33  ;;  %v11762_v40 = vpack.c.bf16 %v6288_v36, %v6287_v34  ;;  %9750 = vmatprep.mubr.msk.bf16.mxu0 %vm3120_vm0, %v12926_v29  ;;  %9878 = vmatprep.mubr.msk.bf16.mxu1 %vm3120_vm0, %v12928_v32  ;;  %v4155_v43 = vadd.f32 %v13951_v60, %v4154_v37  ;;  %v12943_v29 = vld [vmem:[%s13556_s11 + $0xb70] ss:$8 sps:$4 sm:$0xff]   ;;  %v12944_v32 = vld [vmem:[%s13556_s11 + $0x384] ss:$8 sps:$4 sm:$0xff]  }
 0x1df   : > { %v4156_v41 = vpop.f32.mrf.mxu0  ;;  %v5180_v42 = vpop.f32.mrf.mxu1  ;;  %v5179_v44 = vadd.f32 %v13951_v60, %v5178_v38  ;;  %v12946_v35 = vld [vmem:[%s13556_s11 + $0xb84] ss:$8 sps:$4 sm:$0xff]  }
 0x1e0   : > { %12290 = vst [vmem:[%s13748_s18 + $0xd8] sm:$0xff] %v11122_v39   ;;  %12418 = vst [vmem:[%s13748_s18 + $0x4d8] sm:$0xff] %v11762_v40   ;;  %v6033_v56 = vmax.f32 %v4155_v43, 0.0 }
 0x1e1   : > { %v4157_v45 = vpop.f32.mrf.mxu0  ;;  %v5181_v46 = vpop.f32.mrf.mxu1  ;;  %v6289_v57 = vmax.f32 %v5179_v44, 0.0 }
 0x1e2   : > { %v4158_v49 = vadd.f32 %v13951_v60, %v4157_v45  ;;  %v5182_v50 = vadd.f32 %v13951_v60, %v5181_v46 }
 0x1e3   : > { %v4159_v52 = vpop.f32.mrf.mxu0  ;;  %v5183_v54 = vpop.f32.mrf.mxu1 }
 0x1e4   : > { %v6034_v58 = vmax.f32 %v4158_v49, 0.0  ;;  %v6290_v59 = vmax.f32 %v5182_v50, 0.0  ;;  %v12948_v50 = vld [vmem:[%s13556_s11 + $0x380] ss:$8 sps:$4 sm:$0xff]  }
 0x1e5   : > { %v4162_v61 = vpop.f32.mrf.mxu0  ;;  %4353 = vmatmul.mubr.bf16.gmra.mxu0 %v12930_v47  ;;  %v5186_v62 = vpop.f32.mrf.mxu1  ;;  %5377 = vmatmul.mubr.bf16.gmra.mxu1 %v12931_v48 }
 0x1e6   : > { %v11127_v63 = vpack.c.bf16 %v6034_v58, %v6033_v56  ;;  %v11767_v0 = vpack.c.bf16 %v6290_v59, %v6289_v57  ;;  %9751 = vmatprep.mubr.msk.bf16.mxu0 %vm3120_vm0, %v12932_v51  ;;  %9879 = vmatprep.mubr.msk.bf16.mxu1 %vm3120_vm0, %v12934_v55  ;;  %v4163_v53 = vadd.f32 %v13951_v60, %v4162_v61  ;;  %v12949_v51 = vld [vmem:[%s13556_s11 + $0xb80] ss:$8 sps:$4 sm:$0xff]   ;;  %v12950_v55 = vld [vmem:[%s13556_s11 + $0x394] ss:$8 sps:$4 sm:$0xff]  }
 0x1e7   : > { %v4164_v1 = vpop.f32.mrf.mxu0  ;;  %v5188_v2 = vpop.f32.mrf.mxu1  ;;  %v5187_v3 = vadd.f32 %v13951_v60, %v5186_v62  ;;  %v12952_v58 = vld [vmem:[%s13556_s11 + $0xb94] ss:$8 sps:$4 sm:$0xff]  }
 0x1e8   : > { %12291 = vst [vmem:[%s13748_s18 + $0xe0] sm:$0xff] %v11127_v63   ;;  %12419 = vst [vmem:[%s13748_s18 + $0x4e0] sm:$0xff] %v11767_v0   ;;  %v6035_v14 = vmax.f32 %v4163_v53, 0.0 }
 0x1e9   : > { %v4165_v4 = vpop.f32.mrf.mxu0  ;;  %v5189_v5 = vpop.f32.mrf.mxu1  ;;  %v6291_v15 = vmax.f32 %v5187_v3, 0.0 }
 0x1ea   : > { %v4166_v8 = vadd.f32 %v13951_v60, %v4165_v4  ;;  %v5190_v9 = vadd.f32 %v13951_v60, %v5189_v5 }
 0x1eb   : > { %v4167_v11 = vpop.f32.mrf.mxu0  ;;  %v5191_v12 = vpop.f32.mrf.mxu1 }
 0x1ec   : > { %v6036_v16 = vmax.f32 %v4166_v8, 0.0  ;;  %v6292_v17 = vmax.f32 %v5190_v9, 0.0  ;;  %v12954_v9 = vld [vmem:[%s13556_s11 + $0x390] ss:$8 sps:$4 sm:$0xff]  }
 0x1ed   : > { %v4170_v18 = vpop.f32.mrf.mxu0  ;;  %4361 = vmatmul.mubr.bf16.gmra.mxu0 %v12936_v6  ;;  %v5194_v19 = vpop.f32.mrf.mxu1  ;;  %5385 = vmatmul.mubr.bf16.gmra.mxu1 %v12937_v7 }
 0x1ee   : > { %v11132_v20 = vpack.c.bf16 %v6036_v16, %v6035_v14  ;;  %v11772_v21 = vpack.c.bf16 %v6292_v17, %v6291_v15  ;;  %9752 = vmatprep.mubr.msk.bf16.mxu0 %vm3120_vm0, %v12938_v10  ;;  %9880 = vmatprep.mubr.msk.bf16.mxu1 %vm3120_vm0, %v12940_v13  ;;  %v4171_v24 = vadd.f32 %v13951_v60, %v4170_v18  ;;  %v12955_v10 = vld [vmem:[%s13556_s11 + $0xb90] ss:$8 sps:$4 sm:$0xff]   ;;  %v12956_v13 = vld [vmem:[%s13556_s11 + $0x3a4] ss:$8 sps:$4 sm:$0xff]  }
 0x1ef   : > { %v4172_v22 = vpop.f32.mrf.mxu0  ;;  %v5196_v23 = vpop.f32.mrf.mxu1  ;;  %v5195_v25 = vadd.f32 %v13951_v60, %v5194_v19  ;;  %v12958_v16 = vld [vmem:[%s13556_s11 + $0xba4] ss:$8 sps:$4 sm:$0xff]  }
 0x1f0   : > { %12292 = vst [vmem:[%s13748_s18 + $0xe8] sm:$0xff] %v11132_v20   ;;  %12420 = vst [vmem:[%s13748_s18 + $0x4e8] sm:$0xff] %v11772_v21   ;;  %v6037_v36 = vmax.f32 %v4171_v24, 0.0 }
 0x1f1   : > { %v4173_v26 = vpop.f32.mrf.mxu0  ;;  %v5197_v27 = vpop.f32.mrf.mxu1  ;;  %v6293_v37 = vmax.f32 %v5195_v25, 0.0 }
 0x1f2   : > { %v4174_v30 = vadd.f32 %v13951_v60, %v4173_v26  ;;  %v5198_v31 = vadd.f32 %v13951_v60, %v5197_v27 }
 0x1f3   : > { %v4175_v33 = vpop.f32.mrf.mxu0  ;;  %v5199_v34 = vpop.f32.mrf.mxu1 }
 0x1f4   : > { %v6038_v38 = vmax.f32 %v4174_v30, 0.0  ;;  %v6294_v39 = vmax.f32 %v5198_v31, 0.0  ;;  %v12960_v31 = vld [vmem:[%s13556_s11 + $0x3a0] ss:$8 sps:$4 sm:$0xff]  }
 0x1f5   : > { %v4178_v40 = vpop.f32.mrf.mxu0  ;;  %4369 = vmatmul.mubr.bf16.gmra.mxu0 %v12942_v28  ;;  %v5202_v41 = vpop.f32.mrf.mxu1  ;;  %5393 = vmatmul.mubr.bf16.gmra.mxu1 %v12943_v29 }
 0x1f6   : > { %v11137_v42 = vpack.c.bf16 %v6038_v38, %v6037_v36  ;;  %v11777_v43 = vpack.c.bf16 %v6294_v39, %v6293_v37  ;;  %9753 = vmatprep.mubr.msk.bf16.mxu0 %vm3120_vm0, %v12944_v32  ;;  %9881 = vmatprep.mubr.msk.bf16.mxu1 %vm3120_vm0, %v12946_v35  ;;  %v4179_v46 = vadd.f32 %v13951_v60, %v4178_v40  ;;  %v12961_v32 = vld [vmem:[%s13556_s11 + $0xba0] ss:$8 sps:$4 sm:$0xff]   ;;  %v12962_v35 = vld [vmem:[%s13556_s11 + $0x3b4] ss:$8 sps:$4 sm:$0xff]  }
 0x1f7   : > { %v4180_v44 = vpop.f32.mrf.mxu0  ;;  %v5204_v45 = vpop.f32.mrf.mxu1  ;;  %v5203_v47 = vadd.f32 %v13951_v60, %v5202_v41  ;;  %v12964_v38 = vld [vmem:[%s13556_s11 + $0xbb4] ss:$8 sps:$4 sm:$0xff]  }
 0x1f8   : > { %12293 = vst [vmem:[%s13748_s18 + $0xf0] sm:$0xff] %v11137_v42   ;;  %12421 = vst [vmem:[%s13748_s18 + $0x4f0] sm:$0xff] %v11777_v43   ;;  %v6039_v59 = vmax.f32 %v4179_v46, 0.0 }
 0x1f9   : > { %v4181_v48 = vpop.f32.mrf.mxu0  ;;  %v5205_v49 = vpop.f32.mrf.mxu1  ;;  %v6295_v61 = vmax.f32 %v5203_v47, 0.0 }
 0x1fa   : > { %v4182_v52 = vadd.f32 %v13951_v60, %v4181_v48  ;;  %v5206_v54 = vadd.f32 %v13951_v60, %v5205_v49 }
 0x1fb   : > { %v4183_v56 = vpop.f32.mrf.mxu0  ;;  %v5207_v57 = vpop.f32.mrf.mxu1 }
 0x1fc   : > { %v6040_v62 = vmax.f32 %v4182_v52, 0.0  ;;  %v6296_v63 = vmax.f32 %v5206_v54, 0.0  ;;  %v12966_v54 = vld [vmem:[%s13556_s11 + $0x3b0] ss:$8 sps:$4 sm:$0xff]  }
 0x1fd   : > { %v4186_v0 = vpop.f32.mrf.mxu0  ;;  %4377 = vmatmul.mubr.bf16.gmra.mxu0 %v12948_v50  ;;  %v5210_v1 = vpop.f32.mrf.mxu1  ;;  %5401 = vmatmul.mubr.bf16.gmra.mxu1 %v12949_v51 }
 0x1fe   : > { %v11142_v2 = vpack.c.bf16 %v6040_v62, %v6039_v59  ;;  %v11782_v53 = vpack.c.bf16 %v6296_v63, %v6295_v61  ;;  %9754 = vmatprep.mubr.msk.bf16.mxu0 %vm3120_vm0, %v12950_v55  ;;  %9882 = vmatprep.mubr.msk.bf16.mxu1 %vm3120_vm0, %v12952_v58  ;;  %v4187_v5 = vadd.f32 %v13951_v60, %v4186_v0  ;;  %v12967_v55 = vld [vmem:[%s13556_s11 + $0xbb0] ss:$8 sps:$4 sm:$0xff]   ;;  %v12968_v58 = vld [vmem:[%s13556_s11 + $0x3c4] ss:$8 sps:$4 sm:$0xff]  }
 0x1ff   : > { %v4188_v3 = vpop.f32.mrf.mxu0  ;;  %v5212_v4 = vpop.f32.mrf.mxu1  ;;  %v5211_v6 = vadd.f32 %v13951_v60, %v5210_v1  ;;  %v12970_v62 = vld [vmem:[%s13556_s11 + $0xbc4] ss:$8 sps:$4 sm:$0xff]  }
 0x200   : > { %12294 = vst [vmem:[%s13748_s18 + $0xf8] sm:$0xff] %v11142_v2   ;;  %12422 = vst [vmem:[%s13748_s18 + $0x4f8] sm:$0xff] %v11782_v53   ;;  %v6041_v17 = vmax.f32 %v4187_v5, 0.0 }
 0x201   : > { %v4189_v7 = vpop.f32.mrf.mxu0  ;;  %v5213_v8 = vpop.f32.mrf.mxu1  ;;  %v6297_v18 = vmax.f32 %v5211_v6, 0.0 }
 0x202   : > { %v4190_v11 = vadd.f32 %v13951_v60, %v4189_v7  ;;  %v5214_v12 = vadd.f32 %v13951_v60, %v5213_v8 }
 0x203   : > { %v4191_v14 = vpop.f32.mrf.mxu0  ;;  %v5215_v15 = vpop.f32.mrf.mxu1 }
 0x204   : > { %v6042_v19 = vmax.f32 %v4190_v11, 0.0  ;;  %v6298_v20 = vmax.f32 %v5214_v12, 0.0  ;;  %v12972_v12 = vld [vmem:[%s13556_s11 + $0x3c0] ss:$8 sps:$4 sm:$0xff]  }
 0x205   : > { %v4194_v21 = vpop.f32.mrf.mxu0  ;;  %4385 = vmatmul.mubr.bf16.gmra.mxu0 %v12954_v9  ;;  %v5218_v22 = vpop.f32.mrf.mxu1  ;;  %5409 = vmatmul.mubr.bf16.gmra.mxu1 %v12955_v10 }
 0x206   : > { %v11147_v23 = vpack.c.bf16 %v6042_v19, %v6041_v17  ;;  %v11787_v24 = vpack.c.bf16 %v6298_v20, %v6297_v18  ;;  %9755 = vmatprep.mubr.msk.bf16.mxu0 %vm3120_vm0, %v12956_v13  ;;  %9883 = vmatprep.mubr.msk.bf16.mxu1 %vm3120_vm0, %v12958_v16  ;;  %v4195_v27 = vadd.f32 %v13951_v60, %v4194_v21  ;;  %v12973_v13 = vld [vmem:[%s13556_s11 + $0xbc0] ss:$8 sps:$4 sm:$0xff]   ;;  %v12974_v16 = vld [vmem:[%s13556_s11 + $0x3d4] ss:$8 sps:$4 sm:$0xff]  }
 0x207   : > { %v4196_v25 = vpop.f32.mrf.mxu0  ;;  %v5220_v26 = vpop.f32.mrf.mxu1  ;;  %v5219_v28 = vadd.f32 %v13951_v60, %v5218_v22  ;;  %v12976_v19 = vld [vmem:[%s13556_s11 + $0xbd4] ss:$8 sps:$4 sm:$0xff]  }
 0x208   : > { %12295 = vst [vmem:[%s13748_s18 + $0x100] sm:$0xff] %v11147_v23   ;;  %12423 = vst [vmem:[%s13748_s18 + $0x500] sm:$0xff] %v11787_v24   ;;  %v6043_v39 = vmax.f32 %v4195_v27, 0.0 }
 0x209   : > { %v4197_v29 = vpop.f32.mrf.mxu0  ;;  %v5221_v30 = vpop.f32.mrf.mxu1  ;;  %v6299_v40 = vmax.f32 %v5219_v28, 0.0 }
 0x20a   : > { %v4198_v33 = vadd.f32 %v13951_v60, %v4197_v29  ;;  %v5222_v34 = vadd.f32 %v13951_v60, %v5221_v30  ;;  %v14180_v29 = vld [vmem:[%s15210_s2] ss:$0 sm:$0xff] }
 0x20b   : > { %v4199_v36 = vpop.f32.mrf.mxu0  ;;  %v5223_v37 = vpop.f32.mrf.mxu1 }
 0x20c   : > { %v6044_v41 = vmax.f32 %v4198_v33, 0.0  ;;  %v6300_v42 = vmax.f32 %v5222_v34, 0.0  ;;  %v12978_v34 = vld [vmem:[%s13556_s11 + $0x3d0] ss:$8 sps:$4 sm:$0xff]  }
 0x20d   : > { %v4202_v43 = vpop.f32.mrf.mxu0  ;;  %4393 = vmatmul.mubr.bf16.gmra.mxu0 %v12960_v31  ;;  %v5226_v44 = vpop.f32.mrf.mxu1  ;;  %5417 = vmatmul.mubr.bf16.gmra.mxu1 %v12961_v32 }
 0x20e   : > { %v11152_v45 = vpack.c.bf16 %v6044_v41, %v6043_v39  ;;  %v11792_v46 = vpack.c.bf16 %v6300_v42, %v6299_v40  ;;  %9756 = vmatprep.mubr.msk.bf16.mxu0 %vm3120_vm0, %v12962_v35  ;;  %9884 = vmatprep.mubr.msk.bf16.mxu1 %vm3120_vm0, %v12964_v38  ;;  %v4203_v49 = vadd.f32 %v13951_v60, %v4202_v43  ;;  %v12979_v35 = vld [vmem:[%s13556_s11 + $0xbd0] ss:$8 sps:$4 sm:$0xff]   ;;  %v12980_v38 = vld [vmem:[%s13556_s11 + $0x3e4] ss:$8 sps:$4 sm:$0xff]  }
 0x20f   : > { %v4204_v47 = vpop.f32.mrf.mxu0  ;;  %v5228_v48 = vpop.f32.mrf.mxu1  ;;  %v5227_v50 = vadd.f32 %v13951_v60, %v5226_v44  ;;  %v12982_v41 = vld [vmem:[%s13556_s11 + $0xbe4] ss:$8 sps:$4 sm:$0xff]  }
 0x210   : > { %12296 = vst [vmem:[%s13748_s18 + $0x108] sm:$0xff] %v11152_v45   ;;  %12424 = vst [vmem:[%s13748_s18 + $0x508] sm:$0xff] %v11792_v46   ;;  %v6045_v63 = vmax.f32 %v4203_v49, 0.0 }
 0x211   : > { %v4205_v51 = vpop.f32.mrf.mxu0  ;;  %v5229_v52 = vpop.f32.mrf.mxu1  ;;  %v6301_v0 = vmax.f32 %v5227_v50, 0.0 }
 0x212   : > { %v4206_v56 = vadd.f32 %v13951_v60, %v4205_v51  ;;  %v5230_v57 = vadd.f32 %v13951_v60, %v5229_v52 }
 0x213   : > { %v4207_v59 = vpop.f32.mrf.mxu0  ;;  %v5231_v61 = vpop.f32.mrf.mxu1 }
 0x214   : > { %v6046_v1 = vmax.f32 %v4206_v56, 0.0  ;;  %v6302_v2 = vmax.f32 %v5230_v57, 0.0  ;;  %v12984_v57 = vld [vmem:[%s13556_s11 + $0x3e0] ss:$8 sps:$4 sm:$0xff]  }
 0x215   : > { %v4210_v53 = vpop.f32.mrf.mxu0  ;;  %4401 = vmatmul.mubr.bf16.gmra.mxu0 %v12966_v54  ;;  %v5234_v3 = vpop.f32.mrf.mxu1  ;;  %5425 = vmatmul.mubr.bf16.gmra.mxu1 %v12967_v55 }
 0x216   : > { %v11157_v4 = vpack.c.bf16 %v6046_v1, %v6045_v63  ;;  %v11797_v5 = vpack.c.bf16 %v6302_v2, %v6301_v0  ;;  %9757 = vmatprep.mubr.msk.bf16.mxu0 %vm3120_vm0, %v12968_v58  ;;  %9885 = vmatprep.mubr.msk.bf16.mxu1 %vm3120_vm0, %v12970_v62  ;;  %v4211_v8 = vadd.f32 %v13951_v60, %v4210_v53  ;;  %v12985_v58 = vld [vmem:[%s13556_s11 + $0xbe0] ss:$8 sps:$4 sm:$0xff]   ;;  %v12986_v62 = vld [vmem:[%s13556_s11 + $0x3f4] ss:$8 sps:$4 sm:$0xff]  }
 0x217   : > { %v4212_v6 = vpop.f32.mrf.mxu0  ;;  %v5236_v7 = vpop.f32.mrf.mxu1  ;;  %v5235_v9 = vadd.f32 %v13951_v60, %v5234_v3  ;;  %v12988_v1 = vld [vmem:[%s13556_s11 + $0xbf4] ss:$8 sps:$4 sm:$0xff]  }
 0x218   : > { %12297 = vst [vmem:[%s13748_s18 + $0x110] sm:$0xff] %v11157_v4   ;;  %12425 = vst [vmem:[%s13748_s18 + $0x510] sm:$0xff] %v11797_v5   ;;  %v6047_v20 = vmax.f32 %v4211_v8, 0.0 }
 0x219   : > { %v4213_v10 = vpop.f32.mrf.mxu0  ;;  %v5237_v11 = vpop.f32.mrf.mxu1  ;;  %v6303_v21 = vmax.f32 %v5235_v9, 0.0 }
 0x21a   : > { %v4214_v14 = vadd.f32 %v13951_v60, %v4213_v10  ;;  %v5238_v15 = vadd.f32 %v13951_v60, %v5237_v11 }
 0x21b   : > { %v4215_v17 = vpop.f32.mrf.mxu0  ;;  %v5239_v18 = vpop.f32.mrf.mxu1 }
 0x21c   : > { %v6048_v22 = vmax.f32 %v4214_v14, 0.0  ;;  %v6304_v23 = vmax.f32 %v5238_v15, 0.0  ;;  %v12990_v15 = vld [vmem:[%s13556_s11 + $0x3f0] ss:$8 sps:$4 sm:$0xff]  }
 0x21d   : > { %v4218_v24 = vpop.f32.mrf.mxu0  ;;  %4409 = vmatmul.mubr.bf16.gmra.mxu0 %v12972_v12  ;;  %v5242_v25 = vpop.f32.mrf.mxu1  ;;  %5433 = vmatmul.mubr.bf16.gmra.mxu1 %v12973_v13 }
 0x21e   : > { %v11162_v26 = vpack.c.bf16 %v6048_v22, %v6047_v20  ;;  %v11802_v27 = vpack.c.bf16 %v6304_v23, %v6303_v21  ;;  %9758 = vmatprep.mubr.msk.bf16.mxu0 %vm3120_vm0, %v12974_v16  ;;  %9886 = vmatprep.mubr.msk.bf16.mxu1 %vm3120_vm0, %v12976_v19  ;;  %v4219_v30 = vadd.f32 %v14180_v29, %v4218_v24  ;;  %v12991_v16 = vld [vmem:[%s13556_s11 + $0xbf0] ss:$8 sps:$4 sm:$0xff]   ;;  %v12992_v19 = vld [vmem:[%s13556_s11 + $0x404] ss:$8 sps:$4 sm:$0xff]  }
 0x21f   : > { %v4220_v60 = vpop.f32.mrf.mxu0  ;;  %v5244_v28 = vpop.f32.mrf.mxu1  ;;  %v5243_v31 = vadd.f32 %v14180_v29, %v5242_v25  ;;  %v12994_v22 = vld [vmem:[%s13556_s11 + $0xc04] ss:$8 sps:$4 sm:$0xff]  }
 0x220   : > { %12298 = vst [vmem:[%s13748_s18 + $0x118] sm:$0xff] %v11162_v26   ;;  %12426 = vst [vmem:[%s13748_s18 + $0x518] sm:$0xff] %v11802_v27   ;;  %v6049_v42 = vmax.f32 %v4219_v30, 0.0 }
 0x221   : > { %v4221_v32 = vpop.f32.mrf.mxu0  ;;  %v5245_v33 = vpop.f32.mrf.mxu1  ;;  %v6305_v43 = vmax.f32 %v5243_v31, 0.0 }
 0x222   : > { %v4222_v36 = vadd.f32 %v14180_v29, %v4221_v32  ;;  %v5246_v37 = vadd.f32 %v14180_v29, %v5245_v33 }
 0x223   : > { %v4223_v39 = vpop.f32.mrf.mxu0  ;;  %v5247_v40 = vpop.f32.mrf.mxu1 }
 0x224   : > { %v6050_v44 = vmax.f32 %v4222_v36, 0.0  ;;  %v6306_v45 = vmax.f32 %v5246_v37, 0.0  ;;  %v12996_v37 = vld [vmem:[%s13556_s11 + $0x400] ss:$8 sps:$4 sm:$0xff]  }
 0x225   : > { %v4226_v46 = vpop.f32.mrf.mxu0  ;;  %4417 = vmatmul.mubr.bf16.gmra.mxu0 %v12978_v34  ;;  %v5250_v47 = vpop.f32.mrf.mxu1  ;;  %5441 = vmatmul.mubr.bf16.gmra.mxu1 %v12979_v35 }
 0x226   : > { %v11167_v48 = vpack.c.bf16 %v6050_v44, %v6049_v42  ;;  %v11807_v49 = vpack.c.bf16 %v6306_v45, %v6305_v43  ;;  %9759 = vmatprep.mubr.msk.bf16.mxu0 %vm3120_vm0, %v12980_v38  ;;  %9887 = vmatprep.mubr.msk.bf16.mxu1 %vm3120_vm0, %v12982_v41  ;;  %v4227_v52 = vadd.f32 %v14180_v29, %v4226_v46  ;;  %v12997_v38 = vld [vmem:[%s13556_s11 + $0xc00] ss:$8 sps:$4 sm:$0xff]   ;;  %v12998_v41 = vld [vmem:[%s13556_s11 + $0x414] ss:$8 sps:$4 sm:$0xff]  }
 0x227   : > { %v4228_v50 = vpop.f32.mrf.mxu0  ;;  %v5252_v51 = vpop.f32.mrf.mxu1  ;;  %v5251_v54 = vadd.f32 %v14180_v29, %v5250_v47  ;;  %v13000_v44 = vld [vmem:[%s13556_s11 + $0xc14] ss:$8 sps:$4 sm:$0xff]  }
 0x228   : > { %12299 = vst [vmem:[%s13748_s18 + $0x120] sm:$0xff] %v11167_v48   ;;  %12427 = vst [vmem:[%s13748_s18 + $0x520] sm:$0xff] %v11807_v49   ;;  %v6051_v2 = vmax.f32 %v4227_v52, 0.0 }
 0x229   : > { %v4229_v55 = vpop.f32.mrf.mxu0  ;;  %v5253_v56 = vpop.f32.mrf.mxu1  ;;  %v6307_v53 = vmax.f32 %v5251_v54, 0.0 }
 0x22a   : > { %v4230_v59 = vadd.f32 %v14180_v29, %v4229_v55  ;;  %v5254_v61 = vadd.f32 %v14180_v29, %v5253_v56 }
 0x22b   : > { %v4231_v63 = vpop.f32.mrf.mxu0  ;;  %v5255_v0 = vpop.f32.mrf.mxu1 }
 0x22c   : > { %v6052_v3 = vmax.f32 %v4230_v59, 0.0  ;;  %v6308_v4 = vmax.f32 %v5254_v61, 0.0  ;;  %v13002_v61 = vld [vmem:[%s13556_s11 + $0x410] ss:$8 sps:$4 sm:$0xff]  }
 0x22d   : > { %v4234_v5 = vpop.f32.mrf.mxu0  ;;  %4425 = vmatmul.mubr.bf16.gmra.mxu0 %v12984_v57  ;;  %v5258_v6 = vpop.f32.mrf.mxu1  ;;  %5449 = vmatmul.mubr.bf16.gmra.mxu1 %v12985_v58 }
 0x22e   : > { %v11172_v7 = vpack.c.bf16 %v6052_v3, %v6051_v2  ;;  %v11812_v8 = vpack.c.bf16 %v6308_v4, %v6307_v53  ;;  %9760 = vmatprep.mubr.msk.bf16.mxu0 %vm3120_vm0, %v12986_v62  ;;  %9888 = vmatprep.mubr.msk.bf16.mxu1 %vm3120_vm0, %v12988_v1  ;;  %v4235_v11 = vadd.f32 %v14180_v29, %v4234_v5  ;;  %v13003_v62 = vld [vmem:[%s13556_s11 + $0xc10] ss:$8 sps:$4 sm:$0xff]   ;;  %v13004_v1 = vld [vmem:[%s13556_s11 + $0x424] ss:$8 sps:$4 sm:$0xff]  }
 0x22f   : > { %v4236_v9 = vpop.f32.mrf.mxu0  ;;  %v5260_v10 = vpop.f32.mrf.mxu1  ;;  %v5259_v12 = vadd.f32 %v14180_v29, %v5258_v6  ;;  %v13006_v3 = vld [vmem:[%s13556_s11 + $0xc24] ss:$8 sps:$4 sm:$0xff]  }
 0x230   : > { %12300 = vst [vmem:[%s13748_s18 + $0x128] sm:$0xff] %v11172_v7   ;;  %12428 = vst [vmem:[%s13748_s18 + $0x528] sm:$0xff] %v11812_v8   ;;  %v6053_v23 = vmax.f32 %v4235_v11, 0.0 }
 0x231   : > { %v4237_v13 = vpop.f32.mrf.mxu0  ;;  %v5261_v14 = vpop.f32.mrf.mxu1  ;;  %v6309_v24 = vmax.f32 %v5259_v12, 0.0 }
 0x232   : > { %v4238_v17 = vadd.f32 %v14180_v29, %v4237_v13  ;;  %v5262_v18 = vadd.f32 %v14180_v29, %v5261_v14 }
 0x233   : > { %v4239_v20 = vpop.f32.mrf.mxu0  ;;  %v5263_v21 = vpop.f32.mrf.mxu1 }
 0x234   : > { %v6054_v25 = vmax.f32 %v4238_v17, 0.0  ;;  %v6310_v26 = vmax.f32 %v5262_v18, 0.0  ;;  %v13008_v18 = vld [vmem:[%s13556_s11 + $0x420] ss:$8 sps:$4 sm:$0xff]  }
 0x235   : > { %v4242_v27 = vpop.f32.mrf.mxu0  ;;  %4433 = vmatmul.mubr.bf16.gmra.mxu0 %v12990_v15  ;;  %v5266_v60 = vpop.f32.mrf.mxu1  ;;  %5457 = vmatmul.mubr.bf16.gmra.mxu1 %v12991_v16 }
 0x236   : > { %v11177_v28 = vpack.c.bf16 %v6054_v25, %v6053_v23  ;;  %v11817_v30 = vpack.c.bf16 %v6310_v26, %v6309_v24  ;;  %9761 = vmatprep.mubr.msk.bf16.mxu0 %vm3120_vm0, %v12992_v19  ;;  %9889 = vmatprep.mubr.msk.bf16.mxu1 %vm3120_vm0, %v12994_v22  ;;  %v4243_v33 = vadd.f32 %v14180_v29, %v4242_v27  ;;  %v13009_v19 = vld [vmem:[%s13556_s11 + $0xc20] ss:$8 sps:$4 sm:$0xff]   ;;  %v13010_v22 = vld [vmem:[%s13556_s11 + $0x434] ss:$8 sps:$4 sm:$0xff]  }
 0x237   : > { %v4244_v31 = vpop.f32.mrf.mxu0  ;;  %v5268_v32 = vpop.f32.mrf.mxu1  ;;  %v5267_v34 = vadd.f32 %v14180_v29, %v5266_v60  ;;  %v13012_v25 = vld [vmem:[%s13556_s11 + $0xc34] ss:$8 sps:$4 sm:$0xff]  }
 0x238   : > { %12301 = vst [vmem:[%s13748_s18 + $0x130] sm:$0xff] %v11177_v28   ;;  %12429 = vst [vmem:[%s13748_s18 + $0x530] sm:$0xff] %v11817_v30   ;;  %v6055_v45 = vmax.f32 %v4243_v33, 0.0 }
 0x239   : > { %v4245_v35 = vpop.f32.mrf.mxu0  ;;  %v5269_v36 = vpop.f32.mrf.mxu1  ;;  %v6311_v46 = vmax.f32 %v5267_v34, 0.0 }
 0x23a   : > { %v4246_v39 = vadd.f32 %v14180_v29, %v4245_v35  ;;  %v5270_v40 = vadd.f32 %v14180_v29, %v5269_v36 }
 0x23b   : > { %v4247_v42 = vpop.f32.mrf.mxu0  ;;  %v5271_v43 = vpop.f32.mrf.mxu1 }
 0x23c   : > { %v6056_v47 = vmax.f32 %v4246_v39, 0.0  ;;  %v6312_v48 = vmax.f32 %v5270_v40, 0.0  ;;  %v13014_v40 = vld [vmem:[%s13556_s11 + $0x430] ss:$8 sps:$4 sm:$0xff]  }
 0x23d   : > { %v4250_v49 = vpop.f32.mrf.mxu0  ;;  %4441 = vmatmul.mubr.bf16.gmra.mxu0 %v12996_v37  ;;  %v5274_v50 = vpop.f32.mrf.mxu1  ;;  %5465 = vmatmul.mubr.bf16.gmra.mxu1 %v12997_v38 }
 0x23e   : > { %v11182_v51 = vpack.c.bf16 %v6056_v47, %v6055_v45  ;;  %v11822_v52 = vpack.c.bf16 %v6312_v48, %v6311_v46  ;;  %9762 = vmatprep.mubr.msk.bf16.mxu0 %vm3120_vm0, %v12998_v41  ;;  %9890 = vmatprep.mubr.msk.bf16.mxu1 %vm3120_vm0, %v13000_v44  ;;  %v4251_v56 = vadd.f32 %v14180_v29, %v4250_v49  ;;  %v13015_v41 = vld [vmem:[%s13556_s11 + $0xc30] ss:$8 sps:$4 sm:$0xff]   ;;  %v13016_v44 = vld [vmem:[%s13556_s11 + $0x444] ss:$8 sps:$4 sm:$0xff]  }
 0x23f   : > { %v4252_v54 = vpop.f32.mrf.mxu0  ;;  %v5276_v55 = vpop.f32.mrf.mxu1  ;;  %v5275_v57 = vadd.f32 %v14180_v29, %v5274_v50  ;;  %v13018_v47 = vld [vmem:[%s13556_s11 + $0xc44] ss:$8 sps:$4 sm:$0xff]  }
 0x240   : > { %12302 = vst [vmem:[%s13748_s18 + $0x138] sm:$0xff] %v11182_v51   ;;  %12430 = vst [vmem:[%s13748_s18 + $0x538] sm:$0xff] %v11822_v52   ;;  %v6057_v4 = vmax.f32 %v4251_v56, 0.0 }
 0x241   : > { %v4253_v58 = vpop.f32.mrf.mxu0  ;;  %v5277_v59 = vpop.f32.mrf.mxu1  ;;  %v6313_v5 = vmax.f32 %v5275_v57, 0.0 }
 0x242   : > { %v4254_v63 = vadd.f32 %v14180_v29, %v4253_v58  ;;  %v5278_v0 = vadd.f32 %v14180_v29, %v5277_v59 }
 0x243   : > { %v4255_v2 = vpop.f32.mrf.mxu0  ;;  %v5279_v53 = vpop.f32.mrf.mxu1 }
 0x244   : > { %v6058_v6 = vmax.f32 %v4254_v63, 0.0  ;;  %v6314_v7 = vmax.f32 %v5278_v0, 0.0  ;;  %v13020_v0 = vld [vmem:[%s13556_s11 + $0x440] ss:$8 sps:$4 sm:$0xff]  }
 0x245   : > { %v4258_v8 = vpop.f32.mrf.mxu0  ;;  %4449 = vmatmul.mubr.bf16.gmra.mxu0 %v13002_v61  ;;  %v5282_v9 = vpop.f32.mrf.mxu1  ;;  %5473 = vmatmul.mubr.bf16.gmra.mxu1 %v13003_v62 }
 0x246   : > { %v11187_v10 = vpack.c.bf16 %v6058_v6, %v6057_v4  ;;  %v11827_v11 = vpack.c.bf16 %v6314_v7, %v6313_v5  ;;  %9763 = vmatprep.mubr.msk.bf16.mxu0 %vm3120_vm0, %v13004_v1  ;;  %9891 = vmatprep.mubr.msk.bf16.mxu1 %vm3120_vm0, %v13006_v3  ;;  %v4259_v14 = vadd.f32 %v14180_v29, %v4258_v8  ;;  %v13021_v1 = vld [vmem:[%s13556_s11 + $0xc40] ss:$8 sps:$4 sm:$0xff]   ;;  %v13022_v3 = vld [vmem:[%s13556_s11 + $0x454] ss:$8 sps:$4 sm:$0xff]  }
 0x247   : > { %v4260_v12 = vpop.f32.mrf.mxu0  ;;  %v5284_v13 = vpop.f32.mrf.mxu1  ;;  %v5283_v15 = vadd.f32 %v14180_v29, %v5282_v9  ;;  %v13024_v6 = vld [vmem:[%s13556_s11 + $0xc54] ss:$8 sps:$4 sm:$0xff]  }
 0x248   : > { %12303 = vst [vmem:[%s13748_s18 + $0x140] sm:$0xff] %v11187_v10   ;;  %12431 = vst [vmem:[%s13748_s18 + $0x540] sm:$0xff] %v11827_v11   ;;  %v6059_v26 = vmax.f32 %v4259_v14, 0.0 }
 0x249   : > { %v4261_v16 = vpop.f32.mrf.mxu0  ;;  %v5285_v17 = vpop.f32.mrf.mxu1  ;;  %v6315_v27 = vmax.f32 %v5283_v15, 0.0 }
 0x24a   : > { %v4262_v20 = vadd.f32 %v14180_v29, %v4261_v16  ;;  %v5286_v21 = vadd.f32 %v14180_v29, %v5285_v17 }
 0x24b   : > { %v4263_v23 = vpop.f32.mrf.mxu0  ;;  %v5287_v24 = vpop.f32.mrf.mxu1 }
 0x24c   : > { %v6060_v60 = vmax.f32 %v4262_v20, 0.0  ;;  %v6316_v28 = vmax.f32 %v5286_v21, 0.0  ;;  %v13026_v21 = vld [vmem:[%s13556_s11 + $0x450] ss:$8 sps:$4 sm:$0xff]  }
 0x24d   : > { %v4266_v30 = vpop.f32.mrf.mxu0  ;;  %4457 = vmatmul.mubr.bf16.gmra.mxu0 %v13008_v18  ;;  %v5290_v31 = vpop.f32.mrf.mxu1  ;;  %5481 = vmatmul.mubr.bf16.gmra.mxu1 %v13009_v19 }
 0x24e   : > { %v11192_v32 = vpack.c.bf16 %v6060_v60, %v6059_v26  ;;  %v11832_v33 = vpack.c.bf16 %v6316_v28, %v6315_v27  ;;  %9764 = vmatprep.mubr.msk.bf16.mxu0 %vm3120_vm0, %v13010_v22  ;;  %9892 = vmatprep.mubr.msk.bf16.mxu1 %vm3120_vm0, %v13012_v25  ;;  %v4267_v36 = vadd.f32 %v14180_v29, %v4266_v30  ;;  %v13027_v22 = vld [vmem:[%s13556_s11 + $0xc50] ss:$8 sps:$4 sm:$0xff]   ;;  %v13028_v25 = vld [vmem:[%s13556_s11 + $0x464] ss:$8 sps:$4 sm:$0xff]  }
 0x24f   : > { %v4268_v34 = vpop.f32.mrf.mxu0  ;;  %v5292_v35 = vpop.f32.mrf.mxu1  ;;  %v5291_v37 = vadd.f32 %v14180_v29, %v5290_v31  ;;  %v13030_v60 = vld [vmem:[%s13556_s11 + $0xc64] ss:$8 sps:$4 sm:$0xff]  }
 0x250   : > { %12304 = vst [vmem:[%s13748_s18 + $0x148] sm:$0xff] %v11192_v32   ;;  %12432 = vst [vmem:[%s13748_s18 + $0x548] sm:$0xff] %v11832_v33   ;;  %v6061_v48 = vmax.f32 %v4267_v36, 0.0 }
 0x251   : > { %v4269_v38 = vpop.f32.mrf.mxu0  ;;  %v5293_v39 = vpop.f32.mrf.mxu1  ;;  %v6317_v49 = vmax.f32 %v5291_v37, 0.0 }
 0x252   : > { %v4270_v42 = vadd.f32 %v14180_v29, %v4269_v38  ;;  %v5294_v43 = vadd.f32 %v14180_v29, %v5293_v39 }
 0x253   : > { %v4271_v45 = vpop.f32.mrf.mxu0  ;;  %v5295_v46 = vpop.f32.mrf.mxu1 }
 0x254   : > { %v6062_v50 = vmax.f32 %v4270_v42, 0.0  ;;  %v6318_v51 = vmax.f32 %v5294_v43, 0.0  ;;  %v13032_v43 = vld [vmem:[%s13556_s11 + $0x460] ss:$8 sps:$4 sm:$0xff]  }
 0x255   : > { %v4274_v52 = vpop.f32.mrf.mxu0  ;;  %4465 = vmatmul.mubr.bf16.gmra.mxu0 %v13014_v40  ;;  %v5298_v54 = vpop.f32.mrf.mxu1  ;;  %5489 = vmatmul.mubr.bf16.gmra.mxu1 %v13015_v41 }
 0x256   : > { %v11197_v55 = vpack.c.bf16 %v6062_v50, %v6061_v48  ;;  %v11837_v56 = vpack.c.bf16 %v6318_v51, %v6317_v49  ;;  %9765 = vmatprep.mubr.msk.bf16.mxu0 %vm3120_vm0, %v13016_v44  ;;  %9893 = vmatprep.mubr.msk.bf16.mxu1 %vm3120_vm0, %v13018_v47  ;;  %v4275_v59 = vadd.f32 %v14180_v29, %v4274_v52  ;;  %v13033_v44 = vld [vmem:[%s13556_s11 + $0xc60] ss:$8 sps:$4 sm:$0xff]   ;;  %v13034_v47 = vld [vmem:[%s13556_s11 + $0x474] ss:$8 sps:$4 sm:$0xff]  }
 0x257   : > { %v4276_v57 = vpop.f32.mrf.mxu0  ;;  %v5300_v58 = vpop.f32.mrf.mxu1  ;;  %v5299_v61 = vadd.f32 %v14180_v29, %v5298_v54  ;;  %v13036_v50 = vld [vmem:[%s13556_s11 + $0xc74] ss:$8 sps:$4 sm:$0xff]  }
 0x258   : > { %12305 = vst [vmem:[%s13748_s18 + $0x150] sm:$0xff] %v11197_v55   ;;  %12433 = vst [vmem:[%s13748_s18 + $0x550] sm:$0xff] %v11837_v56   ;;  %v6063_v7 = vmax.f32 %v4275_v59, 0.0 }
 0x259   : > { %v4277_v62 = vpop.f32.mrf.mxu0  ;;  %v5301_v63 = vpop.f32.mrf.mxu1  ;;  %v6319_v8 = vmax.f32 %v5299_v61, 0.0 }
 0x25a   : > { %v4278_v2 = vadd.f32 %v14180_v29, %v4277_v62  ;;  %v5302_v53 = vadd.f32 %v14180_v29, %v5301_v63 }
 0x25b   : > { %v4279_v4 = vpop.f32.mrf.mxu0  ;;  %v5303_v5 = vpop.f32.mrf.mxu1 }
 0x25c   : > { %v6064_v9 = vmax.f32 %v4278_v2, 0.0  ;;  %v6320_v10 = vmax.f32 %v5302_v53, 0.0  ;;  %v13038_v53 = vld [vmem:[%s13556_s11 + $0x470] ss:$8 sps:$4 sm:$0xff]  }
 0x25d   : > { %v4282_v11 = vpop.f32.mrf.mxu0  ;;  %4473 = vmatmul.mubr.bf16.gmra.mxu0 %v13020_v0  ;;  %v5306_v12 = vpop.f32.mrf.mxu1  ;;  %5497 = vmatmul.mubr.bf16.gmra.mxu1 %v13021_v1 }
 0x25e   : > { %v11202_v13 = vpack.c.bf16 %v6064_v9, %v6063_v7  ;;  %v11842_v14 = vpack.c.bf16 %v6320_v10, %v6319_v8  ;;  %9766 = vmatprep.mubr.msk.bf16.mxu0 %vm3120_vm0, %v13022_v3  ;;  %9894 = vmatprep.mubr.msk.bf16.mxu1 %vm3120_vm0, %v13024_v6  ;;  %v4283_v17 = vadd.f32 %v14180_v29, %v4282_v11  ;;  %v13039_v3 = vld [vmem:[%s13556_s11 + $0xc70] ss:$8 sps:$4 sm:$0xff]   ;;  %v13040_v6 = vld [vmem:[%s13556_s11 + $0x484] ss:$8 sps:$4 sm:$0xff]  }
 0x25f   : > { %v4284_v15 = vpop.f32.mrf.mxu0  ;;  %v5308_v16 = vpop.f32.mrf.mxu1  ;;  %v5307_v18 = vadd.f32 %v14180_v29, %v5306_v12  ;;  %v13042_v9 = vld [vmem:[%s13556_s11 + $0xc84] ss:$8 sps:$4 sm:$0xff]  }
 0x260   : > { %12306 = vst [vmem:[%s13748_s18 + $0x158] sm:$0xff] %v11202_v13   ;;  %12434 = vst [vmem:[%s13748_s18 + $0x558] sm:$0xff] %v11842_v14   ;;  %v6065_v28 = vmax.f32 %v4283_v17, 0.0 }
 0x261   : > { %v4285_v19 = vpop.f32.mrf.mxu0  ;;  %v5309_v20 = vpop.f32.mrf.mxu1  ;;  %v6321_v30 = vmax.f32 %v5307_v18, 0.0 }
 0x262   : > { %v4286_v23 = vadd.f32 %v14180_v29, %v4285_v19  ;;  %v5310_v24 = vadd.f32 %v14180_v29, %v5309_v20 }
 0x263   : > { %v4287_v26 = vpop.f32.mrf.mxu0  ;;  %v5311_v27 = vpop.f32.mrf.mxu1 }
 0x264   : > { %v6066_v31 = vmax.f32 %v4286_v23, 0.0  ;;  %v6322_v32 = vmax.f32 %v5310_v24, 0.0  ;;  %v13044_v24 = vld [vmem:[%s13556_s11 + $0x480] ss:$8 sps:$4 sm:$0xff]  }
 0x265   : > { %v4290_v33 = vpop.f32.mrf.mxu0  ;;  %4481 = vmatmul.mubr.bf16.gmra.mxu0 %v13026_v21  ;;  %v5314_v34 = vpop.f32.mrf.mxu1  ;;  %5505 = vmatmul.mubr.bf16.gmra.mxu1 %v13027_v22 }
 0x266   : > { %v11207_v35 = vpack.c.bf16 %v6066_v31, %v6065_v28  ;;  %v11847_v36 = vpack.c.bf16 %v6322_v32, %v6321_v30  ;;  %9767 = vmatprep.mubr.msk.bf16.mxu0 %vm3120_vm0, %v13028_v25  ;;  %9895 = vmatprep.mubr.msk.bf16.mxu1 %vm3120_vm0, %v13030_v60  ;;  %v4291_v39 = vadd.f32 %v14180_v29, %v4290_v33  ;;  %v13045_v25 = vld [vmem:[%s13556_s11 + $0xc80] ss:$8 sps:$4 sm:$0xff]   ;;  %v13046_v60 = vld [vmem:[%s13556_s11 + $0x494] ss:$8 sps:$4 sm:$0xff]  }
 0x267   : > { %v4292_v37 = vpop.f32.mrf.mxu0  ;;  %v5316_v38 = vpop.f32.mrf.mxu1  ;;  %v5315_v40 = vadd.f32 %v14180_v29, %v5314_v34  ;;  %v13048_v31 = vld [vmem:[%s13556_s11 + $0xc94] ss:$8 sps:$4 sm:$0xff]  }
 0x268   : > { %12307 = vst [vmem:[%s13748_s18 + $0x160] sm:$0xff] %v11207_v35   ;;  %12435 = vst [vmem:[%s13748_s18 + $0x560] sm:$0xff] %v11847_v36   ;;  %v6067_v51 = vmax.f32 %v4291_v39, 0.0 }
 0x269   : > { %v4293_v41 = vpop.f32.mrf.mxu0  ;;  %v5317_v42 = vpop.f32.mrf.mxu1  ;;  %v6323_v52 = vmax.f32 %v5315_v40, 0.0 }
 0x26a   : > { %v4294_v45 = vadd.f32 %v14180_v29, %v4293_v41  ;;  %v5318_v46 = vadd.f32 %v14180_v29, %v5317_v42 }
 0x26b   : > { %v4295_v48 = vpop.f32.mrf.mxu0  ;;  %v5319_v49 = vpop.f32.mrf.mxu1 }
 0x26c   : > { %v6068_v54 = vmax.f32 %v4294_v45, 0.0  ;;  %v6324_v55 = vmax.f32 %v5318_v46, 0.0  ;;  %v13050_v46 = vld [vmem:[%s13556_s11 + $0x490] ss:$8 sps:$4 sm:$0xff]  }
 0x26d   : > { %v4298_v56 = vpop.f32.mrf.mxu0  ;;  %4489 = vmatmul.mubr.bf16.gmra.mxu0 %v13032_v43  ;;  %v5322_v57 = vpop.f32.mrf.mxu1  ;;  %5513 = vmatmul.mubr.bf16.gmra.mxu1 %v13033_v44 }
 0x26e   : > { %v11212_v58 = vpack.c.bf16 %v6068_v54, %v6067_v51  ;;  %v11852_v59 = vpack.c.bf16 %v6324_v55, %v6323_v52  ;;  %9768 = vmatprep.mubr.msk.bf16.mxu0 %vm3120_vm0, %v13034_v47  ;;  %9896 = vmatprep.mubr.msk.bf16.mxu1 %vm3120_vm0, %v13036_v50  ;;  %v4299_v63 = vadd.f32 %v14180_v29, %v4298_v56  ;;  %v13051_v47 = vld [vmem:[%s13556_s11 + $0xc90] ss:$8 sps:$4 sm:$0xff]   ;;  %v13052_v50 = vld [vmem:[%s13556_s11 + $0x4a4] ss:$8 sps:$4 sm:$0xff]  }
 0x26f   : > { %v4300_v61 = vpop.f32.mrf.mxu0  ;;  %v5324_v62 = vpop.f32.mrf.mxu1  ;;  %v5323_v0 = vadd.f32 %v14180_v29, %v5322_v57  ;;  %v13054_v54 = vld [vmem:[%s13556_s11 + $0xca4] ss:$8 sps:$4 sm:$0xff]  }
 0x270   : > { %12308 = vst [vmem:[%s13748_s18 + $0x168] sm:$0xff] %v11212_v58   ;;  %12436 = vst [vmem:[%s13748_s18 + $0x568] sm:$0xff] %v11852_v59   ;;  %v6069_v10 = vmax.f32 %v4299_v63, 0.0 }
 0x271   : > { %v4301_v1 = vpop.f32.mrf.mxu0  ;;  %v5325_v2 = vpop.f32.mrf.mxu1  ;;  %v6325_v11 = vmax.f32 %v5323_v0, 0.0 }
 0x272   : > { %v4302_v4 = vadd.f32 %v14180_v29, %v4301_v1  ;;  %v5326_v5 = vadd.f32 %v14180_v29, %v5325_v2 }
 0x273   : > { %v4303_v7 = vpop.f32.mrf.mxu0  ;;  %v5327_v8 = vpop.f32.mrf.mxu1 }
 0x274   : > { %v6070_v12 = vmax.f32 %v4302_v4, 0.0  ;;  %v6326_v13 = vmax.f32 %v5326_v5, 0.0  ;;  %v13056_v5 = vld [vmem:[%s13556_s11 + $0x4a0] ss:$8 sps:$4 sm:$0xff]  }
 0x275   : > { %v4306_v14 = vpop.f32.mrf.mxu0  ;;  %4497 = vmatmul.mubr.bf16.gmra.mxu0 %v13038_v53  ;;  %v5330_v15 = vpop.f32.mrf.mxu1  ;;  %5521 = vmatmul.mubr.bf16.gmra.mxu1 %v13039_v3 }
 0x276   : > { %v11217_v16 = vpack.c.bf16 %v6070_v12, %v6069_v10  ;;  %v11857_v17 = vpack.c.bf16 %v6326_v13, %v6325_v11  ;;  %9769 = vmatprep.mubr.msk.bf16.mxu0 %vm3120_vm0, %v13040_v6  ;;  %9897 = vmatprep.mubr.msk.bf16.mxu1 %vm3120_vm0, %v13042_v9  ;;  %v4307_v20 = vadd.f32 %v14180_v29, %v4306_v14  ;;  %v13057_v6 = vld [vmem:[%s13556_s11 + $0xca0] ss:$8 sps:$4 sm:$0xff]   ;;  %v13058_v9 = vld [vmem:[%s13556_s11 + $0x4b4] ss:$8 sps:$4 sm:$0xff]  }
 0x277   : > { %v4308_v18 = vpop.f32.mrf.mxu0  ;;  %v5332_v19 = vpop.f32.mrf.mxu1  ;;  %v5331_v21 = vadd.f32 %v14180_v29, %v5330_v15  ;;  %v13060_v12 = vld [vmem:[%s13556_s11 + $0xcb4] ss:$8 sps:$4 sm:$0xff]  }
 0x278   : > { %12309 = vst [vmem:[%s13748_s18 + $0x170] sm:$0xff] %v11217_v16   ;;  %12437 = vst [vmem:[%s13748_s18 + $0x570] sm:$0xff] %v11857_v17   ;;  %v6071_v32 = vmax.f32 %v4307_v20, 0.0 }
 0x279   : > { %v4309_v22 = vpop.f32.mrf.mxu0  ;;  %v5333_v23 = vpop.f32.mrf.mxu1  ;;  %v6327_v33 = vmax.f32 %v5331_v21, 0.0 }
 0x27a   : > { %v4310_v26 = vadd.f32 %v14180_v29, %v4309_v22  ;;  %v5334_v27 = vadd.f32 %v14180_v29, %v5333_v23 }
 0x27b   : > { %v4311_v28 = vpop.f32.mrf.mxu0  ;;  %v5335_v30 = vpop.f32.mrf.mxu1 }
 0x27c   : > { %v6072_v34 = vmax.f32 %v4310_v26, 0.0  ;;  %v6328_v35 = vmax.f32 %v5334_v27, 0.0  ;;  %v13062_v27 = vld [vmem:[%s13556_s11 + $0x4b0] ss:$8 sps:$4 sm:$0xff]  }
 0x27d   : > { %v4314_v36 = vpop.f32.mrf.mxu0  ;;  %4505 = vmatmul.mubr.bf16.gmra.mxu0 %v13044_v24  ;;  %v5338_v37 = vpop.f32.mrf.mxu1  ;;  %5529 = vmatmul.mubr.bf16.gmra.mxu1 %v13045_v25 }
 0x27e   : > { %v11222_v38 = vpack.c.bf16 %v6072_v34, %v6071_v32  ;;  %v11862_v39 = vpack.c.bf16 %v6328_v35, %v6327_v33  ;;  %9770 = vmatprep.mubr.msk.bf16.mxu0 %vm3120_vm0, %v13046_v60  ;;  %9898 = vmatprep.mubr.msk.bf16.mxu1 %vm3120_vm0, %v13048_v31  ;;  %v4315_v42 = vadd.f32 %v14180_v29, %v4314_v36  ;;  %v13063_v60 = vld [vmem:[%s13556_s11 + $0xcb0] ss:$8 sps:$4 sm:$0xff]   ;;  %v13064_v31 = vld [vmem:[%s13556_s11 + $0x4c4] ss:$8 sps:$4 sm:$0xff]  }
 0x27f   : > { %v4316_v40 = vpop.f32.mrf.mxu0  ;;  %v5340_v41 = vpop.f32.mrf.mxu1  ;;  %v5339_v43 = vadd.f32 %v14180_v29, %v5338_v37  ;;  %v13066_v34 = vld [vmem:[%s13556_s11 + $0xcc4] ss:$8 sps:$4 sm:$0xff]  }
 0x280   : > { %12310 = vst [vmem:[%s13748_s18 + $0x178] sm:$0xff] %v11222_v38   ;;  %12438 = vst [vmem:[%s13748_s18 + $0x578] sm:$0xff] %v11862_v39   ;;  %v6073_v55 = vmax.f32 %v4315_v42, 0.0 }
 0x281   : > { %v4317_v44 = vpop.f32.mrf.mxu0  ;;  %v5341_v45 = vpop.f32.mrf.mxu1  ;;  %v6329_v56 = vmax.f32 %v5339_v43, 0.0 }
 0x282   : > { %v4318_v48 = vadd.f32 %v14180_v29, %v4317_v44  ;;  %v5342_v49 = vadd.f32 %v14180_v29, %v5341_v45 }
 0x283   : > { %v4319_v51 = vpop.f32.mrf.mxu0  ;;  %v5343_v52 = vpop.f32.mrf.mxu1 }
 0x284   : > { %v6074_v57 = vmax.f32 %v4318_v48, 0.0  ;;  %v6330_v58 = vmax.f32 %v5342_v49, 0.0  ;;  %v13068_v49 = vld [vmem:[%s13556_s11 + $0x4c0] ss:$8 sps:$4 sm:$0xff]  }
 0x285   : > { %v4322_v59 = vpop.f32.mrf.mxu0  ;;  %4513 = vmatmul.mubr.bf16.gmra.mxu0 %v13050_v46  ;;  %v5346_v61 = vpop.f32.mrf.mxu1  ;;  %5537 = vmatmul.mubr.bf16.gmra.mxu1 %v13051_v47 }
 0x286   : > { %v11227_v62 = vpack.c.bf16 %v6074_v57, %v6073_v55  ;;  %v11867_v63 = vpack.c.bf16 %v6330_v58, %v6329_v56  ;;  %9771 = vmatprep.mubr.msk.bf16.mxu0 %vm3120_vm0, %v13052_v50  ;;  %9899 = vmatprep.mubr.msk.bf16.mxu1 %vm3120_vm0, %v13054_v54  ;;  %v4323_v2 = vadd.f32 %v14180_v29, %v4322_v59  ;;  %v13069_v50 = vld [vmem:[%s13556_s11 + $0xcc0] ss:$8 sps:$4 sm:$0xff]   ;;  %v13070_v54 = vld [vmem:[%s13556_s11 + $0x4d4] ss:$8 sps:$4 sm:$0xff]  }
 0x287   : > { %v4324_v0 = vpop.f32.mrf.mxu0  ;;  %v5348_v1 = vpop.f32.mrf.mxu1  ;;  %v5347_v53 = vadd.f32 %v14180_v29, %v5346_v61  ;;  %v13072_v57 = vld [vmem:[%s13556_s11 + $0xcd4] ss:$8 sps:$4 sm:$0xff]  }
 0x288   : > { %12311 = vst [vmem:[%s13748_s18 + $0x180] sm:$0xff] %v11227_v62   ;;  %12439 = vst [vmem:[%s13748_s18 + $0x580] sm:$0xff] %v11867_v63   ;;  %v6075_v13 = vmax.f32 %v4323_v2, 0.0 }
 0x289   : > { %v4325_v3 = vpop.f32.mrf.mxu0  ;;  %v5349_v4 = vpop.f32.mrf.mxu1  ;;  %v6331_v14 = vmax.f32 %v5347_v53, 0.0 }
 0x28a   : > { %v4326_v7 = vadd.f32 %v14180_v29, %v4325_v3  ;;  %v5350_v8 = vadd.f32 %v14180_v29, %v5349_v4 }
 0x28b   : > { %v4327_v10 = vpop.f32.mrf.mxu0  ;;  %v5351_v11 = vpop.f32.mrf.mxu1 }
 0x28c   : > { %v6076_v15 = vmax.f32 %v4326_v7, 0.0  ;;  %v6332_v16 = vmax.f32 %v5350_v8, 0.0  ;;  %v13074_v8 = vld [vmem:[%s13556_s11 + $0x4d0] ss:$8 sps:$4 sm:$0xff]  }
 0x28d   : > { %v4330_v17 = vpop.f32.mrf.mxu0  ;;  %4521 = vmatmul.mubr.bf16.gmra.mxu0 %v13056_v5  ;;  %v5354_v18 = vpop.f32.mrf.mxu1  ;;  %5545 = vmatmul.mubr.bf16.gmra.mxu1 %v13057_v6 }
 0x28e   : > { %v11232_v19 = vpack.c.bf16 %v6076_v15, %v6075_v13  ;;  %v11872_v20 = vpack.c.bf16 %v6332_v16, %v6331_v14  ;;  %9772 = vmatprep.mubr.msk.bf16.mxu0 %vm3120_vm0, %v13058_v9  ;;  %9900 = vmatprep.mubr.msk.bf16.mxu1 %vm3120_vm0, %v13060_v12  ;;  %v4331_v23 = vadd.f32 %v14180_v29, %v4330_v17  ;;  %v13075_v9 = vld [vmem:[%s13556_s11 + $0xcd0] ss:$8 sps:$4 sm:$0xff]   ;;  %v13076_v12 = vld [vmem:[%s13556_s11 + $0x4e4] ss:$8 sps:$4 sm:$0xff]  }
 0x28f   : > { %v4332_v21 = vpop.f32.mrf.mxu0  ;;  %v5356_v22 = vpop.f32.mrf.mxu1  ;;  %v5355_v24 = vadd.f32 %v14180_v29, %v5354_v18  ;;  %v13078_v15 = vld [vmem:[%s13556_s11 + $0xce4] ss:$8 sps:$4 sm:$0xff]  }
 0x290   : > { %12312 = vst [vmem:[%s13748_s18 + $0x188] sm:$0xff] %v11232_v19   ;;  %12440 = vst [vmem:[%s13748_s18 + $0x588] sm:$0xff] %v11872_v20   ;;  %v6077_v35 = vmax.f32 %v4331_v23, 0.0 }
 0x291   : > { %v4333_v25 = vpop.f32.mrf.mxu0  ;;  %v5357_v26 = vpop.f32.mrf.mxu1  ;;  %v6333_v36 = vmax.f32 %v5355_v24, 0.0 }
 0x292   : > { %v4334_v28 = vadd.f32 %v14180_v29, %v4333_v25  ;;  %v5358_v30 = vadd.f32 %v14180_v29, %v5357_v26 }
 0x293   : > { %v4335_v32 = vpop.f32.mrf.mxu0  ;;  %v5359_v33 = vpop.f32.mrf.mxu1 }
 0x294   : > { %v6078_v37 = vmax.f32 %v4334_v28, 0.0  ;;  %v6334_v38 = vmax.f32 %v5358_v30, 0.0  ;;  %v13080_v30 = vld [vmem:[%s13556_s11 + $0x4e0] ss:$8 sps:$4 sm:$0xff]  }
 0x295   : > { %v4338_v39 = vpop.f32.mrf.mxu0  ;;  %4529 = vmatmul.mubr.bf16.gmra.mxu0 %v13062_v27  ;;  %v5362_v40 = vpop.f32.mrf.mxu1  ;;  %5553 = vmatmul.mubr.bf16.gmra.mxu1 %v13063_v60 }
 0x296   : > { %v11237_v41 = vpack.c.bf16 %v6078_v37, %v6077_v35  ;;  %v11877_v42 = vpack.c.bf16 %v6334_v38, %v6333_v36  ;;  %9773 = vmatprep.mubr.msk.bf16.mxu0 %vm3120_vm0, %v13064_v31  ;;  %9901 = vmatprep.mubr.msk.bf16.mxu1 %vm3120_vm0, %v13066_v34  ;;  %v4339_v45 = vadd.f32 %v14180_v29, %v4338_v39  ;;  %v13081_v31 = vld [vmem:[%s13556_s11 + $0xce0] ss:$8 sps:$4 sm:$0xff]   ;;  %v13082_v34 = vld [vmem:[%s13556_s11 + $0x4f4] ss:$8 sps:$4 sm:$0xff]  }
 0x297   : > { %v4340_v43 = vpop.f32.mrf.mxu0  ;;  %v5364_v44 = vpop.f32.mrf.mxu1  ;;  %v5363_v46 = vadd.f32 %v14180_v29, %v5362_v40  ;;  %v13084_v37 = vld [vmem:[%s13556_s11 + $0xcf4] ss:$8 sps:$4 sm:$0xff]  }
 0x298   : > { %12313 = vst [vmem:[%s13748_s18 + $0x190] sm:$0xff] %v11237_v41   ;;  %12441 = vst [vmem:[%s13748_s18 + $0x590] sm:$0xff] %v11877_v42   ;;  %v6079_v58 = vmax.f32 %v4339_v45, 0.0 }
 0x299   : > { %v4341_v47 = vpop.f32.mrf.mxu0  ;;  %v5365_v48 = vpop.f32.mrf.mxu1  ;;  %v6335_v59 = vmax.f32 %v5363_v46, 0.0 }
 0x29a   : > { %v4342_v51 = vadd.f32 %v14180_v29, %v4341_v47  ;;  %v5366_v52 = vadd.f32 %v14180_v29, %v5365_v48 }
 0x29b   : > { %v4343_v55 = vpop.f32.mrf.mxu0  ;;  %v5367_v56 = vpop.f32.mrf.mxu1 }
 0x29c   : > { %v6080_v61 = vmax.f32 %v4342_v51, 0.0  ;;  %v6336_v62 = vmax.f32 %v5366_v52, 0.0  ;;  %v13086_v52 = vld [vmem:[%s13556_s11 + $0x4f0] ss:$8 sps:$4 sm:$0xff]  }
 0x29d   : > { %v4346_v63 = vpop.f32.mrf.mxu0  ;;  %4537 = vmatmul.mubr.bf16.gmra.mxu0 %v13068_v49  ;;  %v5370_v0 = vpop.f32.mrf.mxu1  ;;  %5561 = vmatmul.mubr.bf16.gmra.mxu1 %v13069_v50 }
 0x29e   : > { %v11242_v1 = vpack.c.bf16 %v6080_v61, %v6079_v58  ;;  %v11882_v2 = vpack.c.bf16 %v6336_v62, %v6335_v59  ;;  %9774 = vmatprep.mubr.msk.bf16.mxu0 %vm3120_vm0, %v13070_v54  ;;  %9902 = vmatprep.mubr.msk.bf16.mxu1 %vm3120_vm0, %v13072_v57  ;;  %v4347_v4 = vadd.f32 %v14180_v29, %v4346_v63  ;;  %v13087_v54 = vld [vmem:[%s13556_s11 + $0xcf0] ss:$8 sps:$4 sm:$0xff]   ;;  %v13088_v57 = vld [vmem:[%s13556_s11 + $0x504] ss:$8 sps:$4 sm:$0xff]  }
 0x29f   : > { %v4348_v53 = vpop.f32.mrf.mxu0  ;;  %v5372_v3 = vpop.f32.mrf.mxu1  ;;  %v5371_v5 = vadd.f32 %v14180_v29, %v5370_v0  ;;  %v13090_v61 = vld [vmem:[%s13556_s11 + $0xd04] ss:$8 sps:$4 sm:$0xff]  }
 0x2a0   : > { %12314 = vst [vmem:[%s13748_s18 + $0x198] sm:$0xff] %v11242_v1   ;;  %12442 = vst [vmem:[%s13748_s18 + $0x598] sm:$0xff] %v11882_v2   ;;  %v6081_v16 = vmax.f32 %v4347_v4, 0.0 }
 0x2a1   : > { %v4349_v6 = vpop.f32.mrf.mxu0  ;;  %v5373_v7 = vpop.f32.mrf.mxu1  ;;  %v6337_v17 = vmax.f32 %v5371_v5, 0.0 }
 0x2a2   : > { %v4350_v10 = vadd.f32 %v14180_v29, %v4349_v6  ;;  %v5374_v11 = vadd.f32 %v14180_v29, %v5373_v7  ;;  %v14413_v6 = vld [vmem:[%s15210_s2] ss:$0 sm:$0xff] }
 0x2a3   : > { %v4351_v13 = vpop.f32.mrf.mxu0  ;;  %v5375_v14 = vpop.f32.mrf.mxu1 }
 0x2a4   : > { %v6082_v18 = vmax.f32 %v4350_v10, 0.0  ;;  %v6338_v19 = vmax.f32 %v5374_v11, 0.0  ;;  %v13092_v11 = vld [vmem:[%s13556_s11 + $0x500] ss:$8 sps:$4 sm:$0xff]  }
 0x2a5   : > { %v4354_v20 = vpop.f32.mrf.mxu0  ;;  %4545 = vmatmul.mubr.bf16.gmra.mxu0 %v13074_v8  ;;  %v5378_v21 = vpop.f32.mrf.mxu1  ;;  %5569 = vmatmul.mubr.bf16.gmra.mxu1 %v13075_v9 }
 0x2a6   : > { %v11247_v22 = vpack.c.bf16 %v6082_v18, %v6081_v16  ;;  %v11887_v23 = vpack.c.bf16 %v6338_v19, %v6337_v17  ;;  %9775 = vmatprep.mubr.msk.bf16.mxu0 %vm3120_vm0, %v13076_v12  ;;  %9903 = vmatprep.mubr.msk.bf16.mxu1 %vm3120_vm0, %v13078_v15  ;;  %v4355_v26 = vadd.f32 %v14180_v29, %v4354_v20  ;;  %v13093_v12 = vld [vmem:[%s13556_s11 + $0xd00] ss:$8 sps:$4 sm:$0xff]   ;;  %v13094_v15 = vld [vmem:[%s13556_s11 + $0x514] ss:$8 sps:$4 sm:$0xff]  }
 0x2a7   : > { %v4356_v24 = vpop.f32.mrf.mxu0  ;;  %v5380_v25 = vpop.f32.mrf.mxu1  ;;  %v5379_v27 = vadd.f32 %v14180_v29, %v5378_v21  ;;  %v13096_v18 = vld [vmem:[%s13556_s11 + $0xd14] ss:$8 sps:$4 sm:$0xff]  }
 0x2a8   : > { %12315 = vst [vmem:[%s13748_s18 + $0x1a0] sm:$0xff] %v11247_v22   ;;  %12443 = vst [vmem:[%s13748_s18 + $0x5a0] sm:$0xff] %v11887_v23   ;;  %v6083_v38 = vmax.f32 %v4355_v26, 0.0 }
 0x2a9   : > { %v4357_v60 = vpop.f32.mrf.mxu0  ;;  %v5381_v28 = vpop.f32.mrf.mxu1  ;;  %v6339_v39 = vmax.f32 %v5379_v27, 0.0 }
 0x2aa   : > { %v4358_v32 = vadd.f32 %v14180_v29, %v4357_v60  ;;  %v5382_v33 = vadd.f32 %v14180_v29, %v5381_v28 }
 0x2ab   : > { %v4359_v35 = vpop.f32.mrf.mxu0  ;;  %v5383_v36 = vpop.f32.mrf.mxu1 }
 0x2ac   : > { %v6084_v40 = vmax.f32 %v4358_v32, 0.0  ;;  %v6340_v41 = vmax.f32 %v5382_v33, 0.0  ;;  %v13098_v33 = vld [vmem:[%s13556_s11 + $0x510] ss:$8 sps:$4 sm:$0xff]  }
 0x2ad   : > { %v4362_v42 = vpop.f32.mrf.mxu0  ;;  %4553 = vmatmul.mubr.bf16.gmra.mxu0 %v13080_v30  ;;  %v5386_v43 = vpop.f32.mrf.mxu1  ;;  %5577 = vmatmul.mubr.bf16.gmra.mxu1 %v13081_v31 }
 0x2ae   : > { %v11252_v44 = vpack.c.bf16 %v6084_v40, %v6083_v38  ;;  %v11892_v45 = vpack.c.bf16 %v6340_v41, %v6339_v39  ;;  %9776 = vmatprep.mubr.msk.bf16.mxu0 %vm3120_vm0, %v13082_v34  ;;  %9904 = vmatprep.mubr.msk.bf16.mxu1 %vm3120_vm0, %v13084_v37  ;;  %v4363_v48 = vadd.f32 %v14180_v29, %v4362_v42  ;;  %v13099_v34 = vld [vmem:[%s13556_s11 + $0xd10] ss:$8 sps:$4 sm:$0xff]   ;;  %v13100_v37 = vld [vmem:[%s13556_s11 + $0x524] ss:$8 sps:$4 sm:$0xff]  }
 0x2af   : > { %v4364_v46 = vpop.f32.mrf.mxu0  ;;  %v5388_v47 = vpop.f32.mrf.mxu1  ;;  %v5387_v49 = vadd.f32 %v14180_v29, %v5386_v43  ;;  %v13102_v40 = vld [vmem:[%s13556_s11 + $0xd24] ss:$8 sps:$4 sm:$0xff]  }
 0x2b0   : > { %12316 = vst [vmem:[%s13748_s18 + $0x1a8] sm:$0xff] %v11252_v44   ;;  %12444 = vst [vmem:[%s13748_s18 + $0x5a8] sm:$0xff] %v11892_v45   ;;  %v6085_v62 = vmax.f32 %v4363_v48, 0.0 }
 0x2b1   : > { %v4365_v50 = vpop.f32.mrf.mxu0  ;;  %v5389_v51 = vpop.f32.mrf.mxu1  ;;  %v6341_v63 = vmax.f32 %v5387_v49, 0.0 }
 0x2b2   : > { %v4366_v55 = vadd.f32 %v14180_v29, %v4365_v50  ;;  %v5390_v56 = vadd.f32 %v14180_v29, %v5389_v51 }
 0x2b3   : > { %v4367_v58 = vpop.f32.mrf.mxu0  ;;  %v5391_v59 = vpop.f32.mrf.mxu1 }
 0x2b4   : > { %v6086_v0 = vmax.f32 %v4366_v55, 0.0  ;;  %v6342_v1 = vmax.f32 %v5390_v56, 0.0  ;;  %v13104_v56 = vld [vmem:[%s13556_s11 + $0x520] ss:$8 sps:$4 sm:$0xff]  }
 0x2b5   : > { %v4370_v2 = vpop.f32.mrf.mxu0  ;;  %4561 = vmatmul.mubr.bf16.gmra.mxu0 %v13086_v52  ;;  %v5394_v53 = vpop.f32.mrf.mxu1  ;;  %5585 = vmatmul.mubr.bf16.gmra.mxu1 %v13087_v54 }
 0x2b6   : > { %v11257_v3 = vpack.c.bf16 %v6086_v0, %v6085_v62  ;;  %v11897_v4 = vpack.c.bf16 %v6342_v1, %v6341_v63  ;;  %9777 = vmatprep.mubr.msk.bf16.mxu0 %vm3120_vm0, %v13088_v57  ;;  %9905 = vmatprep.mubr.msk.bf16.mxu1 %vm3120_vm0, %v13090_v61  ;;  %v4371_v7 = vadd.f32 %v14413_v6, %v4370_v2  ;;  %v13105_v57 = vld [vmem:[%s13556_s11 + $0xd20] ss:$8 sps:$4 sm:$0xff]   ;;  %v13106_v61 = vld [vmem:[%s13556_s11 + $0x534] ss:$8 sps:$4 sm:$0xff]  }
 0x2b7   : > { %v4372_v29 = vpop.f32.mrf.mxu0  ;;  %v5396_v5 = vpop.f32.mrf.mxu1  ;;  %v5395_v8 = vadd.f32 %v14413_v6, %v5394_v53  ;;  %v13108_v0 = vld [vmem:[%s13556_s11 + $0xd34] ss:$8 sps:$4 sm:$0xff]  }
 0x2b8   : > { %12317 = vst [vmem:[%s13748_s18 + $0x1b0] sm:$0xff] %v11257_v3   ;;  %12445 = vst [vmem:[%s13748_s18 + $0x5b0] sm:$0xff] %v11897_v4   ;;  %v6087_v19 = vmax.f32 %v4371_v7, 0.0 }
 0x2b9   : > { %v4373_v9 = vpop.f32.mrf.mxu0  ;;  %v5397_v10 = vpop.f32.mrf.mxu1  ;;  %v6343_v20 = vmax.f32 %v5395_v8, 0.0 }
 0x2ba   : > { %v4374_v13 = vadd.f32 %v14413_v6, %v4373_v9  ;;  %v5398_v14 = vadd.f32 %v14413_v6, %v5397_v10 }
 0x2bb   : > { %v4375_v16 = vpop.f32.mrf.mxu0  ;;  %v5399_v17 = vpop.f32.mrf.mxu1 }
 0x2bc   : > { %v6088_v21 = vmax.f32 %v4374_v13, 0.0  ;;  %v6344_v22 = vmax.f32 %v5398_v14, 0.0  ;;  %v13110_v14 = vld [vmem:[%s13556_s11 + $0x530] ss:$8 sps:$4 sm:$0xff]  }
 0x2bd   : > { %v4378_v23 = vpop.f32.mrf.mxu0  ;;  %4569 = vmatmul.mubr.bf16.gmra.mxu0 %v13092_v11  ;;  %v5402_v24 = vpop.f32.mrf.mxu1  ;;  %5593 = vmatmul.mubr.bf16.gmra.mxu1 %v13093_v12 }
 0x2be   : > { %v11262_v25 = vpack.c.bf16 %v6088_v21, %v6087_v19  ;;  %v11902_v26 = vpack.c.bf16 %v6344_v22, %v6343_v20  ;;  %9778 = vmatprep.mubr.msk.bf16.mxu0 %vm3120_vm0, %v13094_v15  ;;  %9906 = vmatprep.mubr.msk.bf16.mxu1 %vm3120_vm0, %v13096_v18  ;;  %v4379_v28 = vadd.f32 %v14413_v6, %v4378_v23  ;;  %v13111_v15 = vld [vmem:[%s13556_s11 + $0xd30] ss:$8 sps:$4 sm:$0xff]   ;;  %v13112_v18 = vld [vmem:[%s13556_s11 + $0x544] ss:$8 sps:$4 sm:$0xff]  }
 0x2bf   : > { %v4380_v27 = vpop.f32.mrf.mxu0  ;;  %v5404_v60 = vpop.f32.mrf.mxu1  ;;  %v5403_v30 = vadd.f32 %v14413_v6, %v5402_v24  ;;  %v13114_v21 = vld [vmem:[%s13556_s11 + $0xd44] ss:$8 sps:$4 sm:$0xff]  }
 0x2c0   : > { %12318 = vst [vmem:[%s13748_s18 + $0x1b8] sm:$0xff] %v11262_v25   ;;  %12446 = vst [vmem:[%s13748_s18 + $0x5b8] sm:$0xff] %v11902_v26   ;;  %v6089_v41 = vmax.f32 %v4379_v28, 0.0 }
 0x2c1   : > { %v4381_v31 = vpop.f32.mrf.mxu0  ;;  %v5405_v32 = vpop.f32.mrf.mxu1  ;;  %v6345_v42 = vmax.f32 %v5403_v30, 0.0 }
 0x2c2   : > { %v4382_v35 = vadd.f32 %v14413_v6, %v4381_v31  ;;  %v5406_v36 = vadd.f32 %v14413_v6, %v5405_v32 }
 0x2c3   : > { %v4383_v38 = vpop.f32.mrf.mxu0  ;;  %v5407_v39 = vpop.f32.mrf.mxu1 }
 0x2c4   : > { %v6090_v43 = vmax.f32 %v4382_v35, 0.0  ;;  %v6346_v44 = vmax.f32 %v5406_v36, 0.0  ;;  %v13116_v36 = vld [vmem:[%s13556_s11 + $0x540] ss:$8 sps:$4 sm:$0xff]  }
 0x2c5   : > { %v4386_v45 = vpop.f32.mrf.mxu0  ;;  %4577 = vmatmul.mubr.bf16.gmra.mxu0 %v13098_v33  ;;  %v5410_v46 = vpop.f32.mrf.mxu1  ;;  %5601 = vmatmul.mubr.bf16.gmra.mxu1 %v13099_v34 }
 0x2c6   : > { %v11267_v47 = vpack.c.bf16 %v6090_v43, %v6089_v41  ;;  %v11907_v48 = vpack.c.bf16 %v6346_v44, %v6345_v42  ;;  %9779 = vmatprep.mubr.msk.bf16.mxu0 %vm3120_vm0, %v13100_v37  ;;  %9907 = vmatprep.mubr.msk.bf16.mxu1 %vm3120_vm0, %v13102_v40  ;;  %v4387_v51 = vadd.f32 %v14413_v6, %v4386_v45  ;;  %v13117_v37 = vld [vmem:[%s13556_s11 + $0xd40] ss:$8 sps:$4 sm:$0xff]   ;;  %v13118_v40 = vld [vmem:[%s13556_s11 + $0x554] ss:$8 sps:$4 sm:$0xff]  }
 0x2c7   : > { %v4388_v49 = vpop.f32.mrf.mxu0  ;;  %v5412_v50 = vpop.f32.mrf.mxu1  ;;  %v5411_v52 = vadd.f32 %v14413_v6, %v5410_v46  ;;  %v13120_v43 = vld [vmem:[%s13556_s11 + $0xd54] ss:$8 sps:$4 sm:$0xff]  }
 0x2c8   : > { %12319 = vst [vmem:[%s13748_s18 + $0x1c0] sm:$0xff] %v11267_v47   ;;  %12447 = vst [vmem:[%s13748_s18 + $0x5c0] sm:$0xff] %v11907_v48   ;;  %v6091_v1 = vmax.f32 %v4387_v51, 0.0 }
 0x2c9   : > { %v4389_v54 = vpop.f32.mrf.mxu0  ;;  %v5413_v55 = vpop.f32.mrf.mxu1  ;;  %v6347_v2 = vmax.f32 %v5411_v52, 0.0 }
 0x2ca   : > { %v4390_v58 = vadd.f32 %v14413_v6, %v4389_v54  ;;  %v5414_v59 = vadd.f32 %v14413_v6, %v5413_v55 }
 0x2cb   : > { %v4391_v62 = vpop.f32.mrf.mxu0  ;;  %v5415_v63 = vpop.f32.mrf.mxu1 }
 0x2cc   : > { %v6092_v53 = vmax.f32 %v4390_v58, 0.0  ;;  %v6348_v3 = vmax.f32 %v5414_v59, 0.0  ;;  %v13122_v59 = vld [vmem:[%s13556_s11 + $0x550] ss:$8 sps:$4 sm:$0xff]  }
 0x2cd   : > { %v4394_v4 = vpop.f32.mrf.mxu0  ;;  %4585 = vmatmul.mubr.bf16.gmra.mxu0 %v13104_v56  ;;  %v5418_v29 = vpop.f32.mrf.mxu1  ;;  %5609 = vmatmul.mubr.bf16.gmra.mxu1 %v13105_v57 }
 0x2ce   : > { %v11272_v5 = vpack.c.bf16 %v6092_v53, %v6091_v1  ;;  %v11912_v7 = vpack.c.bf16 %v6348_v3, %v6347_v2  ;;  %9780 = vmatprep.mubr.msk.bf16.mxu0 %vm3120_vm0, %v13106_v61  ;;  %9908 = vmatprep.mubr.msk.bf16.mxu1 %vm3120_vm0, %v13108_v0  ;;  %v4395_v10 = vadd.f32 %v14413_v6, %v4394_v4  ;;  %v13123_v61 = vld [vmem:[%s13556_s11 + $0xd50] ss:$8 sps:$4 sm:$0xff]   ;;  %v13124_v0 = vld [vmem:[%s13556_s11 + $0x564] ss:$8 sps:$4 sm:$0xff]  }
 0x2cf   : > { %v4396_v8 = vpop.f32.mrf.mxu0  ;;  %v5420_v9 = vpop.f32.mrf.mxu1  ;;  %v5419_v11 = vadd.f32 %v14413_v6, %v5418_v29  ;;  %v13126_v53 = vld [vmem:[%s13556_s11 + $0xd64] ss:$8 sps:$4 sm:$0xff]  }
 0x2d0   : > { %12320 = vst [vmem:[%s13748_s18 + $0x1c8] sm:$0xff] %v11272_v5   ;;  %12448 = vst [vmem:[%s13748_s18 + $0x5c8] sm:$0xff] %v11912_v7   ;;  %v6093_v22 = vmax.f32 %v4395_v10, 0.0 }
 0x2d1   : > { %v4397_v12 = vpop.f32.mrf.mxu0  ;;  %v5421_v13 = vpop.f32.mrf.mxu1  ;;  %v6349_v23 = vmax.f32 %v5419_v11, 0.0 }
 0x2d2   : > { %v4398_v16 = vadd.f32 %v14413_v6, %v4397_v12  ;;  %v5422_v17 = vadd.f32 %v14413_v6, %v5421_v13 }
 0x2d3   : > { %v4399_v19 = vpop.f32.mrf.mxu0  ;;  %v5423_v20 = vpop.f32.mrf.mxu1 }
 0x2d4   : > { %v6094_v24 = vmax.f32 %v4398_v16, 0.0  ;;  %v6350_v25 = vmax.f32 %v5422_v17, 0.0  ;;  %v13128_v17 = vld [vmem:[%s13556_s11 + $0x560] ss:$8 sps:$4 sm:$0xff]  }
 0x2d5   : > { %v4402_v26 = vpop.f32.mrf.mxu0  ;;  %4593 = vmatmul.mubr.bf16.gmra.mxu0 %v13110_v14  ;;  %v5426_v27 = vpop.f32.mrf.mxu1  ;;  %5617 = vmatmul.mubr.bf16.gmra.mxu1 %v13111_v15 }
 0x2d6   : > { %v11277_v60 = vpack.c.bf16 %v6094_v24, %v6093_v22  ;;  %v11917_v28 = vpack.c.bf16 %v6350_v25, %v6349_v23  ;;  %9781 = vmatprep.mubr.msk.bf16.mxu0 %vm3120_vm0, %v13112_v18  ;;  %9909 = vmatprep.mubr.msk.bf16.mxu1 %vm3120_vm0, %v13114_v21  ;;  %v4403_v32 = vadd.f32 %v14413_v6, %v4402_v26  ;;  %v13129_v18 = vld [vmem:[%s13556_s11 + $0xd60] ss:$8 sps:$4 sm:$0xff]   ;;  %v13130_v21 = vld [vmem:[%s13556_s11 + $0x574] ss:$8 sps:$4 sm:$0xff]  }
 0x2d7   : > { %v4404_v30 = vpop.f32.mrf.mxu0  ;;  %v5428_v31 = vpop.f32.mrf.mxu1  ;;  %v5427_v33 = vadd.f32 %v14413_v6, %v5426_v27  ;;  %v13132_v24 = vld [vmem:[%s13556_s11 + $0xd74] ss:$8 sps:$4 sm:$0xff]  }
 0x2d8   : > { %12321 = vst [vmem:[%s13748_s18 + $0x1d0] sm:$0xff] %v11277_v60   ;;  %12449 = vst [vmem:[%s13748_s18 + $0x5d0] sm:$0xff] %v11917_v28   ;;  %v6095_v44 = vmax.f32 %v4403_v32, 0.0 }
 0x2d9   : > { %v4405_v34 = vpop.f32.mrf.mxu0  ;;  %v5429_v35 = vpop.f32.mrf.mxu1  ;;  %v6351_v45 = vmax.f32 %v5427_v33, 0.0 }
 0x2da   : > { %v4406_v38 = vadd.f32 %v14413_v6, %v4405_v34  ;;  %v5430_v39 = vadd.f32 %v14413_v6, %v5429_v35 }
 0x2db   : > { %v4407_v41 = vpop.f32.mrf.mxu0  ;;  %v5431_v42 = vpop.f32.mrf.mxu1 }
 0x2dc   : > { %v6096_v46 = vmax.f32 %v4406_v38, 0.0  ;;  %v6352_v47 = vmax.f32 %v5430_v39, 0.0  ;;  %v13134_v39 = vld [vmem:[%s13556_s11 + $0x570] ss:$8 sps:$4 sm:$0xff]  }
 0x2dd   : > { %v4410_v48 = vpop.f32.mrf.mxu0  ;;  %4601 = vmatmul.mubr.bf16.gmra.mxu0 %v13116_v36  ;;  %v5434_v49 = vpop.f32.mrf.mxu1  ;;  %5625 = vmatmul.mubr.bf16.gmra.mxu1 %v13117_v37 }
 0x2de   : > { %v11282_v50 = vpack.c.bf16 %v6096_v46, %v6095_v44  ;;  %v11922_v51 = vpack.c.bf16 %v6352_v47, %v6351_v45  ;;  %9782 = vmatprep.mubr.msk.bf16.mxu0 %vm3120_vm0, %v13118_v40  ;;  %9910 = vmatprep.mubr.msk.bf16.mxu1 %vm3120_vm0, %v13120_v43  ;;  %v4411_v55 = vadd.f32 %v14413_v6, %v4410_v48  ;;  %v13135_v40 = vld [vmem:[%s13556_s11 + $0xd70] ss:$8 sps:$4 sm:$0xff]   ;;  %v13136_v43 = vld [vmem:[%s13556_s11 + $0x584] ss:$8 sps:$4 sm:$0xff]  }
 0x2df   : > { %v4412_v52 = vpop.f32.mrf.mxu0  ;;  %v5436_v54 = vpop.f32.mrf.mxu1  ;;  %v5435_v56 = vadd.f32 %v14413_v6, %v5434_v49  ;;  %v13138_v46 = vld [vmem:[%s13556_s11 + $0xd84] ss:$8 sps:$4 sm:$0xff]  }
 0x2e0   : > { %12322 = vst [vmem:[%s13748_s18 + $0x1d8] sm:$0xff] %v11282_v50   ;;  %12450 = vst [vmem:[%s13748_s18 + $0x5d8] sm:$0xff] %v11922_v51   ;;  %v6097_v3 = vmax.f32 %v4411_v55, 0.0 }
 0x2e1   : > { %v4413_v57 = vpop.f32.mrf.mxu0  ;;  %v5437_v58 = vpop.f32.mrf.mxu1  ;;  %v6353_v4 = vmax.f32 %v5435_v56, 0.0 }
 0x2e2   : > { %v4414_v62 = vadd.f32 %v14413_v6, %v4413_v57  ;;  %v5438_v63 = vadd.f32 %v14413_v6, %v5437_v58 }
 0x2e3   : > { %v4415_v1 = vpop.f32.mrf.mxu0  ;;  %v5439_v2 = vpop.f32.mrf.mxu1 }
 0x2e4   : > { %v6098_v29 = vmax.f32 %v4414_v62, 0.0  ;;  %v6354_v5 = vmax.f32 %v5438_v63, 0.0  ;;  %v13140_v63 = vld [vmem:[%s13556_s11 + $0x580] ss:$8 sps:$4 sm:$0xff]  }
 0x2e5   : > { %v4418_v7 = vpop.f32.mrf.mxu0  ;;  %4609 = vmatmul.mubr.bf16.gmra.mxu0 %v13122_v59  ;;  %v5442_v8 = vpop.f32.mrf.mxu1  ;;  %5633 = vmatmul.mubr.bf16.gmra.mxu1 %v13123_v61 }
 0x2e6   : > { %v11287_v9 = vpack.c.bf16 %v6098_v29, %v6097_v3  ;;  %v11927_v10 = vpack.c.bf16 %v6354_v5, %v6353_v4  ;;  %9783 = vmatprep.mubr.msk.bf16.mxu0 %vm3120_vm0, %v13124_v0  ;;  %9911 = vmatprep.mubr.msk.bf16.mxu1 %vm3120_vm0, %v13126_v53  ;;  %v4419_v13 = vadd.f32 %v14413_v6, %v4418_v7  ;;  %v13141_v0 = vld [vmem:[%s13556_s11 + $0xd80] ss:$8 sps:$4 sm:$0xff]   ;;  %v13142_v53 = vld [vmem:[%s13556_s11 + $0x594] ss:$8 sps:$4 sm:$0xff]  }
 0x2e7   : > { %v4420_v11 = vpop.f32.mrf.mxu0  ;;  %v5444_v12 = vpop.f32.mrf.mxu1  ;;  %v5443_v14 = vadd.f32 %v14413_v6, %v5442_v8  ;;  %v13144_v29 = vld [vmem:[%s13556_s11 + $0xd94] ss:$8 sps:$4 sm:$0xff]  }
 0x2e8   : > { %12323 = vst [vmem:[%s13748_s18 + $0x1e0] sm:$0xff] %v11287_v9   ;;  %12451 = vst [vmem:[%s13748_s18 + $0x5e0] sm:$0xff] %v11927_v10   ;;  %v6099_v25 = vmax.f32 %v4419_v13, 0.0 }
 0x2e9   : > { %v4421_v15 = vpop.f32.mrf.mxu0  ;;  %v5445_v16 = vpop.f32.mrf.mxu1  ;;  %v6355_v26 = vmax.f32 %v5443_v14, 0.0 }
 0x2ea   : > { %v4422_v19 = vadd.f32 %v14413_v6, %v4421_v15  ;;  %v5446_v20 = vadd.f32 %v14413_v6, %v5445_v16 }
 0x2eb   : > { %v4423_v22 = vpop.f32.mrf.mxu0  ;;  %v5447_v23 = vpop.f32.mrf.mxu1 }
 0x2ec   : > { %v6100_v27 = vmax.f32 %v4422_v19, 0.0  ;;  %v6356_v60 = vmax.f32 %v5446_v20, 0.0  ;;  %v13146_v20 = vld [vmem:[%s13556_s11 + $0x590] ss:$8 sps:$4 sm:$0xff]  }
 0x2ed   : > { %v4426_v28 = vpop.f32.mrf.mxu0  ;;  %4617 = vmatmul.mubr.bf16.gmra.mxu0 %v13128_v17  ;;  %v5450_v30 = vpop.f32.mrf.mxu1  ;;  %5641 = vmatmul.mubr.bf16.gmra.mxu1 %v13129_v18 }
 0x2ee   : > { %v11292_v31 = vpack.c.bf16 %v6100_v27, %v6099_v25  ;;  %v11932_v32 = vpack.c.bf16 %v6356_v60, %v6355_v26  ;;  %9784 = vmatprep.mubr.msk.bf16.mxu0 %vm3120_vm0, %v13130_v21  ;;  %9912 = vmatprep.mubr.msk.bf16.mxu1 %vm3120_vm0, %v13132_v24  ;;  %v4427_v35 = vadd.f32 %v14413_v6, %v4426_v28  ;;  %v13147_v21 = vld [vmem:[%s13556_s11 + $0xd90] ss:$8 sps:$4 sm:$0xff]   ;;  %v13148_v24 = vld [vmem:[%s13556_s11 + $0x5a4] ss:$8 sps:$4 sm:$0xff]  }
 0x2ef   : > { %v4428_v33 = vpop.f32.mrf.mxu0  ;;  %v5452_v34 = vpop.f32.mrf.mxu1  ;;  %v5451_v36 = vadd.f32 %v14413_v6, %v5450_v30  ;;  %v13150_v27 = vld [vmem:[%s13556_s11 + $0xda4] ss:$8 sps:$4 sm:$0xff]  }
 0x2f0   : > { %12324 = vst [vmem:[%s13748_s18 + $0x1e8] sm:$0xff] %v11292_v31   ;;  %12452 = vst [vmem:[%s13748_s18 + $0x5e8] sm:$0xff] %v11932_v32   ;;  %v6101_v47 = vmax.f32 %v4427_v35, 0.0 }
 0x2f1   : > { %v4429_v37 = vpop.f32.mrf.mxu0  ;;  %v5453_v38 = vpop.f32.mrf.mxu1  ;;  %v6357_v48 = vmax.f32 %v5451_v36, 0.0 }
 0x2f2   : > { %v4430_v41 = vadd.f32 %v14413_v6, %v4429_v37  ;;  %v5454_v42 = vadd.f32 %v14413_v6, %v5453_v38 }
 0x2f3   : > { %v4431_v44 = vpop.f32.mrf.mxu0  ;;  %v5455_v45 = vpop.f32.mrf.mxu1 }
 0x2f4   : > { %v6102_v49 = vmax.f32 %v4430_v41, 0.0  ;;  %v6358_v50 = vmax.f32 %v5454_v42, 0.0  ;;  %v13152_v42 = vld [vmem:[%s13556_s11 + $0x5a0] ss:$8 sps:$4 sm:$0xff]  }
 0x2f5   : > { %v4434_v51 = vpop.f32.mrf.mxu0  ;;  %4625 = vmatmul.mubr.bf16.gmra.mxu0 %v13134_v39  ;;  %v5458_v52 = vpop.f32.mrf.mxu1  ;;  %5649 = vmatmul.mubr.bf16.gmra.mxu1 %v13135_v40 }
 0x2f6   : > { %v11297_v54 = vpack.c.bf16 %v6102_v49, %v6101_v47  ;;  %v11937_v55 = vpack.c.bf16 %v6358_v50, %v6357_v48  ;;  %9785 = vmatprep.mubr.msk.bf16.mxu0 %vm3120_vm0, %v13136_v43  ;;  %9913 = vmatprep.mubr.msk.bf16.mxu1 %vm3120_vm0, %v13138_v46  ;;  %v4435_v58 = vadd.f32 %v14413_v6, %v4434_v51  ;;  %v13153_v43 = vld [vmem:[%s13556_s11 + $0xda0] ss:$8 sps:$4 sm:$0xff]   ;;  %v13154_v46 = vld [vmem:[%s13556_s11 + $0x5b4] ss:$8 sps:$4 sm:$0xff]  }
 0x2f7   : > { %v4436_v56 = vpop.f32.mrf.mxu0  ;;  %v5460_v57 = vpop.f32.mrf.mxu1  ;;  %v5459_v59 = vadd.f32 %v14413_v6, %v5458_v52  ;;  %v13156_v49 = vld [vmem:[%s13556_s11 + $0xdb4] ss:$8 sps:$4 sm:$0xff]  }
 0x2f8   : > { %12325 = vst [vmem:[%s13748_s18 + $0x1f0] sm:$0xff] %v11297_v54   ;;  %12453 = vst [vmem:[%s13748_s18 + $0x5f0] sm:$0xff] %v11937_v55   ;;  %v6103_v5 = vmax.f32 %v4435_v58, 0.0 }
 0x2f9   : > { %v4437_v61 = vpop.f32.mrf.mxu0  ;;  %v5461_v62 = vpop.f32.mrf.mxu1  ;;  %v6359_v7 = vmax.f32 %v5459_v59, 0.0 }
 0x2fa   : > { %v4438_v1 = vadd.f32 %v14413_v6, %v4437_v61  ;;  %v5462_v2 = vadd.f32 %v14413_v6, %v5461_v62 }
 0x2fb   : > { %v4439_v3 = vpop.f32.mrf.mxu0  ;;  %v5463_v4 = vpop.f32.mrf.mxu1 }
 0x2fc   : > { %v6104_v8 = vmax.f32 %v4438_v1, 0.0  ;;  %v6360_v9 = vmax.f32 %v5462_v2, 0.0  ;;  %v13158_v2 = vld [vmem:[%s13556_s11 + $0x5b0] ss:$8 sps:$4 sm:$0xff]  }
 0x2fd   : > { %v4442_v10 = vpop.f32.mrf.mxu0  ;;  %4633 = vmatmul.mubr.bf16.gmra.mxu0 %v13140_v63  ;;  %v5466_v11 = vpop.f32.mrf.mxu1  ;;  %5657 = vmatmul.mubr.bf16.gmra.mxu1 %v13141_v0 }
 0x2fe   : > { %v11302_v12 = vpack.c.bf16 %v6104_v8, %v6103_v5  ;;  %v11942_v13 = vpack.c.bf16 %v6360_v9, %v6359_v7  ;;  %9786 = vmatprep.mubr.msk.bf16.mxu0 %vm3120_vm0, %v13142_v53  ;;  %9914 = vmatprep.mubr.msk.bf16.mxu1 %vm3120_vm0, %v13144_v29  ;;  %v4443_v16 = vadd.f32 %v14413_v6, %v4442_v10  ;;  %v13159_v53 = vld [vmem:[%s13556_s11 + $0xdb0] ss:$8 sps:$4 sm:$0xff]   ;;  %v13160_v29 = vld [vmem:[%s13556_s11 + $0x5c4] ss:$8 sps:$4 sm:$0xff]  }
 0x2ff   : > { %v4444_v14 = vpop.f32.mrf.mxu0  ;;  %v5468_v15 = vpop.f32.mrf.mxu1  ;;  %v5467_v17 = vadd.f32 %v14413_v6, %v5466_v11  ;;  %v13162_v8 = vld [vmem:[%s13556_s11 + $0xdc4] ss:$8 sps:$4 sm:$0xff]  }
 0x300   : > { %12326 = vst [vmem:[%s13748_s18 + $0x1f8] sm:$0xff] %v11302_v12   ;;  %12454 = vst [vmem:[%s13748_s18 + $0x5f8] sm:$0xff] %v11942_v13   ;;  %v6105_v60 = vmax.f32 %v4443_v16, 0.0 }
 0x301   : > { %v4445_v18 = vpop.f32.mrf.mxu0  ;;  %v5469_v19 = vpop.f32.mrf.mxu1  ;;  %v6361_v28 = vmax.f32 %v5467_v17, 0.0 }
 0x302   : > { %v4446_v22 = vadd.f32 %v14413_v6, %v4445_v18  ;;  %v5470_v23 = vadd.f32 %v14413_v6, %v5469_v19 }
 0x303   : > { %v4447_v25 = vpop.f32.mrf.mxu0  ;;  %v5471_v26 = vpop.f32.mrf.mxu1 }
 0x304   : > { %v6106_v30 = vmax.f32 %v4446_v22, 0.0  ;;  %v6362_v31 = vmax.f32 %v5470_v23, 0.0  ;;  %v13164_v23 = vld [vmem:[%s13556_s11 + $0x5c0] ss:$8 sps:$4 sm:$0xff]  }
 0x305   : > { %v4450_v32 = vpop.f32.mrf.mxu0  ;;  %4641 = vmatmul.mubr.bf16.gmra.mxu0 %v13146_v20  ;;  %v5474_v33 = vpop.f32.mrf.mxu1  ;;  %5665 = vmatmul.mubr.bf16.gmra.mxu1 %v13147_v21 }
 0x306   : > { %v11307_v34 = vpack.c.bf16 %v6106_v30, %v6105_v60  ;;  %v11947_v35 = vpack.c.bf16 %v6362_v31, %v6361_v28  ;;  %9787 = vmatprep.mubr.msk.bf16.mxu0 %vm3120_vm0, %v13148_v24  ;;  %9915 = vmatprep.mubr.msk.bf16.mxu1 %vm3120_vm0, %v13150_v27  ;;  %v4451_v38 = vadd.f32 %v14413_v6, %v4450_v32  ;;  %v13165_v24 = vld [vmem:[%s13556_s11 + $0xdc0] ss:$8 sps:$4 sm:$0xff]   ;;  %v13166_v27 = vld [vmem:[%s13556_s11 + $0x5d4] ss:$8 sps:$4 sm:$0xff]  }
 0x307   : > { %v4452_v36 = vpop.f32.mrf.mxu0  ;;  %v5476_v37 = vpop.f32.mrf.mxu1  ;;  %v5475_v39 = vadd.f32 %v14413_v6, %v5474_v33  ;;  %v13168_v30 = vld [vmem:[%s13556_s11 + $0xdd4] ss:$8 sps:$4 sm:$0xff]  }
 0x308   : > { %12327 = vst [vmem:[%s13748_s18 + $0x200] sm:$0xff] %v11307_v34   ;;  %12455 = vst [vmem:[%s13748_s18 + $0x600] sm:$0xff] %v11947_v35   ;;  %v6107_v50 = vmax.f32 %v4451_v38, 0.0 }
 0x309   : > { %v4453_v40 = vpop.f32.mrf.mxu0  ;;  %v5477_v41 = vpop.f32.mrf.mxu1  ;;  %v6363_v51 = vmax.f32 %v5475_v39, 0.0 }
 0x30a   : > { %v4454_v44 = vadd.f32 %v14413_v6, %v4453_v40  ;;  %v5478_v45 = vadd.f32 %v14413_v6, %v5477_v41 }
 0x30b   : > { %v4455_v47 = vpop.f32.mrf.mxu0  ;;  %v5479_v48 = vpop.f32.mrf.mxu1 }
 0x30c   : > { %v6108_v52 = vmax.f32 %v4454_v44, 0.0  ;;  %v6364_v54 = vmax.f32 %v5478_v45, 0.0  ;;  %v13170_v45 = vld [vmem:[%s13556_s11 + $0x5d0] ss:$8 sps:$4 sm:$0xff]  }
 0x30d   : > { %v4458_v55 = vpop.f32.mrf.mxu0  ;;  %4649 = vmatmul.mubr.bf16.gmra.mxu0 %v13152_v42  ;;  %v5482_v56 = vpop.f32.mrf.mxu1  ;;  %5673 = vmatmul.mubr.bf16.gmra.mxu1 %v13153_v43 }
 0x30e   : > { %v11312_v57 = vpack.c.bf16 %v6108_v52, %v6107_v50  ;;  %v11952_v58 = vpack.c.bf16 %v6364_v54, %v6363_v51  ;;  %9788 = vmatprep.mubr.msk.bf16.mxu0 %vm3120_vm0, %v13154_v46  ;;  %9916 = vmatprep.mubr.msk.bf16.mxu1 %vm3120_vm0, %v13156_v49  ;;  %v4459_v62 = vadd.f32 %v14413_v6, %v4458_v55  ;;  %v13171_v46 = vld [vmem:[%s13556_s11 + $0xdd0] ss:$8 sps:$4 sm:$0xff]   ;;  %v13172_v49 = vld [vmem:[%s13556_s11 + $0x5e4] ss:$8 sps:$4 sm:$0xff]  }
 0x30f   : > { %v4460_v59 = vpop.f32.mrf.mxu0  ;;  %v5484_v61 = vpop.f32.mrf.mxu1  ;;  %v5483_v63 = vadd.f32 %v14413_v6, %v5482_v56  ;;  %v13174_v52 = vld [vmem:[%s13556_s11 + $0xde4] ss:$8 sps:$4 sm:$0xff]  }
 0x310   : > { %12328 = vst [vmem:[%s13748_s18 + $0x208] sm:$0xff] %v11312_v57   ;;  %12456 = vst [vmem:[%s13748_s18 + $0x608] sm:$0xff] %v11952_v58   ;;  %v6109_v9 = vmax.f32 %v4459_v62, 0.0 }
 0x311   : > { %v4461_v0 = vpop.f32.mrf.mxu0  ;;  %v5485_v1 = vpop.f32.mrf.mxu1  ;;  %v6365_v10 = vmax.f32 %v5483_v63, 0.0 }
 0x312   : > { %v4462_v3 = vadd.f32 %v14413_v6, %v4461_v0  ;;  %v5486_v4 = vadd.f32 %v14413_v6, %v5485_v1 }
 0x313   : > { %v4463_v5 = vpop.f32.mrf.mxu0  ;;  %v5487_v7 = vpop.f32.mrf.mxu1 }
 0x314   : > { %v6110_v11 = vmax.f32 %v4462_v3, 0.0  ;;  %v6366_v12 = vmax.f32 %v5486_v4, 0.0  ;;  %v13176_v4 = vld [vmem:[%s13556_s11 + $0x5e0] ss:$8 sps:$4 sm:$0xff]  }
 0x315   : > { %v4466_v13 = vpop.f32.mrf.mxu0  ;;  %4657 = vmatmul.mubr.bf16.gmra.mxu0 %v13158_v2  ;;  %v5490_v14 = vpop.f32.mrf.mxu1  ;;  %5681 = vmatmul.mubr.bf16.gmra.mxu1 %v13159_v53 }
 0x316   : > { %v11317_v15 = vpack.c.bf16 %v6110_v11, %v6109_v9  ;;  %v11957_v16 = vpack.c.bf16 %v6366_v12, %v6365_v10  ;;  %9789 = vmatprep.mubr.msk.bf16.mxu0 %vm3120_vm0, %v13160_v29  ;;  %9917 = vmatprep.mubr.msk.bf16.mxu1 %vm3120_vm0, %v13162_v8  ;;  %v4467_v19 = vadd.f32 %v14413_v6, %v4466_v13  ;;  %v13177_v29 = vld [vmem:[%s13556_s11 + $0xde0] ss:$8 sps:$4 sm:$0xff]   ;;  %v13178_v8 = vld [vmem:[%s13556_s11 + $0x5f4] ss:$8 sps:$4 sm:$0xff]  }
 0x317   : > { %v4468_v17 = vpop.f32.mrf.mxu0  ;;  %v5492_v18 = vpop.f32.mrf.mxu1  ;;  %v5491_v20 = vadd.f32 %v14413_v6, %v5490_v14  ;;  %v13180_v11 = vld [vmem:[%s13556_s11 + $0xdf4] ss:$8 sps:$4 sm:$0xff]  }
 0x318   : > { %12329 = vst [vmem:[%s13748_s18 + $0x210] sm:$0xff] %v11317_v15   ;;  %12457 = vst [vmem:[%s13748_s18 + $0x610] sm:$0xff] %v11957_v16   ;;  %v6111_v31 = vmax.f32 %v4467_v19, 0.0 }
 0x319   : > { %v4469_v21 = vpop.f32.mrf.mxu0  ;;  %v5493_v22 = vpop.f32.mrf.mxu1  ;;  %v6367_v32 = vmax.f32 %v5491_v20, 0.0 }
 0x31a   : > { %v4470_v25 = vadd.f32 %v14413_v6, %v4469_v21  ;;  %v5494_v26 = vadd.f32 %v14413_v6, %v5493_v22 }
 0x31b   : > { %v4471_v60 = vpop.f32.mrf.mxu0  ;;  %v5495_v28 = vpop.f32.mrf.mxu1 }
 0x31c   : > { %v6112_v33 = vmax.f32 %v4470_v25, 0.0  ;;  %v6368_v34 = vmax.f32 %v5494_v26, 0.0  ;;  %v13182_v26 = vld [vmem:[%s13556_s11 + $0x5f0] ss:$8 sps:$4 sm:$0xff]  }
 0x31d   : > { %v4474_v35 = vpop.f32.mrf.mxu0  ;;  %4665 = vmatmul.mubr.bf16.gmra.mxu0 %v13164_v23  ;;  %v5498_v36 = vpop.f32.mrf.mxu1  ;;  %5689 = vmatmul.mubr.bf16.gmra.mxu1 %v13165_v24 }
 0x31e   : > { %v11322_v37 = vpack.c.bf16 %v6112_v33, %v6111_v31  ;;  %v11962_v38 = vpack.c.bf16 %v6368_v34, %v6367_v32  ;;  %9790 = vmatprep.mubr.msk.bf16.mxu0 %vm3120_vm0, %v13166_v27  ;;  %9918 = vmatprep.mubr.msk.bf16.mxu1 %vm3120_vm0, %v13168_v30  ;;  %v4475_v41 = vadd.f32 %v14413_v6, %v4474_v35  ;;  %v13183_v27 = vld [vmem:[%s13556_s11 + $0xdf0] ss:$8 sps:$4 sm:$0xff]   ;;  %v13184_v30 = vld [vmem:[%s13556_s11 + $0x604] ss:$8 sps:$4 sm:$0xff]  }
 0x31f   : > { %v4476_v39 = vpop.f32.mrf.mxu0  ;;  %v5500_v40 = vpop.f32.mrf.mxu1  ;;  %v5499_v42 = vadd.f32 %v14413_v6, %v5498_v36  ;;  %v13186_v33 = vld [vmem:[%s13556_s11 + $0xe04] ss:$8 sps:$4 sm:$0xff]  }
 0x320   : > { %12330 = vst [vmem:[%s13748_s18 + $0x218] sm:$0xff] %v11322_v37   ;;  %12458 = vst [vmem:[%s13748_s18 + $0x618] sm:$0xff] %v11962_v38   ;;  %v6113_v54 = vmax.f32 %v4475_v41, 0.0 }
 0x321   : > { %v4477_v43 = vpop.f32.mrf.mxu0  ;;  %v5501_v44 = vpop.f32.mrf.mxu1  ;;  %v6369_v55 = vmax.f32 %v5499_v42, 0.0 }
 0x322   : > { %v4478_v47 = vadd.f32 %v14413_v6, %v4477_v43  ;;  %v5502_v48 = vadd.f32 %v14413_v6, %v5501_v44 }
 0x323   : > { %v4479_v50 = vpop.f32.mrf.mxu0  ;;  %v5503_v51 = vpop.f32.mrf.mxu1 }
 0x324   : > { %v6114_v56 = vmax.f32 %v4478_v47, 0.0  ;;  %v6370_v57 = vmax.f32 %v5502_v48, 0.0  ;;  %v13188_v48 = vld [vmem:[%s13556_s11 + $0x600] ss:$8 sps:$4 sm:$0xff]  }
 0x325   : > { %v4482_v58 = vpop.f32.mrf.mxu0  ;;  %4673 = vmatmul.mubr.bf16.gmra.mxu0 %v13170_v45  ;;  %v5506_v59 = vpop.f32.mrf.mxu1  ;;  %5697 = vmatmul.mubr.bf16.gmra.mxu1 %v13171_v46 }
 0x326   : > { %v11327_v61 = vpack.c.bf16 %v6114_v56, %v6113_v54  ;;  %v11967_v62 = vpack.c.bf16 %v6370_v57, %v6369_v55  ;;  %9791 = vmatprep.mubr.msk.bf16.mxu0 %vm3120_vm0, %v13172_v49  ;;  %9919 = vmatprep.mubr.msk.bf16.mxu1 %vm3120_vm0, %v13174_v52  ;;  %v4483_v1 = vadd.f32 %v14413_v6, %v4482_v58  ;;  %v13189_v49 = vld [vmem:[%s13556_s11 + $0xe00] ss:$8 sps:$4 sm:$0xff]   ;;  %v13190_v52 = vld [vmem:[%s13556_s11 + $0x614] ss:$8 sps:$4 sm:$0xff]  }
 0x327   : > { %v4484_v63 = vpop.f32.mrf.mxu0  ;;  %v5508_v0 = vpop.f32.mrf.mxu1  ;;  %v5507_v2 = vadd.f32 %v14413_v6, %v5506_v59  ;;  %v13192_v56 = vld [vmem:[%s13556_s11 + $0xe14] ss:$8 sps:$4 sm:$0xff]  }
 0x328   : > { %12331 = vst [vmem:[%s13748_s18 + $0x220] sm:$0xff] %v11327_v61   ;;  %12459 = vst [vmem:[%s13748_s18 + $0x620] sm:$0xff] %v11967_v62   ;;  %v6115_v12 = vmax.f32 %v4483_v1, 0.0 }
 0x329   : > { %v4485_v53 = vpop.f32.mrf.mxu0  ;;  %v5509_v3 = vpop.f32.mrf.mxu1  ;;  %v6371_v13 = vmax.f32 %v5507_v2, 0.0 }
 0x32a   : > { %v4486_v5 = vadd.f32 %v14413_v6, %v4485_v53  ;;  %v5510_v7 = vadd.f32 %v14413_v6, %v5509_v3 }
 0x32b   : > { %v4487_v9 = vpop.f32.mrf.mxu0  ;;  %v5511_v10 = vpop.f32.mrf.mxu1 }
 0x32c   : > { %v6116_v14 = vmax.f32 %v4486_v5, 0.0  ;;  %v6372_v15 = vmax.f32 %v5510_v7, 0.0  ;;  %v13194_v7 = vld [vmem:[%s13556_s11 + $0x610] ss:$8 sps:$4 sm:$0xff]  }
 0x32d   : > { %v4490_v16 = vpop.f32.mrf.mxu0  ;;  %4681 = vmatmul.mubr.bf16.gmra.mxu0 %v13176_v4  ;;  %v5514_v17 = vpop.f32.mrf.mxu1  ;;  %5705 = vmatmul.mubr.bf16.gmra.mxu1 %v13177_v29 }
 0x32e   : > { %v11332_v18 = vpack.c.bf16 %v6116_v14, %v6115_v12  ;;  %v11972_v19 = vpack.c.bf16 %v6372_v15, %v6371_v13  ;;  %9792 = vmatprep.mubr.msk.bf16.mxu0 %vm3120_vm0, %v13178_v8  ;;  %9920 = vmatprep.mubr.msk.bf16.mxu1 %vm3120_vm0, %v13180_v11  ;;  %v4491_v22 = vadd.f32 %v14413_v6, %v4490_v16  ;;  %v13195_v8 = vld [vmem:[%s13556_s11 + $0xe10] ss:$8 sps:$4 sm:$0xff]   ;;  %v13196_v11 = vld [vmem:[%s13556_s11 + $0x624] ss:$8 sps:$4 sm:$0xff]  }
 0x32f   : > { %v4492_v20 = vpop.f32.mrf.mxu0  ;;  %v5516_v21 = vpop.f32.mrf.mxu1  ;;  %v5515_v23 = vadd.f32 %v14413_v6, %v5514_v17  ;;  %v13198_v14 = vld [vmem:[%s13556_s11 + $0xe24] ss:$8 sps:$4 sm:$0xff]  }
 0x330   : > { %12332 = vst [vmem:[%s13748_s18 + $0x228] sm:$0xff] %v11332_v18   ;;  %12460 = vst [vmem:[%s13748_s18 + $0x628] sm:$0xff] %v11972_v19   ;;  %v6117_v34 = vmax.f32 %v4491_v22, 0.0 }
 0x331   : > { %v4493_v24 = vpop.f32.mrf.mxu0  ;;  %v5517_v25 = vpop.f32.mrf.mxu1  ;;  %v6373_v35 = vmax.f32 %v5515_v23, 0.0 }
 0x332   : > { %v4494_v60 = vadd.f32 %v14413_v6, %v4493_v24  ;;  %v5518_v28 = vadd.f32 %v14413_v6, %v5517_v25 }
 0x333   : > { %v4495_v31 = vpop.f32.mrf.mxu0  ;;  %v5519_v32 = vpop.f32.mrf.mxu1 }
 0x334   : > { %v6118_v36 = vmax.f32 %v4494_v60, 0.0  ;;  %v6374_v37 = vmax.f32 %v5518_v28, 0.0  ;;  %v13200_v28 = vld [vmem:[%s13556_s11 + $0x620] ss:$8 sps:$4 sm:$0xff]  }
 0x335   : > { %v4498_v38 = vpop.f32.mrf.mxu0  ;;  %4689 = vmatmul.mubr.bf16.gmra.mxu0 %v13182_v26  ;;  %v5522_v39 = vpop.f32.mrf.mxu1  ;;  %5713 = vmatmul.mubr.bf16.gmra.mxu1 %v13183_v27 }
 0x336   : > { %v11337_v40 = vpack.c.bf16 %v6118_v36, %v6117_v34  ;;  %v11977_v41 = vpack.c.bf16 %v6374_v37, %v6373_v35  ;;  %9793 = vmatprep.mubr.msk.bf16.mxu0 %vm3120_vm0, %v13184_v30  ;;  %9921 = vmatprep.mubr.msk.bf16.mxu1 %vm3120_vm0, %v13186_v33  ;;  %v4499_v44 = vadd.f32 %v14413_v6, %v4498_v38  ;;  %v13201_v30 = vld [vmem:[%s13556_s11 + $0xe20] ss:$8 sps:$4 sm:$0xff]   ;;  %v13202_v33 = vld [vmem:[%s13556_s11 + $0x634] ss:$8 sps:$4 sm:$0xff]  }
 0x337   : > { %v4500_v42 = vpop.f32.mrf.mxu0  ;;  %v5524_v43 = vpop.f32.mrf.mxu1  ;;  %v5523_v45 = vadd.f32 %v14413_v6, %v5522_v39  ;;  %v13204_v36 = vld [vmem:[%s13556_s11 + $0xe34] ss:$8 sps:$4 sm:$0xff]  }
 0x338   : > { %12333 = vst [vmem:[%s13748_s18 + $0x230] sm:$0xff] %v11337_v40   ;;  %12461 = vst [vmem:[%s13748_s18 + $0x630] sm:$0xff] %v11977_v41   ;;  %v6119_v57 = vmax.f32 %v4499_v44, 0.0 }
 0x339   : > { %v4501_v46 = vpop.f32.mrf.mxu0  ;;  %v5525_v47 = vpop.f32.mrf.mxu1  ;;  %v6375_v58 = vmax.f32 %v5523_v45, 0.0 }
 0x33a   : > { %v4502_v50 = vadd.f32 %v14413_v6, %v4501_v46  ;;  %v5526_v51 = vadd.f32 %v14413_v6, %v5525_v47  ;;  %v14646_v46 = vld [vmem:[%s15210_s2] ss:$0 sm:$0xff] }
 0x33b   : > { %v4503_v54 = vpop.f32.mrf.mxu0  ;;  %v5527_v55 = vpop.f32.mrf.mxu1 }
 0x33c   : > { %v6120_v59 = vmax.f32 %v4502_v50, 0.0  ;;  %v6376_v61 = vmax.f32 %v5526_v51, 0.0  ;;  %v13206_v51 = vld [vmem:[%s13556_s11 + $0x630] ss:$8 sps:$4 sm:$0xff]  }
 0x33d   : > { %v4506_v62 = vpop.f32.mrf.mxu0  ;;  %4697 = vmatmul.mubr.bf16.gmra.mxu0 %v13188_v48  ;;  %v5530_v63 = vpop.f32.mrf.mxu1  ;;  %5721 = vmatmul.mubr.bf16.gmra.mxu1 %v13189_v49 }
 0x33e   : > { %v11342_v0 = vpack.c.bf16 %v6120_v59, %v6119_v57  ;;  %v11982_v1 = vpack.c.bf16 %v6376_v61, %v6375_v58  ;;  %9794 = vmatprep.mubr.msk.bf16.mxu0 %vm3120_vm0, %v13190_v52  ;;  %9922 = vmatprep.mubr.msk.bf16.mxu1 %vm3120_vm0, %v13192_v56  ;;  %v4507_v3 = vadd.f32 %v14413_v6, %v4506_v62  ;;  %v13207_v52 = vld [vmem:[%s13556_s11 + $0xe30] ss:$8 sps:$4 sm:$0xff]   ;;  %v13208_v56 = vld [vmem:[%s13556_s11 + $0x644] ss:$8 sps:$4 sm:$0xff]  }
 0x33f   : > { %v4508_v2 = vpop.f32.mrf.mxu0  ;;  %v5532_v53 = vpop.f32.mrf.mxu1  ;;  %v5531_v4 = vadd.f32 %v14413_v6, %v5530_v63  ;;  %v13210_v59 = vld [vmem:[%s13556_s11 + $0xe44] ss:$8 sps:$4 sm:$0xff]  }
 0x340   : > { %12334 = vst [vmem:[%s13748_s18 + $0x238] sm:$0xff] %v11342_v0   ;;  %12462 = vst [vmem:[%s13748_s18 + $0x638] sm:$0xff] %v11982_v1   ;;  %v6121_v15 = vmax.f32 %v4507_v3, 0.0 }
 0x341   : > { %v4509_v29 = vpop.f32.mrf.mxu0  ;;  %v5533_v5 = vpop.f32.mrf.mxu1  ;;  %v6377_v16 = vmax.f32 %v5531_v4, 0.0 }
 0x342   : > { %v4510_v9 = vadd.f32 %v14413_v6, %v4509_v29  ;;  %v5534_v10 = vadd.f32 %v14413_v6, %v5533_v5 }
 0x343   : > { %v4511_v12 = vpop.f32.mrf.mxu0  ;;  %v5535_v13 = vpop.f32.mrf.mxu1 }
 0x344   : > { %v6122_v17 = vmax.f32 %v4510_v9, 0.0  ;;  %v6378_v18 = vmax.f32 %v5534_v10, 0.0  ;;  %v13212_v10 = vld [vmem:[%s13556_s11 + $0x640] ss:$8 sps:$4 sm:$0xff]  }
 0x345   : > { %v4514_v19 = vpop.f32.mrf.mxu0  ;;  %4705 = vmatmul.mubr.bf16.gmra.mxu0 %v13194_v7  ;;  %v5538_v20 = vpop.f32.mrf.mxu1  ;;  %5729 = vmatmul.mubr.bf16.gmra.mxu1 %v13195_v8 }
 0x346   : > { %v11347_v21 = vpack.c.bf16 %v6122_v17, %v6121_v15  ;;  %v11987_v22 = vpack.c.bf16 %v6378_v18, %v6377_v16  ;;  %9795 = vmatprep.mubr.msk.bf16.mxu0 %vm3120_vm0, %v13196_v11  ;;  %9923 = vmatprep.mubr.msk.bf16.mxu1 %vm3120_vm0, %v13198_v14  ;;  %v4515_v25 = vadd.f32 %v14413_v6, %v4514_v19  ;;  %v13213_v11 = vld [vmem:[%s13556_s11 + $0xe40] ss:$8 sps:$4 sm:$0xff]   ;;  %v13214_v14 = vld [vmem:[%s13556_s11 + $0x654] ss:$8 sps:$4 sm:$0xff]  }
 0x347   : > { %v4516_v23 = vpop.f32.mrf.mxu0  ;;  %v5540_v24 = vpop.f32.mrf.mxu1  ;;  %v5539_v26 = vadd.f32 %v14413_v6, %v5538_v20  ;;  %v13216_v17 = vld [vmem:[%s13556_s11 + $0xe54] ss:$8 sps:$4 sm:$0xff]  }
 0x348   : > { %12335 = vst [vmem:[%s13748_s18 + $0x240] sm:$0xff] %v11347_v21   ;;  %12463 = vst [vmem:[%s13748_s18 + $0x640] sm:$0xff] %v11987_v22   ;;  %v6123_v37 = vmax.f32 %v4515_v25, 0.0 }
 0x349   : > { %v4517_v27 = vpop.f32.mrf.mxu0  ;;  %v5541_v60 = vpop.f32.mrf.mxu1  ;;  %v6379_v38 = vmax.f32 %v5539_v26, 0.0 }
 0x34a   : > { %v4518_v31 = vadd.f32 %v14413_v6, %v4517_v27  ;;  %v5542_v32 = vadd.f32 %v14413_v6, %v5541_v60 }
 0x34b   : > { %v4519_v34 = vpop.f32.mrf.mxu0  ;;  %v5543_v35 = vpop.f32.mrf.mxu1 }
 0x34c   : > { %v6124_v39 = vmax.f32 %v4518_v31, 0.0  ;;  %v6380_v40 = vmax.f32 %v5542_v32, 0.0  ;;  %v13218_v32 = vld [vmem:[%s13556_s11 + $0x650] ss:$8 sps:$4 sm:$0xff]  }
 0x34d   : > { %v4522_v41 = vpop.f32.mrf.mxu0  ;;  %4713 = vmatmul.mubr.bf16.gmra.mxu0 %v13200_v28  ;;  %v5546_v42 = vpop.f32.mrf.mxu1  ;;  %5737 = vmatmul.mubr.bf16.gmra.mxu1 %v13201_v30 }
 0x34e   : > { %v11352_v43 = vpack.c.bf16 %v6124_v39, %v6123_v37  ;;  %v11992_v44 = vpack.c.bf16 %v6380_v40, %v6379_v38  ;;  %9796 = vmatprep.mubr.msk.bf16.mxu0 %vm3120_vm0, %v13202_v33  ;;  %9924 = vmatprep.mubr.msk.bf16.mxu1 %vm3120_vm0, %v13204_v36  ;;  %v4523_v47 = vadd.f32 %v14646_v46, %v4522_v41  ;;  %v13219_v33 = vld [vmem:[%s13556_s11 + $0xe50] ss:$8 sps:$4 sm:$0xff]   ;;  %v13220_v36 = vld [vmem:[%s13556_s11 + $0x664] ss:$8 sps:$4 sm:$0xff]  }
 0x34f   : > { %v4524_v6 = vpop.f32.mrf.mxu0  ;;  %v5548_v45 = vpop.f32.mrf.mxu1  ;;  %v5547_v48 = vadd.f32 %v14646_v46, %v5546_v42  ;;  %v13222_v39 = vld [vmem:[%s13556_s11 + $0xe64] ss:$8 sps:$4 sm:$0xff]  }
 0x350   : > { %12336 = vst [vmem:[%s13748_s18 + $0x248] sm:$0xff] %v11352_v43   ;;  %12464 = vst [vmem:[%s13748_s18 + $0x648] sm:$0xff] %v11992_v44   ;;  %v6125_v61 = vmax.f32 %v4523_v47, 0.0 }
 0x351   : > { %v4525_v49 = vpop.f32.mrf.mxu0  ;;  %v5549_v50 = vpop.f32.mrf.mxu1  ;;  %v6381_v62 = vmax.f32 %v5547_v48, 0.0 }
 0x352   : > { %v4526_v54 = vadd.f32 %v14646_v46, %v4525_v49  ;;  %v5550_v55 = vadd.f32 %v14646_v46, %v5549_v50 }
 0x353   : > { %v4527_v57 = vpop.f32.mrf.mxu0  ;;  %v5551_v58 = vpop.f32.mrf.mxu1 }
 0x354   : > { %v6126_v63 = vmax.f32 %v4526_v54, 0.0  ;;  %v6382_v0 = vmax.f32 %v5550_v55, 0.0  ;;  %v13224_v55 = vld [vmem:[%s13556_s11 + $0x660] ss:$8 sps:$4 sm:$0xff]  }
 0x355   : > { %v4530_v1 = vpop.f32.mrf.mxu0  ;;  %4721 = vmatmul.mubr.bf16.gmra.mxu0 %v13206_v51  ;;  %v5554_v2 = vpop.f32.mrf.mxu1  ;;  %5745 = vmatmul.mubr.bf16.gmra.mxu1 %v13207_v52 }
 0x356   : > { %v11357_v53 = vpack.c.bf16 %v6126_v63, %v6125_v61  ;;  %v11997_v3 = vpack.c.bf16 %v6382_v0, %v6381_v62  ;;  %9797 = vmatprep.mubr.msk.bf16.mxu0 %vm3120_vm0, %v13208_v56  ;;  %9925 = vmatprep.mubr.msk.bf16.mxu1 %vm3120_vm0, %v13210_v59  ;;  %v4531_v5 = vadd.f32 %v14646_v46, %v4530_v1  ;;  %v13225_v56 = vld [vmem:[%s13556_s11 + $0xe60] ss:$8 sps:$4 sm:$0xff]   ;;  %v13226_v59 = vld [vmem:[%s13556_s11 + $0x674] ss:$8 sps:$4 sm:$0xff]  }
 0x357   : > { %v4532_v4 = vpop.f32.mrf.mxu0  ;;  %v5556_v29 = vpop.f32.mrf.mxu1  ;;  %v5555_v7 = vadd.f32 %v14646_v46, %v5554_v2  ;;  %v13228_v63 = vld [vmem:[%s13556_s11 + $0xe74] ss:$8 sps:$4 sm:$0xff]  }
 0x358   : > { %12337 = vst [vmem:[%s13748_s18 + $0x250] sm:$0xff] %v11357_v53   ;;  %12465 = vst [vmem:[%s13748_s18 + $0x650] sm:$0xff] %v11997_v3   ;;  %v6127_v18 = vmax.f32 %v4531_v5, 0.0 }
 0x359   : > { %v4533_v8 = vpop.f32.mrf.mxu0  ;;  %v5557_v9 = vpop.f32.mrf.mxu1  ;;  %v6383_v19 = vmax.f32 %v5555_v7, 0.0 }
 0x35a   : > { %v4534_v12 = vadd.f32 %v14646_v46, %v4533_v8  ;;  %v5558_v13 = vadd.f32 %v14646_v46, %v5557_v9 }
 0x35b   : > { %v4535_v15 = vpop.f32.mrf.mxu0  ;;  %v5559_v16 = vpop.f32.mrf.mxu1 }
 0x35c   : > { %v6128_v20 = vmax.f32 %v4534_v12, 0.0  ;;  %v6384_v21 = vmax.f32 %v5558_v13, 0.0  ;;  %v13230_v13 = vld [vmem:[%s13556_s11 + $0x670] ss:$8 sps:$4 sm:$0xff]  }
 0x35d   : > { %v4538_v22 = vpop.f32.mrf.mxu0  ;;  %4729 = vmatmul.mubr.bf16.gmra.mxu0 %v13212_v10  ;;  %v5562_v23 = vpop.f32.mrf.mxu1  ;;  %5753 = vmatmul.mubr.bf16.gmra.mxu1 %v13213_v11 }
 0x35e   : > { %v11362_v24 = vpack.c.bf16 %v6128_v20, %v6127_v18  ;;  %v12002_v25 = vpack.c.bf16 %v6384_v21, %v6383_v19  ;;  %9798 = vmatprep.mubr.msk.bf16.mxu0 %vm3120_vm0, %v13214_v14  ;;  %9926 = vmatprep.mubr.msk.bf16.mxu1 %vm3120_vm0, %v13216_v17  ;;  %v4539_v60 = vadd.f32 %v14646_v46, %v4538_v22  ;;  %v13231_v14 = vld [vmem:[%s13556_s11 + $0xe70] ss:$8 sps:$4 sm:$0xff]   ;;  %v13232_v17 = vld [vmem:[%s13556_s11 + $0x684] ss:$8 sps:$4 sm:$0xff]  }
 0x35f   : > { %v4540_v26 = vpop.f32.mrf.mxu0  ;;  %v5564_v27 = vpop.f32.mrf.mxu1  ;;  %v5563_v28 = vadd.f32 %v14646_v46, %v5562_v23  ;;  %v13234_v20 = vld [vmem:[%s13556_s11 + $0xe84] ss:$8 sps:$4 sm:$0xff]  }
 0x360   : > { %12338 = vst [vmem:[%s13748_s18 + $0x258] sm:$0xff] %v11362_v24   ;;  %12466 = vst [vmem:[%s13748_s18 + $0x658] sm:$0xff] %v12002_v25   ;;  %v6129_v40 = vmax.f32 %v4539_v60, 0.0 }
 0x361   : > { %v4541_v30 = vpop.f32.mrf.mxu0  ;;  %v5565_v31 = vpop.f32.mrf.mxu1  ;;  %v6385_v41 = vmax.f32 %v5563_v28, 0.0 }
 0x362   : > { %v4542_v34 = vadd.f32 %v14646_v46, %v4541_v30  ;;  %v5566_v35 = vadd.f32 %v14646_v46, %v5565_v31 }
 0x363   : > { %v4543_v37 = vpop.f32.mrf.mxu0  ;;  %v5567_v38 = vpop.f32.mrf.mxu1 }
 0x364   : > { %v6130_v42 = vmax.f32 %v4542_v34, 0.0  ;;  %v6386_v43 = vmax.f32 %v5566_v35, 0.0  ;;  %v13236_v35 = vld [vmem:[%s13556_s11 + $0x680] ss:$8 sps:$4 sm:$0xff]  }
 0x365   : > { %v4546_v44 = vpop.f32.mrf.mxu0  ;;  %4737 = vmatmul.mubr.bf16.gmra.mxu0 %v13218_v32  ;;  %v5570_v6 = vpop.f32.mrf.mxu1  ;;  %5761 = vmatmul.mubr.bf16.gmra.mxu1 %v13219_v33 }
 0x366   : > { %v11367_v45 = vpack.c.bf16 %v6130_v42, %v6129_v40  ;;  %v12007_v47 = vpack.c.bf16 %v6386_v43, %v6385_v41  ;;  %9799 = vmatprep.mubr.msk.bf16.mxu0 %vm3120_vm0, %v13220_v36  ;;  %9927 = vmatprep.mubr.msk.bf16.mxu1 %vm3120_vm0, %v13222_v39  ;;  %v4547_v50 = vadd.f32 %v14646_v46, %v4546_v44  ;;  %v13237_v36 = vld [vmem:[%s13556_s11 + $0xe80] ss:$8 sps:$4 sm:$0xff]   ;;  %v13238_v39 = vld [vmem:[%s13556_s11 + $0x694] ss:$8 sps:$4 sm:$0xff]  }
 0x367   : > { %v4548_v48 = vpop.f32.mrf.mxu0  ;;  %v5572_v49 = vpop.f32.mrf.mxu1  ;;  %v5571_v51 = vadd.f32 %v14646_v46, %v5570_v6  ;;  %v13240_v42 = vld [vmem:[%s13556_s11 + $0xe94] ss:$8 sps:$4 sm:$0xff]  }
 0x368   : > { %12339 = vst [vmem:[%s13748_s18 + $0x260] sm:$0xff] %v11367_v45   ;;  %12467 = vst [vmem:[%s13748_s18 + $0x660] sm:$0xff] %v12007_v47   ;;  %v6131_v0 = vmax.f32 %v4547_v50, 0.0 }
 0x369   : > { %v4549_v52 = vpop.f32.mrf.mxu0  ;;  %v5573_v54 = vpop.f32.mrf.mxu1  ;;  %v6387_v1 = vmax.f32 %v5571_v51, 0.0 }
 0x36a   : > { %v4550_v57 = vadd.f32 %v14646_v46, %v4549_v52  ;;  %v5574_v58 = vadd.f32 %v14646_v46, %v5573_v54 }
 0x36b   : > { %v4551_v61 = vpop.f32.mrf.mxu0  ;;  %v5575_v62 = vpop.f32.mrf.mxu1 }
 0x36c   : > { %v6132_v2 = vmax.f32 %v4550_v57, 0.0  ;;  %v6388_v53 = vmax.f32 %v5574_v58, 0.0  ;;  %v13242_v58 = vld [vmem:[%s13556_s11 + $0x690] ss:$8 sps:$4 sm:$0xff]  }
 0x36d   : > { %v4554_v3 = vpop.f32.mrf.mxu0  ;;  %4745 = vmatmul.mubr.bf16.gmra.mxu0 %v13224_v55  ;;  %v5578_v4 = vpop.f32.mrf.mxu1  ;;  %5769 = vmatmul.mubr.bf16.gmra.mxu1 %v13225_v56 }
 0x36e   : > { %v11372_v29 = vpack.c.bf16 %v6132_v2, %v6131_v0  ;;  %v12012_v5 = vpack.c.bf16 %v6388_v53, %v6387_v1  ;;  %9800 = vmatprep.mubr.msk.bf16.mxu0 %vm3120_vm0, %v13226_v59  ;;  %9928 = vmatprep.mubr.msk.bf16.mxu1 %vm3120_vm0, %v13228_v63  ;;  %v4555_v9 = vadd.f32 %v14646_v46, %v4554_v3  ;;  %v13243_v59 = vld [vmem:[%s13556_s11 + $0xe90] ss:$8 sps:$4 sm:$0xff]   ;;  %v13244_v63 = vld [vmem:[%s13556_s11 + $0x6a4] ss:$8 sps:$4 sm:$0xff]  }
 0x36f   : > { %v4556_v7 = vpop.f32.mrf.mxu0  ;;  %v5580_v8 = vpop.f32.mrf.mxu1  ;;  %v5579_v10 = vadd.f32 %v14646_v46, %v5578_v4  ;;  %v13246_v2 = vld [vmem:[%s13556_s11 + $0xea4] ss:$8 sps:$4 sm:$0xff]  }
 0x370   : > { %12340 = vst [vmem:[%s13748_s18 + $0x268] sm:$0xff] %v11372_v29   ;;  %12468 = vst [vmem:[%s13748_s18 + $0x668] sm:$0xff] %v12012_v5   ;;  %v6133_v21 = vmax.f32 %v4555_v9, 0.0 }
 0x371   : > { %v4557_v11 = vpop.f32.mrf.mxu0  ;;  %v5581_v12 = vpop.f32.mrf.mxu1  ;;  %v6389_v22 = vmax.f32 %v5579_v10, 0.0 }
 0x372   : > { %v4558_v15 = vadd.f32 %v14646_v46, %v4557_v11  ;;  %v5582_v16 = vadd.f32 %v14646_v46, %v5581_v12 }
 0x373   : > { %v4559_v18 = vpop.f32.mrf.mxu0  ;;  %v5583_v19 = vpop.f32.mrf.mxu1 }
 0x374   : > { %v6134_v23 = vmax.f32 %v4558_v15, 0.0  ;;  %v6390_v24 = vmax.f32 %v5582_v16, 0.0  ;;  %v13248_v16 = vld [vmem:[%s13556_s11 + $0x6a0] ss:$8 sps:$4 sm:$0xff]  }
 0x375   : > { %v4562_v25 = vpop.f32.mrf.mxu0  ;;  %4753 = vmatmul.mubr.bf16.gmra.mxu0 %v13230_v13  ;;  %v5586_v26 = vpop.f32.mrf.mxu1  ;;  %5777 = vmatmul.mubr.bf16.gmra.mxu1 %v13231_v14 }
 0x376   : > { %v11377_v27 = vpack.c.bf16 %v6134_v23, %v6133_v21  ;;  %v12017_v60 = vpack.c.bf16 %v6390_v24, %v6389_v22  ;;  %9801 = vmatprep.mubr.msk.bf16.mxu0 %vm3120_vm0, %v13232_v17  ;;  %9929 = vmatprep.mubr.msk.bf16.mxu1 %vm3120_vm0, %v13234_v20  ;;  %v4563_v31 = vadd.f32 %v14646_v46, %v4562_v25  ;;  %v13249_v17 = vld [vmem:[%s13556_s11 + $0xea0] ss:$8 sps:$4 sm:$0xff]   ;;  %v13250_v20 = vld [vmem:[%s13556_s11 + $0x6b4] ss:$8 sps:$4 sm:$0xff]  }
 0x377   : > { %v4564_v28 = vpop.f32.mrf.mxu0  ;;  %v5588_v30 = vpop.f32.mrf.mxu1  ;;  %v5587_v32 = vadd.f32 %v14646_v46, %v5586_v26  ;;  %v13252_v23 = vld [vmem:[%s13556_s11 + $0xeb4] ss:$8 sps:$4 sm:$0xff]  }
 0x378   : > { %12341 = vst [vmem:[%s13748_s18 + $0x270] sm:$0xff] %v11377_v27   ;;  %12469 = vst [vmem:[%s13748_s18 + $0x670] sm:$0xff] %v12017_v60   ;;  %v6135_v43 = vmax.f32 %v4563_v31, 0.0 }
 0x379   : > { %v4565_v33 = vpop.f32.mrf.mxu0  ;;  %v5589_v34 = vpop.f32.mrf.mxu1  ;;  %v6391_v44 = vmax.f32 %v5587_v32, 0.0 }
 0x37a   : > { %v4566_v37 = vadd.f32 %v14646_v46, %v4565_v33  ;;  %v5590_v38 = vadd.f32 %v14646_v46, %v5589_v34 }
 0x37b   : > { %v4567_v40 = vpop.f32.mrf.mxu0  ;;  %v5591_v41 = vpop.f32.mrf.mxu1 }
 0x37c   : > { %v6136_v6 = vmax.f32 %v4566_v37, 0.0  ;;  %v6392_v45 = vmax.f32 %v5590_v38, 0.0  ;;  %v13254_v38 = vld [vmem:[%s13556_s11 + $0x6b0] ss:$8 sps:$4 sm:$0xff]  }
 0x37d   : > { %v4570_v47 = vpop.f32.mrf.mxu0  ;;  %4761 = vmatmul.mubr.bf16.gmra.mxu0 %v13236_v35  ;;  %v5594_v48 = vpop.f32.mrf.mxu1  ;;  %5785 = vmatmul.mubr.bf16.gmra.mxu1 %v13237_v36 }
 0x37e   : > { %v11382_v49 = vpack.c.bf16 %v6136_v6, %v6135_v43  ;;  %v12022_v50 = vpack.c.bf16 %v6392_v45, %v6391_v44  ;;  %9802 = vmatprep.mubr.msk.bf16.mxu0 %vm3120_vm0, %v13238_v39  ;;  %9930 = vmatprep.mubr.msk.bf16.mxu1 %vm3120_vm0, %v13240_v42  ;;  %v4571_v54 = vadd.f32 %v14646_v46, %v4570_v47  ;;  %v13255_v39 = vld [vmem:[%s13556_s11 + $0xeb0] ss:$8 sps:$4 sm:$0xff]   ;;  %v13256_v42 = vld [vmem:[%s13556_s11 + $0x6c4] ss:$8 sps:$4 sm:$0xff]  }
 0x37f   : > { %v4572_v51 = vpop.f32.mrf.mxu0  ;;  %v5596_v52 = vpop.f32.mrf.mxu1  ;;  %v5595_v55 = vadd.f32 %v14646_v46, %v5594_v48  ;;  %v13258_v6 = vld [vmem:[%s13556_s11 + $0xec4] ss:$8 sps:$4 sm:$0xff]  }
 0x380   : > { %12342 = vst [vmem:[%s13748_s18 + $0x278] sm:$0xff] %v11382_v49   ;;  %12470 = vst [vmem:[%s13748_s18 + $0x678] sm:$0xff] %v12022_v50   ;;  %v6137_v53 = vmax.f32 %v4571_v54, 0.0 }
 0x381   : > { %v4573_v56 = vpop.f32.mrf.mxu0  ;;  %v5597_v57 = vpop.f32.mrf.mxu1  ;;  %v6393_v3 = vmax.f32 %v5595_v55, 0.0 }
 0x382   : > { %v4574_v61 = vadd.f32 %v14646_v46, %v4573_v56  ;;  %v5598_v62 = vadd.f32 %v14646_v46, %v5597_v57 }
 0x383   : > { %v4575_v0 = vpop.f32.mrf.mxu0  ;;  %v5599_v1 = vpop.f32.mrf.mxu1 }
 0x384   : > { %v6138_v4 = vmax.f32 %v4574_v61, 0.0  ;;  %v6394_v29 = vmax.f32 %v5598_v62, 0.0  ;;  %v13260_v62 = vld [vmem:[%s13556_s11 + $0x6c0] ss:$8 sps:$4 sm:$0xff]  }
 0x385   : > { %v4578_v5 = vpop.f32.mrf.mxu0  ;;  %4769 = vmatmul.mubr.bf16.gmra.mxu0 %v13242_v58  ;;  %v5602_v7 = vpop.f32.mrf.mxu1  ;;  %5793 = vmatmul.mubr.bf16.gmra.mxu1 %v13243_v59 }
 0x386   : > { %v11387_v8 = vpack.c.bf16 %v6138_v4, %v6137_v53  ;;  %v12027_v9 = vpack.c.bf16 %v6394_v29, %v6393_v3  ;;  %9803 = vmatprep.mubr.msk.bf16.mxu0 %vm3120_vm0, %v13244_v63  ;;  %9931 = vmatprep.mubr.msk.bf16.mxu1 %vm3120_vm0, %v13246_v2  ;;  %v4579_v12 = vadd.f32 %v14646_v46, %v4578_v5  ;;  %v13261_v63 = vld [vmem:[%s13556_s11 + $0xec0] ss:$8 sps:$4 sm:$0xff]   ;;  %v13262_v2 = vld [vmem:[%s13556_s11 + $0x6d4] ss:$8 sps:$4 sm:$0xff]  }
 0x387   : > { %v4580_v10 = vpop.f32.mrf.mxu0  ;;  %v5604_v11 = vpop.f32.mrf.mxu1  ;;  %v5603_v13 = vadd.f32 %v14646_v46, %v5602_v7  ;;  %v13264_v4 = vld [vmem:[%s13556_s11 + $0xed4] ss:$8 sps:$4 sm:$0xff]  }
 0x388   : > { %12343 = vst [vmem:[%s13748_s18 + $0x280] sm:$0xff] %v11387_v8   ;;  %12471 = vst [vmem:[%s13748_s18 + $0x680] sm:$0xff] %v12027_v9   ;;  %v6139_v24 = vmax.f32 %v4579_v12, 0.0 }
 0x389   : > { %v4581_v14 = vpop.f32.mrf.mxu0  ;;  %v5605_v15 = vpop.f32.mrf.mxu1  ;;  %v6395_v25 = vmax.f32 %v5603_v13, 0.0 }
 0x38a   : > { %v4582_v18 = vadd.f32 %v14646_v46, %v4581_v14  ;;  %v5606_v19 = vadd.f32 %v14646_v46, %v5605_v15 }
 0x38b   : > { %v4583_v21 = vpop.f32.mrf.mxu0  ;;  %v5607_v22 = vpop.f32.mrf.mxu1 }
 0x38c   : > { %v6140_v26 = vmax.f32 %v4582_v18, 0.0  ;;  %v6396_v27 = vmax.f32 %v5606_v19, 0.0  ;;  %v13266_v19 = vld [vmem:[%s13556_s11 + $0x6d0] ss:$8 sps:$4 sm:$0xff]  }
 0x38d   : > { %v4586_v60 = vpop.f32.mrf.mxu0  ;;  %4777 = vmatmul.mubr.bf16.gmra.mxu0 %v13248_v16  ;;  %v5610_v28 = vpop.f32.mrf.mxu1  ;;  %5801 = vmatmul.mubr.bf16.gmra.mxu1 %v13249_v17 }
 0x38e   : > { %v11392_v30 = vpack.c.bf16 %v6140_v26, %v6139_v24  ;;  %v12032_v31 = vpack.c.bf16 %v6396_v27, %v6395_v25  ;;  %9804 = vmatprep.mubr.msk.bf16.mxu0 %vm3120_vm0, %v13250_v20  ;;  %9932 = vmatprep.mubr.msk.bf16.mxu1 %vm3120_vm0, %v13252_v23  ;;  %v4587_v34 = vadd.f32 %v14646_v46, %v4586_v60  ;;  %v13267_v20 = vld [vmem:[%s13556_s11 + $0xed0] ss:$8 sps:$4 sm:$0xff]   ;;  %v13268_v23 = vld [vmem:[%s13556_s11 + $0x6e4] ss:$8 sps:$4 sm:$0xff]  }
 0x38f   : > { %v4588_v32 = vpop.f32.mrf.mxu0  ;;  %v5612_v33 = vpop.f32.mrf.mxu1  ;;  %v5611_v35 = vadd.f32 %v14646_v46, %v5610_v28  ;;  %v13270_v26 = vld [vmem:[%s13556_s11 + $0xee4] ss:$8 sps:$4 sm:$0xff]  }
 0x390   : > { %12344 = vst [vmem:[%s13748_s18 + $0x288] sm:$0xff] %v11392_v30   ;;  %12472 = vst [vmem:[%s13748_s18 + $0x688] sm:$0xff] %v12032_v31   ;;  %v6141_v45 = vmax.f32 %v4587_v34, 0.0 }
 0x391   : > { %v4589_v36 = vpop.f32.mrf.mxu0  ;;  %v5613_v37 = vpop.f32.mrf.mxu1  ;;  %v6397_v47 = vmax.f32 %v5611_v35, 0.0 }
 0x392   : > { %v4590_v40 = vadd.f32 %v14646_v46, %v4589_v36  ;;  %v5614_v41 = vadd.f32 %v14646_v46, %v5613_v37 }
 0x393   : > { %v4591_v43 = vpop.f32.mrf.mxu0  ;;  %v5615_v44 = vpop.f32.mrf.mxu1 }
 0x394   : > { %v6142_v48 = vmax.f32 %v4590_v40, 0.0  ;;  %v6398_v49 = vmax.f32 %v5614_v41, 0.0  ;;  %v13272_v41 = vld [vmem:[%s13556_s11 + $0x6e0] ss:$8 sps:$4 sm:$0xff]  }
 0x395   : > { %v4594_v50 = vpop.f32.mrf.mxu0  ;;  %4785 = vmatmul.mubr.bf16.gmra.mxu0 %v13254_v38  ;;  %v5618_v51 = vpop.f32.mrf.mxu1  ;;  %5809 = vmatmul.mubr.bf16.gmra.mxu1 %v13255_v39 }
 0x396   : > { %v11397_v52 = vpack.c.bf16 %v6142_v48, %v6141_v45  ;;  %v12037_v54 = vpack.c.bf16 %v6398_v49, %v6397_v47  ;;  %9805 = vmatprep.mubr.msk.bf16.mxu0 %vm3120_vm0, %v13256_v42  ;;  %9933 = vmatprep.mubr.msk.bf16.mxu1 %vm3120_vm0, %v13258_v6  ;;  %v4595_v57 = vadd.f32 %v14646_v46, %v4594_v50  ;;  %v13273_v42 = vld [vmem:[%s13556_s11 + $0xee0] ss:$8 sps:$4 sm:$0xff]   ;;  %v13274_v6 = vld [vmem:[%s13556_s11 + $0x6f4] ss:$8 sps:$4 sm:$0xff]  }
 0x397   : > { %v4596_v55 = vpop.f32.mrf.mxu0  ;;  %v5620_v56 = vpop.f32.mrf.mxu1  ;;  %v5619_v58 = vadd.f32 %v14646_v46, %v5618_v51  ;;  %v13276_v48 = vld [vmem:[%s13556_s11 + $0xef4] ss:$8 sps:$4 sm:$0xff]  }
 0x398   : > { %12345 = vst [vmem:[%s13748_s18 + $0x290] sm:$0xff] %v11397_v52   ;;  %12473 = vst [vmem:[%s13748_s18 + $0x690] sm:$0xff] %v12037_v54   ;;  %v6143_v29 = vmax.f32 %v4595_v57, 0.0 }
 0x399   : > { %v4597_v59 = vpop.f32.mrf.mxu0  ;;  %v5621_v61 = vpop.f32.mrf.mxu1  ;;  %v6399_v5 = vmax.f32 %v5619_v58, 0.0 }
 0x39a   : > { %v4598_v0 = vadd.f32 %v14646_v46, %v4597_v59  ;;  %v5622_v1 = vadd.f32 %v14646_v46, %v5621_v61 }
 0x39b   : > { %v4599_v53 = vpop.f32.mrf.mxu0  ;;  %v5623_v3 = vpop.f32.mrf.mxu1 }
 0x39c   : > { %v6144_v7 = vmax.f32 %v4598_v0, 0.0  ;;  %v6400_v8 = vmax.f32 %v5622_v1, 0.0  ;;  %v13278_v1 = vld [vmem:[%s13556_s11 + $0x6f0] ss:$8 sps:$4 sm:$0xff]  }
 0x39d   : > { %v4602_v9 = vpop.f32.mrf.mxu0  ;;  %4793 = vmatmul.mubr.bf16.gmra.mxu0 %v13260_v62  ;;  %v5626_v10 = vpop.f32.mrf.mxu1  ;;  %5817 = vmatmul.mubr.bf16.gmra.mxu1 %v13261_v63 }
 0x39e   : > { %v11402_v11 = vpack.c.bf16 %v6144_v7, %v6143_v29  ;;  %v12042_v12 = vpack.c.bf16 %v6400_v8, %v6399_v5  ;;  %9806 = vmatprep.mubr.msk.bf16.mxu0 %vm3120_vm0, %v13262_v2  ;;  %9934 = vmatprep.mubr.msk.bf16.mxu1 %vm3120_vm0, %v13264_v4  ;;  %v4603_v15 = vadd.f32 %v14646_v46, %v4602_v9  ;;  %v13279_v2 = vld [vmem:[%s13556_s11 + $0xef0] ss:$8 sps:$4 sm:$0xff]   ;;  %v13280_v4 = vld [vmem:[%s13556_s11 + $0x704] ss:$8 sps:$4 sm:$0xff]  }
 0x39f   : > { %v4604_v13 = vpop.f32.mrf.mxu0  ;;  %v5628_v14 = vpop.f32.mrf.mxu1  ;;  %v5627_v16 = vadd.f32 %v14646_v46, %v5626_v10  ;;  %v13282_v7 = vld [vmem:[%s13556_s11 + $0xf04] ss:$8 sps:$4 sm:$0xff]  }
 0x3a0   : > { %12346 = vst [vmem:[%s13748_s18 + $0x298] sm:$0xff] %v11402_v11   ;;  %12474 = vst [vmem:[%s13748_s18 + $0x698] sm:$0xff] %v12042_v12   ;;  %v6145_v27 = vmax.f32 %v4603_v15, 0.0 }
 0x3a1   : > { %v4605_v17 = vpop.f32.mrf.mxu0  ;;  %v5629_v18 = vpop.f32.mrf.mxu1  ;;  %v6401_v60 = vmax.f32 %v5627_v16, 0.0 }
 0x3a2   : > { %v4606_v21 = vadd.f32 %v14646_v46, %v4605_v17  ;;  %v5630_v22 = vadd.f32 %v14646_v46, %v5629_v18 }
 0x3a3   : > { %v4607_v24 = vpop.f32.mrf.mxu0  ;;  %v5631_v25 = vpop.f32.mrf.mxu1 }
 0x3a4   : > { %v6146_v28 = vmax.f32 %v4606_v21, 0.0  ;;  %v6402_v30 = vmax.f32 %v5630_v22, 0.0  ;;  %v13284_v22 = vld [vmem:[%s13556_s11 + $0x700] ss:$8 sps:$4 sm:$0xff]  }
 0x3a5   : > { %v4610_v31 = vpop.f32.mrf.mxu0  ;;  %4801 = vmatmul.mubr.bf16.gmra.mxu0 %v13266_v19  ;;  %v5634_v32 = vpop.f32.mrf.mxu1  ;;  %5825 = vmatmul.mubr.bf16.gmra.mxu1 %v13267_v20 }
 0x3a6   : > { %v11407_v33 = vpack.c.bf16 %v6146_v28, %v6145_v27  ;;  %v12047_v34 = vpack.c.bf16 %v6402_v30, %v6401_v60  ;;  %9807 = vmatprep.mubr.msk.bf16.mxu0 %vm3120_vm0, %v13268_v23  ;;  %9935 = vmatprep.mubr.msk.bf16.mxu1 %vm3120_vm0, %v13270_v26  ;;  %v4611_v37 = vadd.f32 %v14646_v46, %v4610_v31  ;;  %v13285_v23 = vld [vmem:[%s13556_s11 + $0xf00] ss:$8 sps:$4 sm:$0xff]   ;;  %v13286_v26 = vld [vmem:[%s13556_s11 + $0x714] ss:$8 sps:$4 sm:$0xff]  }
 0x3a7   : > { %v4612_v35 = vpop.f32.mrf.mxu0  ;;  %v5636_v36 = vpop.f32.mrf.mxu1  ;;  %v5635_v38 = vadd.f32 %v14646_v46, %v5634_v32  ;;  %v13288_v28 = vld [vmem:[%s13556_s11 + $0xf14] ss:$8 sps:$4 sm:$0xff]  }
 0x3a8   : > { %12347 = vst [vmem:[%s13748_s18 + $0x2a0] sm:$0xff] %v11407_v33   ;;  %12475 = vst [vmem:[%s13748_s18 + $0x6a0] sm:$0xff] %v12047_v34   ;;  %v6147_v49 = vmax.f32 %v4611_v37, 0.0 }
 0x3a9   : > { %v4613_v39 = vpop.f32.mrf.mxu0  ;;  %v5637_v40 = vpop.f32.mrf.mxu1  ;;  %v6403_v50 = vmax.f32 %v5635_v38, 0.0 }
 0x3aa   : > { %v4614_v43 = vadd.f32 %v14646_v46, %v4613_v39  ;;  %v5638_v44 = vadd.f32 %v14646_v46, %v5637_v40 }
 0x3ab   : > { %v4615_v45 = vpop.f32.mrf.mxu0  ;;  %v5639_v47 = vpop.f32.mrf.mxu1 }
 0x3ac   : > { %v6148_v51 = vmax.f32 %v4614_v43, 0.0  ;;  %v6404_v52 = vmax.f32 %v5638_v44, 0.0  ;;  %v13290_v44 = vld [vmem:[%s13556_s11 + $0x710] ss:$8 sps:$4 sm:$0xff]  }
 0x3ad   : > { %v4618_v54 = vpop.f32.mrf.mxu0  ;;  %4809 = vmatmul.mubr.bf16.gmra.mxu0 %v13272_v41  ;;  %v5642_v55 = vpop.f32.mrf.mxu1  ;;  %5833 = vmatmul.mubr.bf16.gmra.mxu1 %v13273_v42 }
 0x3ae   : > { %v11412_v56 = vpack.c.bf16 %v6148_v51, %v6147_v49  ;;  %v12052_v57 = vpack.c.bf16 %v6404_v52, %v6403_v50  ;;  %9808 = vmatprep.mubr.msk.bf16.mxu0 %vm3120_vm0, %v13274_v6  ;;  %9936 = vmatprep.mubr.msk.bf16.mxu1 %vm3120_vm0, %v13276_v48  ;;  %v4619_v61 = vadd.f32 %v14646_v46, %v4618_v54  ;;  %v13291_v6 = vld [vmem:[%s13556_s11 + $0xf10] ss:$8 sps:$4 sm:$0xff]   ;;  %v13292_v48 = vld [vmem:[%s13556_s11 + $0x724] ss:$8 sps:$4 sm:$0xff]  }
 0x3af   : > { %v4620_v58 = vpop.f32.mrf.mxu0  ;;  %v5644_v59 = vpop.f32.mrf.mxu1  ;;  %v5643_v62 = vadd.f32 %v14646_v46, %v5642_v55  ;;  %v13294_v51 = vld [vmem:[%s13556_s11 + $0xf24] ss:$8 sps:$4 sm:$0xff]  }
 0x3b0   : > { %12348 = vst [vmem:[%s13748_s18 + $0x2a8] sm:$0xff] %v11412_v56   ;;  %12476 = vst [vmem:[%s13748_s18 + $0x6a8] sm:$0xff] %v12052_v57   ;;  %v6149_v8 = vmax.f32 %v4619_v61, 0.0 }
 0x3b1   : > { %v4621_v63 = vpop.f32.mrf.mxu0  ;;  %v5645_v0 = vpop.f32.mrf.mxu1  ;;  %v6405_v9 = vmax.f32 %v5643_v62, 0.0 }
 0x3b2   : > { %v4622_v53 = vadd.f32 %v14646_v46, %v4621_v63  ;;  %v5646_v3 = vadd.f32 %v14646_v46, %v5645_v0 }
 0x3b3   : > { %v4623_v29 = vpop.f32.mrf.mxu0  ;;  %v5647_v5 = vpop.f32.mrf.mxu1 }
 0x3b4   : > { %v6150_v10 = vmax.f32 %v4622_v53, 0.0  ;;  %v6406_v11 = vmax.f32 %v5646_v3, 0.0  ;;  %v13296_v3 = vld [vmem:[%s13556_s11 + $0x720] ss:$8 sps:$4 sm:$0xff]  }
 0x3b5   : > { %v4626_v12 = vpop.f32.mrf.mxu0  ;;  %4817 = vmatmul.mubr.bf16.gmra.mxu0 %v13278_v1  ;;  %v5650_v13 = vpop.f32.mrf.mxu1  ;;  %5841 = vmatmul.mubr.bf16.gmra.mxu1 %v13279_v2 }
 0x3b6   : > { %v11417_v14 = vpack.c.bf16 %v6150_v10, %v6149_v8  ;;  %v12057_v15 = vpack.c.bf16 %v6406_v11, %v6405_v9  ;;  %9809 = vmatprep.mubr.msk.bf16.mxu0 %vm3120_vm0, %v13280_v4  ;;  %9937 = vmatprep.mubr.msk.bf16.mxu1 %vm3120_vm0, %v13282_v7  ;;  %v4627_v18 = vadd.f32 %v14646_v46, %v4626_v12  ;;  %v13297_v4 = vld [vmem:[%s13556_s11 + $0xf20] ss:$8 sps:$4 sm:$0xff]   ;;  %v13298_v7 = vld [vmem:[%s13556_s11 + $0x734] ss:$8 sps:$4 sm:$0xff]  }
 0x3b7   : > { %v4628_v16 = vpop.f32.mrf.mxu0  ;;  %v5652_v17 = vpop.f32.mrf.mxu1  ;;  %v5651_v19 = vadd.f32 %v14646_v46, %v5650_v13  ;;  %v13300_v10 = vld [vmem:[%s13556_s11 + $0xf34] ss:$8 sps:$4 sm:$0xff]  }
 0x3b8   : > { %12349 = vst [vmem:[%s13748_s18 + $0x2b0] sm:$0xff] %v11417_v14   ;;  %12477 = vst [vmem:[%s13748_s18 + $0x6b0] sm:$0xff] %v12057_v15   ;;  %v6151_v30 = vmax.f32 %v4627_v18, 0.0 }
 0x3b9   : > { %v4629_v20 = vpop.f32.mrf.mxu0  ;;  %v5653_v21 = vpop.f32.mrf.mxu1  ;;  %v6407_v31 = vmax.f32 %v5651_v19, 0.0 }
 0x3ba   : > { %v4630_v24 = vadd.f32 %v14646_v46, %v4629_v20  ;;  %v5654_v25 = vadd.f32 %v14646_v46, %v5653_v21 }
 0x3bb   : > { %v4631_v27 = vpop.f32.mrf.mxu0  ;;  %v5655_v60 = vpop.f32.mrf.mxu1 }
 0x3bc   : > { %v6152_v32 = vmax.f32 %v4630_v24, 0.0  ;;  %v6408_v33 = vmax.f32 %v5654_v25, 0.0  ;;  %v13302_v25 = vld [vmem:[%s13556_s11 + $0x730] ss:$8 sps:$4 sm:$0xff]  }
 0x3bd   : > { %v4634_v34 = vpop.f32.mrf.mxu0  ;;  %4825 = vmatmul.mubr.bf16.gmra.mxu0 %v13284_v22  ;;  %v5658_v35 = vpop.f32.mrf.mxu1  ;;  %5849 = vmatmul.mubr.bf16.gmra.mxu1 %v13285_v23 }
 0x3be   : > { %v11422_v36 = vpack.c.bf16 %v6152_v32, %v6151_v30  ;;  %v12062_v37 = vpack.c.bf16 %v6408_v33, %v6407_v31  ;;  %9810 = vmatprep.mubr.msk.bf16.mxu0 %vm3120_vm0, %v13286_v26  ;;  %9938 = vmatprep.mubr.msk.bf16.mxu1 %vm3120_vm0, %v13288_v28  ;;  %v4635_v40 = vadd.f32 %v14646_v46, %v4634_v34  ;;  %v13303_v26 = vld [vmem:[%s13556_s11 + $0xf30] ss:$8 sps:$4 sm:$0xff]   ;;  %v13304_v28 = vld [vmem:[%s13556_s11 + $0x744] ss:$8 sps:$4 sm:$0xff]  }
 0x3bf   : > { %v4636_v38 = vpop.f32.mrf.mxu0  ;;  %v5660_v39 = vpop.f32.mrf.mxu1  ;;  %v5659_v41 = vadd.f32 %v14646_v46, %v5658_v35  ;;  %v13306_v32 = vld [vmem:[%s13556_s11 + $0xf44] ss:$8 sps:$4 sm:$0xff]  }
 0x3c0   : > { %12350 = vst [vmem:[%s13748_s18 + $0x2b8] sm:$0xff] %v11422_v36   ;;  %12478 = vst [vmem:[%s13748_s18 + $0x6b8] sm:$0xff] %v12062_v37   ;;  %v6153_v52 = vmax.f32 %v4635_v40, 0.0 }
 0x3c1   : > { %v4637_v42 = vpop.f32.mrf.mxu0  ;;  %v5661_v43 = vpop.f32.mrf.mxu1  ;;  %v6409_v54 = vmax.f32 %v5659_v41, 0.0 }
 0x3c2   : > { %v4638_v45 = vadd.f32 %v14646_v46, %v4637_v42  ;;  %v5662_v47 = vadd.f32 %v14646_v46, %v5661_v43 }
 0x3c3   : > { %v4639_v49 = vpop.f32.mrf.mxu0  ;;  %v5663_v50 = vpop.f32.mrf.mxu1 }
 0x3c4   : > { %v6154_v55 = vmax.f32 %v4638_v45, 0.0  ;;  %v6410_v56 = vmax.f32 %v5662_v47, 0.0  ;;  %v13308_v47 = vld [vmem:[%s13556_s11 + $0x740] ss:$8 sps:$4 sm:$0xff]  }
 0x3c5   : > { %v4642_v57 = vpop.f32.mrf.mxu0  ;;  %4833 = vmatmul.mubr.bf16.gmra.mxu0 %v13290_v44  ;;  %v5666_v58 = vpop.f32.mrf.mxu1  ;;  %5857 = vmatmul.mubr.bf16.gmra.mxu1 %v13291_v6 }
 0x3c6   : > { %v11427_v59 = vpack.c.bf16 %v6154_v55, %v6153_v52  ;;  %v12067_v61 = vpack.c.bf16 %v6410_v56, %v6409_v54  ;;  %9811 = vmatprep.mubr.msk.bf16.mxu0 %vm3120_vm0, %v13292_v48  ;;  %9939 = vmatprep.mubr.msk.bf16.mxu1 %vm3120_vm0, %v13294_v51  ;;  %v4643_v0 = vadd.f32 %v14646_v46, %v4642_v57  ;;  %v13309_v48 = vld [vmem:[%s13556_s11 + $0xf40] ss:$8 sps:$4 sm:$0xff]   ;;  %v13310_v51 = vld [vmem:[%s13556_s11 + $0x754] ss:$8 sps:$4 sm:$0xff]  }
 0x3c7   : > { %v4644_v62 = vpop.f32.mrf.mxu0  ;;  %v5668_v63 = vpop.f32.mrf.mxu1  ;;  %v5667_v1 = vadd.f32 %v14646_v46, %v5666_v58  ;;  %v13312_v55 = vld [vmem:[%s13556_s11 + $0xf54] ss:$8 sps:$4 sm:$0xff]  }
 0x3c8   : > { %12351 = vst [vmem:[%s13748_s18 + $0x2c0] sm:$0xff] %v11427_v59   ;;  %12479 = vst [vmem:[%s13748_s18 + $0x6c0] sm:$0xff] %v12067_v61   ;;  %v6155_v11 = vmax.f32 %v4643_v0, 0.0 }
 0x3c9   : > { %v4645_v2 = vpop.f32.mrf.mxu0  ;;  %v5669_v53 = vpop.f32.mrf.mxu1  ;;  %v6411_v12 = vmax.f32 %v5667_v1, 0.0 }
 0x3ca   : > { %v4646_v29 = vadd.f32 %v14646_v46, %v4645_v2  ;;  %v5670_v5 = vadd.f32 %v14646_v46, %v5669_v53 }
 0x3cb   : > { %v4647_v8 = vpop.f32.mrf.mxu0  ;;  %v5671_v9 = vpop.f32.mrf.mxu1 }
 0x3cc   : > { %v6156_v13 = vmax.f32 %v4646_v29, 0.0  ;;  %v6412_v14 = vmax.f32 %v5670_v5, 0.0  ;;  %v13314_v5 = vld [vmem:[%s13556_s11 + $0x750] ss:$8 sps:$4 sm:$0xff]  }
 0x3cd   : > { %v4650_v15 = vpop.f32.mrf.mxu0  ;;  %4841 = vmatmul.mubr.bf16.gmra.mxu0 %v13296_v3  ;;  %v5674_v16 = vpop.f32.mrf.mxu1  ;;  %5865 = vmatmul.mubr.bf16.gmra.mxu1 %v13297_v4 }
 0x3ce   : > { %v11432_v17 = vpack.c.bf16 %v6156_v13, %v6155_v11  ;;  %v12072_v18 = vpack.c.bf16 %v6412_v14, %v6411_v12  ;;  %9812 = vmatprep.mubr.msk.bf16.mxu0 %vm3120_vm0, %v13298_v7  ;;  %9940 = vmatprep.mubr.msk.bf16.mxu1 %vm3120_vm0, %v13300_v10  ;;  %v4651_v21 = vadd.f32 %v14646_v46, %v4650_v15  ;;  %v13315_v7 = vld [vmem:[%s13556_s11 + $0xf50] ss:$8 sps:$4 sm:$0xff]   ;;  %v13316_v10 = vld [vmem:[%s13556_s11 + $0x764] ss:$8 sps:$4 sm:$0xff]  }
 0x3cf   : > { %v4652_v19 = vpop.f32.mrf.mxu0  ;;  %v5676_v20 = vpop.f32.mrf.mxu1  ;;  %v5675_v22 = vadd.f32 %v14646_v46, %v5674_v16  ;;  %v13318_v13 = vld [vmem:[%s13556_s11 + $0xf64] ss:$8 sps:$4 sm:$0xff]  }
 0x3d0   : > { %12352 = vst [vmem:[%s13748_s18 + $0x2c8] sm:$0xff] %v11432_v17   ;;  %12480 = vst [vmem:[%s13748_s18 + $0x6c8] sm:$0xff] %v12072_v18   ;;  %v6157_v33 = vmax.f32 %v4651_v21, 0.0 }
 0x3d1   : > { %v4653_v23 = vpop.f32.mrf.mxu0  ;;  %v5677_v24 = vpop.f32.mrf.mxu1  ;;  %v6413_v34 = vmax.f32 %v5675_v22, 0.0 }
 0x3d2   : > { %v4654_v27 = vadd.f32 %v14646_v46, %v4653_v23  ;;  %v5678_v60 = vadd.f32 %v14646_v46, %v5677_v24  ;;  %v14879_v23 = vld [vmem:[%s15210_s2] ss:$0 sm:$0xff] }
 0x3d3   : > { %v4655_v30 = vpop.f32.mrf.mxu0  ;;  %v5679_v31 = vpop.f32.mrf.mxu1 }
 0x3d4   : > { %v6158_v35 = vmax.f32 %v4654_v27, 0.0  ;;  %v6414_v36 = vmax.f32 %v5678_v60, 0.0  ;;  %v13320_v60 = vld [vmem:[%s13556_s11 + $0x760] ss:$8 sps:$4 sm:$0xff]  }
 0x3d5   : > { %v4658_v37 = vpop.f32.mrf.mxu0  ;;  %4849 = vmatmul.mubr.bf16.gmra.mxu0 %v13302_v25  ;;  %v5682_v38 = vpop.f32.mrf.mxu1  ;;  %5873 = vmatmul.mubr.bf16.gmra.mxu1 %v13303_v26 }
 0x3d6   : > { %v11437_v39 = vpack.c.bf16 %v6158_v35, %v6157_v33  ;;  %v12077_v40 = vpack.c.bf16 %v6414_v36, %v6413_v34  ;;  %9813 = vmatprep.mubr.msk.bf16.mxu0 %vm3120_vm0, %v13304_v28  ;;  %9941 = vmatprep.mubr.msk.bf16.mxu1 %vm3120_vm0, %v13306_v32  ;;  %v4659_v43 = vadd.f32 %v14646_v46, %v4658_v37  ;;  %v13321_v28 = vld [vmem:[%s13556_s11 + $0xf60] ss:$8 sps:$4 sm:$0xff]   ;;  %v13322_v32 = vld [vmem:[%s13556_s11 + $0x774] ss:$8 sps:$4 sm:$0xff]  }
 0x3d7   : > { %v4660_v41 = vpop.f32.mrf.mxu0  ;;  %v5684_v42 = vpop.f32.mrf.mxu1  ;;  %v5683_v44 = vadd.f32 %v14646_v46, %v5682_v38  ;;  %v13324_v35 = vld [vmem:[%s13556_s11 + $0xf74] ss:$8 sps:$4 sm:$0xff]  }
 0x3d8   : > { %12353 = vst [vmem:[%s13748_s18 + $0x2d0] sm:$0xff] %v11437_v39   ;;  %12481 = vst [vmem:[%s13748_s18 + $0x6d0] sm:$0xff] %v12077_v40   ;;  %v6159_v56 = vmax.f32 %v4659_v43, 0.0 }
 0x3d9   : > { %v4661_v6 = vpop.f32.mrf.mxu0  ;;  %v5685_v45 = vpop.f32.mrf.mxu1  ;;  %v6415_v57 = vmax.f32 %v5683_v44, 0.0 }
 0x3da   : > { %v4662_v49 = vadd.f32 %v14646_v46, %v4661_v6  ;;  %v5686_v50 = vadd.f32 %v14646_v46, %v5685_v45 }
 0x3db   : > { %v4663_v52 = vpop.f32.mrf.mxu0  ;;  %v5687_v54 = vpop.f32.mrf.mxu1 }
 0x3dc   : > { %v6160_v58 = vmax.f32 %v4662_v49, 0.0  ;;  %v6416_v59 = vmax.f32 %v5686_v50, 0.0  ;;  %v13326_v50 = vld [vmem:[%s13556_s11 + $0x770] ss:$8 sps:$4 sm:$0xff]  }
 0x3dd   : > { %v4666_v61 = vpop.f32.mrf.mxu0  ;;  %4857 = vmatmul.mubr.bf16.gmra.mxu0 %v13308_v47  ;;  %v5690_v62 = vpop.f32.mrf.mxu1  ;;  %5881 = vmatmul.mubr.bf16.gmra.mxu1 %v13309_v48 }
 0x3de   : > { %v11442_v63 = vpack.c.bf16 %v6160_v58, %v6159_v56  ;;  %v12082_v0 = vpack.c.bf16 %v6416_v59, %v6415_v57  ;;  %9814 = vmatprep.mubr.msk.bf16.mxu0 %vm3120_vm0, %v13310_v51  ;;  %9942 = vmatprep.mubr.msk.bf16.mxu1 %vm3120_vm0, %v13312_v55  ;;  %v4667_v53 = vadd.f32 %v14646_v46, %v4666_v61  ;;  %v13327_v51 = vld [vmem:[%s13556_s11 + $0xf70] ss:$8 sps:$4 sm:$0xff]   ;;  %v13328_v55 = vld [vmem:[%s13556_s11 + $0x784] ss:$8 sps:$4 sm:$0xff]  }
 0x3df   : > { %v4668_v1 = vpop.f32.mrf.mxu0  ;;  %v5692_v2 = vpop.f32.mrf.mxu1  ;;  %v5691_v3 = vadd.f32 %v14646_v46, %v5690_v62  ;;  %v13330_v58 = vld [vmem:[%s13556_s11 + $0xf84] ss:$8 sps:$4 sm:$0xff]  }
 0x3e0   : > { %12354 = vst [vmem:[%s13748_s18 + $0x2d8] sm:$0xff] %v11442_v63   ;;  %12482 = vst [vmem:[%s13748_s18 + $0x6d8] sm:$0xff] %v12082_v0   ;;  %v6161_v14 = vmax.f32 %v4667_v53, 0.0 }
 0x3e1   : > { %v4669_v4 = vpop.f32.mrf.mxu0  ;;  %v5693_v29 = vpop.f32.mrf.mxu1  ;;  %v6417_v15 = vmax.f32 %v5691_v3, 0.0 }
 0x3e2   : > { %v4670_v8 = vadd.f32 %v14646_v46, %v4669_v4  ;;  %v5694_v9 = vadd.f32 %v14646_v46, %v5693_v29 }
 0x3e3   : > { %v4671_v11 = vpop.f32.mrf.mxu0  ;;  %v5695_v12 = vpop.f32.mrf.mxu1 }
 0x3e4   : > { %v6162_v16 = vmax.f32 %v4670_v8, 0.0  ;;  %v6418_v17 = vmax.f32 %v5694_v9, 0.0  ;;  %v13332_v9 = vld [vmem:[%s13556_s11 + $0x780] ss:$8 sps:$4 sm:$0xff]  }
 0x3e5   : > { %v4674_v18 = vpop.f32.mrf.mxu0  ;;  %4865 = vmatmul.mubr.bf16.gmra.mxu0 %v13314_v5  ;;  %v5698_v19 = vpop.f32.mrf.mxu1  ;;  %5889 = vmatmul.mubr.bf16.gmra.mxu1 %v13315_v7 }
 0x3e6   : > { %v11447_v20 = vpack.c.bf16 %v6162_v16, %v6161_v14  ;;  %v12087_v21 = vpack.c.bf16 %v6418_v17, %v6417_v15  ;;  %9815 = vmatprep.mubr.msk.bf16.mxu0 %vm3120_vm0, %v13316_v10  ;;  %9943 = vmatprep.mubr.msk.bf16.mxu1 %vm3120_vm0, %v13318_v13  ;;  %v4675_v24 = vadd.f32 %v14879_v23, %v4674_v18  ;;  %v13333_v10 = vld [vmem:[%s13556_s11 + $0xf80] ss:$8 sps:$4 sm:$0xff]   ;;  %v13334_v13 = vld [vmem:[%s13556_s11 + $0x794] ss:$8 sps:$4 sm:$0xff]  }
 0x3e7   : > { %v4676_v46 = vpop.f32.mrf.mxu0  ;;  %v5700_v22 = vpop.f32.mrf.mxu1  ;;  %v5699_v25 = vadd.f32 %v14879_v23, %v5698_v19  ;;  %v13336_v16 = vld [vmem:[%s13556_s11 + $0xf94] ss:$8 sps:$4 sm:$0xff]  }
 0x3e8   : > { %12355 = vst [vmem:[%s13748_s18 + $0x2e0] sm:$0xff] %v11447_v20   ;;  %12483 = vst [vmem:[%s13748_s18 + $0x6e0] sm:$0xff] %v12087_v21   ;;  %v6163_v36 = vmax.f32 %v4675_v24, 0.0 }
 0x3e9   : > { %v4677_v26 = vpop.f32.mrf.mxu0  ;;  %v5701_v27 = vpop.f32.mrf.mxu1  ;;  %v6419_v37 = vmax.f32 %v5699_v25, 0.0 }
 0x3ea   : > { %v4678_v30 = vadd.f32 %v14879_v23, %v4677_v26  ;;  %v5702_v31 = vadd.f32 %v14879_v23, %v5701_v27 }
 0x3eb   : > { %v4679_v33 = vpop.f32.mrf.mxu0  ;;  %v5703_v34 = vpop.f32.mrf.mxu1 }
 0x3ec   : > { %v6164_v38 = vmax.f32 %v4678_v30, 0.0  ;;  %v6420_v39 = vmax.f32 %v5702_v31, 0.0  ;;  %v13338_v31 = vld [vmem:[%s13556_s11 + $0x790] ss:$8 sps:$4 sm:$0xff]  }
 0x3ed   : > { %v4682_v40 = vpop.f32.mrf.mxu0  ;;  %4873 = vmatmul.mubr.bf16.gmra.mxu0 %v13320_v60  ;;  %v5706_v41 = vpop.f32.mrf.mxu1  ;;  %5897 = vmatmul.mubr.bf16.gmra.mxu1 %v13321_v28 }
 0x3ee   : > { %v11452_v42 = vpack.c.bf16 %v6164_v38, %v6163_v36  ;;  %v12092_v43 = vpack.c.bf16 %v6420_v39, %v6419_v37  ;;  %9816 = vmatprep.mubr.msk.bf16.mxu0 %vm3120_vm0, %v13322_v32  ;;  %9944 = vmatprep.mubr.msk.bf16.mxu1 %vm3120_vm0, %v13324_v35  ;;  %v4683_v45 = vadd.f32 %v14879_v23, %v4682_v40  ;;  %v13339_v32 = vld [vmem:[%s13556_s11 + $0xf90] ss:$8 sps:$4 sm:$0xff]   ;;  %v13340_v35 = vld [vmem:[%s13556_s11 + $0x7a4] ss:$8 sps:$4 sm:$0xff]  }
 0x3ef   : > { %v4684_v44 = vpop.f32.mrf.mxu0  ;;  %v5708_v6 = vpop.f32.mrf.mxu1  ;;  %v5707_v47 = vadd.f32 %v14879_v23, %v5706_v41  ;;  %v13342_v38 = vld [vmem:[%s13556_s11 + $0xfa4] ss:$8 sps:$4 sm:$0xff]  }
 0x3f0   : > { %12356 = vst [vmem:[%s13748_s18 + $0x2e8] sm:$0xff] %v11452_v42   ;;  %12484 = vst [vmem:[%s13748_s18 + $0x6e8] sm:$0xff] %v12092_v43   ;;  %v6165_v59 = vmax.f32 %v4683_v45, 0.0 }
 0x3f1   : > { %v4685_v48 = vpop.f32.mrf.mxu0  ;;  %v5709_v49 = vpop.f32.mrf.mxu1  ;;  %v6421_v61 = vmax.f32 %v5707_v47, 0.0 }
 0x3f2   : > { %v4686_v52 = vadd.f32 %v14879_v23, %v4685_v48  ;;  %v5710_v54 = vadd.f32 %v14879_v23, %v5709_v49 }
 0x3f3   : > { %v4687_v56 = vpop.f32.mrf.mxu0  ;;  %v5711_v57 = vpop.f32.mrf.mxu1 }
 0x3f4   : > { %v6166_v62 = vmax.f32 %v4686_v52, 0.0  ;;  %v6422_v63 = vmax.f32 %v5710_v54, 0.0  ;;  %v13344_v54 = vld [vmem:[%s13556_s11 + $0x7a0] ss:$8 sps:$4 sm:$0xff]  }
 0x3f5   : > { %v4690_v0 = vpop.f32.mrf.mxu0  ;;  %4881 = vmatmul.mubr.bf16.gmra.mxu0 %v13326_v50  ;;  %v5714_v1 = vpop.f32.mrf.mxu1  ;;  %5905 = vmatmul.mubr.bf16.gmra.mxu1 %v13327_v51 }
 0x3f6   : > { %v11457_v2 = vpack.c.bf16 %v6166_v62, %v6165_v59  ;;  %v12097_v53 = vpack.c.bf16 %v6422_v63, %v6421_v61  ;;  %9817 = vmatprep.mubr.msk.bf16.mxu0 %vm3120_vm0, %v13328_v55  ;;  %9945 = vmatprep.mubr.msk.bf16.mxu1 %vm3120_vm0, %v13330_v58  ;;  %v4691_v29 = vadd.f32 %v14879_v23, %v4690_v0  ;;  %v13345_v55 = vld [vmem:[%s13556_s11 + $0xfa0] ss:$8 sps:$4 sm:$0xff]   ;;  %v13346_v58 = vld [vmem:[%s13556_s11 + $0x7b4] ss:$8 sps:$4 sm:$0xff]  }
 0x3f7   : > { %v4692_v3 = vpop.f32.mrf.mxu0  ;;  %v5716_v4 = vpop.f32.mrf.mxu1  ;;  %v5715_v5 = vadd.f32 %v14879_v23, %v5714_v1  ;;  %v13348_v62 = vld [vmem:[%s13556_s11 + $0xfb4] ss:$8 sps:$4 sm:$0xff]  }
 0x3f8   : > { %12357 = vst [vmem:[%s13748_s18 + $0x2f0] sm:$0xff] %v11457_v2   ;;  %12485 = vst [vmem:[%s13748_s18 + $0x6f0] sm:$0xff] %v12097_v53   ;;  %v6167_v17 = vmax.f32 %v4691_v29, 0.0 }
 0x3f9   : > { %v4693_v7 = vpop.f32.mrf.mxu0  ;;  %v5717_v8 = vpop.f32.mrf.mxu1  ;;  %v6423_v18 = vmax.f32 %v5715_v5, 0.0 }
 0x3fa   : > { %v4694_v11 = vadd.f32 %v14879_v23, %v4693_v7  ;;  %v5718_v12 = vadd.f32 %v14879_v23, %v5717_v8 }
 0x3fb   : > { %v4695_v14 = vpop.f32.mrf.mxu0  ;;  %v5719_v15 = vpop.f32.mrf.mxu1 }
 0x3fc   : > { %v6168_v19 = vmax.f32 %v4694_v11, 0.0  ;;  %v6424_v20 = vmax.f32 %v5718_v12, 0.0  ;;  %v13350_v12 = vld [vmem:[%s13556_s11 + $0x7b0] ss:$8 sps:$4 sm:$0xff]  }
 0x3fd   : > { %v4698_v21 = vpop.f32.mrf.mxu0  ;;  %4889 = vmatmul.mubr.bf16.gmra.mxu0 %v13332_v9  ;;  %v5722_v46 = vpop.f32.mrf.mxu1  ;;  %5913 = vmatmul.mubr.bf16.gmra.mxu1 %v13333_v10 }
 0x3fe   : > { %v11462_v22 = vpack.c.bf16 %v6168_v19, %v6167_v17  ;;  %v12102_v24 = vpack.c.bf16 %v6424_v20, %v6423_v18  ;;  %9818 = vmatprep.mubr.msk.bf16.mxu0 %vm3120_vm0, %v13334_v13  ;;  %9946 = vmatprep.mubr.msk.bf16.mxu1 %vm3120_vm0, %v13336_v16  ;;  %v4699_v27 = vadd.f32 %v14879_v23, %v4698_v21  ;;  %v13351_v13 = vld [vmem:[%s13556_s11 + $0xfb0] ss:$8 sps:$4 sm:$0xff]   ;;  %v13352_v16 = vld [vmem:[%s13556_s11 + $0x7c4] ss:$8 sps:$4 sm:$0xff]  }
 0x3ff   : > { %v4700_v25 = vpop.f32.mrf.mxu0  ;;  %v5724_v26 = vpop.f32.mrf.mxu1  ;;  %v5723_v60 = vadd.f32 %v14879_v23, %v5722_v46  ;;  %v13354_v19 = vld [vmem:[%s13556_s11 + $0xfc4] ss:$8 sps:$4 sm:$0xff]  }
 0x400   : > { %12358 = vst [vmem:[%s13748_s18 + $0x2f8] sm:$0xff] %v11462_v22   ;;  %12486 = vst [vmem:[%s13748_s18 + $0x6f8] sm:$0xff] %v12102_v24   ;;  %v6169_v39 = vmax.f32 %v4699_v27, 0.0 }
 0x401   : > { %v4701_v28 = vpop.f32.mrf.mxu0  ;;  %v5725_v30 = vpop.f32.mrf.mxu1  ;;  %v6425_v40 = vmax.f32 %v5723_v60, 0.0 }
 0x402   : > { %v4702_v33 = vadd.f32 %v14879_v23, %v4701_v28  ;;  %v5726_v34 = vadd.f32 %v14879_v23, %v5725_v30 }
 0x403   : > { %v4703_v36 = vpop.f32.mrf.mxu0  ;;  %v5727_v37 = vpop.f32.mrf.mxu1 }
 0x404   : > { %v6170_v41 = vmax.f32 %v4702_v33, 0.0  ;;  %v6426_v42 = vmax.f32 %v5726_v34, 0.0  ;;  %v13356_v34 = vld [vmem:[%s13556_s11 + $0x7c0] ss:$8 sps:$4 sm:$0xff]  }
 0x405   : > { %v4706_v43 = vpop.f32.mrf.mxu0  ;;  %4897 = vmatmul.mubr.bf16.gmra.mxu0 %v13338_v31  ;;  %v5730_v44 = vpop.f32.mrf.mxu1  ;;  %5921 = vmatmul.mubr.bf16.gmra.mxu1 %v13339_v32 }
 0x406   : > { %v11467_v6 = vpack.c.bf16 %v6170_v41, %v6169_v39  ;;  %v12107_v45 = vpack.c.bf16 %v6426_v42, %v6425_v40  ;;  %9819 = vmatprep.mubr.msk.bf16.mxu0 %vm3120_vm0, %v13340_v35  ;;  %9947 = vmatprep.mubr.msk.bf16.mxu1 %vm3120_vm0, %v13342_v38  ;;  %v4707_v49 = vadd.f32 %v14879_v23, %v4706_v43  ;;  %v13357_v35 = vld [vmem:[%s13556_s11 + $0xfc0] ss:$8 sps:$4 sm:$0xff]   ;;  %v13358_v38 = vld [vmem:[%s13556_s11 + $0x7d4] ss:$8 sps:$4 sm:$0xff]  }
 0x407   : > { %v4708_v47 = vpop.f32.mrf.mxu0  ;;  %v5732_v48 = vpop.f32.mrf.mxu1  ;;  %v5731_v50 = vadd.f32 %v14879_v23, %v5730_v44  ;;  %v13360_v41 = vld [vmem:[%s13556_s11 + $0xfd4] ss:$8 sps:$4 sm:$0xff]  }
 0x408   : > { %12359 = vst [vmem:[%s13748_s18 + $0x300] sm:$0xff] %v11467_v6   ;;  %12487 = vst [vmem:[%s13748_s18 + $0x700] sm:$0xff] %v12107_v45   ;;  %v6171_v63 = vmax.f32 %v4707_v49, 0.0 }
 0x409   : > { %v4709_v51 = vpop.f32.mrf.mxu0  ;;  %v5733_v52 = vpop.f32.mrf.mxu1  ;;  %v6427_v0 = vmax.f32 %v5731_v50, 0.0 }
 0x40a   : > { %v4710_v56 = vadd.f32 %v14879_v23, %v4709_v51  ;;  %v5734_v57 = vadd.f32 %v14879_v23, %v5733_v52 }
 0x40b   : > { %v4711_v59 = vpop.f32.mrf.mxu0  ;;  %v5735_v61 = vpop.f32.mrf.mxu1 }
 0x40c   : > { %v6172_v1 = vmax.f32 %v4710_v56, 0.0  ;;  %v6428_v2 = vmax.f32 %v5734_v57, 0.0  ;;  %v13362_v57 = vld [vmem:[%s13556_s11 + $0x7d0] ss:$8 sps:$4 sm:$0xff]  }
 0x40d   : > { %v4714_v53 = vpop.f32.mrf.mxu0  ;;  %4905 = vmatmul.mubr.bf16.gmra.mxu0 %v13344_v54  ;;  %v5738_v3 = vpop.f32.mrf.mxu1  ;;  %5929 = vmatmul.mubr.bf16.gmra.mxu1 %v13345_v55 }
 0x40e   : > { %v11472_v4 = vpack.c.bf16 %v6172_v1, %v6171_v63  ;;  %v12112_v29 = vpack.c.bf16 %v6428_v2, %v6427_v0  ;;  %9820 = vmatprep.mubr.msk.bf16.mxu0 %vm3120_vm0, %v13346_v58  ;;  %9948 = vmatprep.mubr.msk.bf16.mxu1 %vm3120_vm0, %v13348_v62  ;;  %v4715_v8 = vadd.f32 %v14879_v23, %v4714_v53  ;;  %v13363_v58 = vld [vmem:[%s13556_s11 + $0xfd0] ss:$8 sps:$4 sm:$0xff]   ;;  %v13364_v62 = vld [vmem:[%s13556_s11 + $0x7e4] ss:$8 sps:$4 sm:$0xff]  }
 0x40f   : > { %v4716_v5 = vpop.f32.mrf.mxu0  ;;  %v5740_v7 = vpop.f32.mrf.mxu1  ;;  %v5739_v9 = vadd.f32 %v14879_v23, %v5738_v3  ;;  %v13366_v1 = vld [vmem:[%s13556_s11 + $0xfe4] ss:$8 sps:$4 sm:$0xff]  }
 0x410   : > { %12360 = vst [vmem:[%s13748_s18 + $0x308] sm:$0xff] %v11472_v4   ;;  %12488 = vst [vmem:[%s13748_s18 + $0x708] sm:$0xff] %v12112_v29   ;;  %v6173_v20 = vmax.f32 %v4715_v8, 0.0 }
 0x411   : > { %v4717_v10 = vpop.f32.mrf.mxu0  ;;  %v5741_v11 = vpop.f32.mrf.mxu1  ;;  %v6429_v21 = vmax.f32 %v5739_v9, 0.0 }
 0x412   : > { %v4718_v14 = vadd.f32 %v14879_v23, %v4717_v10  ;;  %v5742_v15 = vadd.f32 %v14879_v23, %v5741_v11 }
 0x413   : > { %v4719_v17 = vpop.f32.mrf.mxu0  ;;  %v5743_v18 = vpop.f32.mrf.mxu1 }
 0x414   : > { %v6174_v46 = vmax.f32 %v4718_v14, 0.0  ;;  %v6430_v22 = vmax.f32 %v5742_v15, 0.0  ;;  %v13368_v15 = vld [vmem:[%s13556_s11 + $0x7e0] ss:$8 sps:$4 sm:$0xff]  }
 0x415   : > { %v4722_v24 = vpop.f32.mrf.mxu0  ;;  %4913 = vmatmul.mubr.bf16.gmra.mxu0 %v13350_v12  ;;  %v5746_v25 = vpop.f32.mrf.mxu1  ;;  %5937 = vmatmul.mubr.bf16.gmra.mxu1 %v13351_v13 }
 0x416   : > { %v11477_v26 = vpack.c.bf16 %v6174_v46, %v6173_v20  ;;  %v12117_v27 = vpack.c.bf16 %v6430_v22, %v6429_v21  ;;  %9821 = vmatprep.mubr.msk.bf16.mxu0 %vm3120_vm0, %v13352_v16  ;;  %9949 = vmatprep.mubr.msk.bf16.mxu1 %vm3120_vm0, %v13354_v19  ;;  %v4723_v30 = vadd.f32 %v14879_v23, %v4722_v24  ;;  %v13369_v16 = vld [vmem:[%s13556_s11 + $0xfe0] ss:$8 sps:$4 sm:$0xff]   ;;  %v13370_v19 = vld [vmem:[%s13556_s11 + $0x7f4] ss:$8 sps:$4 sm:$0xff]  }
 0x417   : > { %v4724_v60 = vpop.f32.mrf.mxu0  ;;  %v5748_v28 = vpop.f32.mrf.mxu1  ;;  %v5747_v31 = vadd.f32 %v14879_v23, %v5746_v25  ;;  %v13372_v46 = vld [vmem:[%s13556_s11 + $0xff4] ss:$8 sps:$4 sm:$0xff]  }
 0x418   : > { %12361 = vst [vmem:[%s13748_s18 + $0x310] sm:$0xff] %v11477_v26   ;;  %12489 = vst [vmem:[%s13748_s18 + $0x710] sm:$0xff] %v12117_v27   ;;  %v6175_v42 = vmax.f32 %v4723_v30, 0.0 }
 0x419   : > { %v4725_v32 = vpop.f32.mrf.mxu0  ;;  %v5749_v33 = vpop.f32.mrf.mxu1  ;;  %v6431_v43 = vmax.f32 %v5747_v31, 0.0 }
 0x41a   : > { %v4726_v36 = vadd.f32 %v14879_v23, %v4725_v32  ;;  %v5750_v37 = vadd.f32 %v14879_v23, %v5749_v33 }
 0x41b   : > { %v4727_v39 = vpop.f32.mrf.mxu0  ;;  %v5751_v40 = vpop.f32.mrf.mxu1 }
 0x41c   : > { %v6176_v44 = vmax.f32 %v4726_v36, 0.0  ;;  %v6432_v6 = vmax.f32 %v5750_v37, 0.0  ;;  %v13374_v37 = vld [vmem:[%s13556_s11 + $0x7f0] ss:$8 sps:$4 sm:$0xff]  }
 0x41d   : > { %v4730_v45 = vpop.f32.mrf.mxu0  ;;  %4921 = vmatmul.mubr.bf16.gmra.mxu0 %v13356_v34  ;;  %v5754_v47 = vpop.f32.mrf.mxu1  ;;  %5945 = vmatmul.mubr.bf16.gmra.mxu1 %v13357_v35 }
 0x41e   : > { %v11482_v48 = vpack.c.bf16 %v6176_v44, %v6175_v42  ;;  %v12122_v49 = vpack.c.bf16 %v6432_v6, %v6431_v43  ;;  %9822 = vmatprep.mubr.msk.bf16.mxu0 %vm3120_vm0, %v13358_v38  ;;  %9950 = vmatprep.mubr.msk.bf16.mxu1 %vm3120_vm0, %v13360_v41  ;;  %v4731_v52 = vadd.f32 %v14879_v23, %v4730_v45  ;;  %v13375_v38 = vld [vmem:[%s13556_s11 + $0xff0] ss:$8 sps:$4 sm:$0xff]  }
 0x41f   : > { %v4732_v50 = vpop.f32.mrf.mxu0  ;;  %v5756_v51 = vpop.f32.mrf.mxu1  ;;  %v5755_v54 = vadd.f32 %v14879_v23, %v5754_v47 }
 0x420   : > { %12362 = vst [vmem:[%s13748_s18 + $0x318] sm:$0xff] %v11482_v48   ;;  %12490 = vst [vmem:[%s13748_s18 + $0x718] sm:$0xff] %v12122_v49   ;;  %v6177_v2 = vmax.f32 %v4731_v52, 0.0 }
 0x421   : > { %v4733_v55 = vpop.f32.mrf.mxu0  ;;  %v5757_v56 = vpop.f32.mrf.mxu1  ;;  %v6433_v53 = vmax.f32 %v5755_v54, 0.0 }
 0x422   : > { %v4734_v59 = vadd.f32 %v14879_v23, %v4733_v55  ;;  %v5758_v61 = vadd.f32 %v14879_v23, %v5757_v56 }
 0x423   : > { %v4735_v63 = vpop.f32.mrf.mxu0  ;;  %v5759_v0 = vpop.f32.mrf.mxu1 }
 0x424   : > { %v6178_v3 = vmax.f32 %v4734_v59, 0.0  ;;  %v6434_v4 = vmax.f32 %v5758_v61, 0.0 }
 0x425   : > { %v4738_v29 = vpop.f32.mrf.mxu0  ;;  %4929 = vmatmul.mubr.bf16.gmra.mxu0 %v13362_v57  ;;  %v5762_v5 = vpop.f32.mrf.mxu1  ;;  %5953 = vmatmul.mubr.bf16.gmra.mxu1 %v13363_v58 }
 0x426   : > { %v11487_v7 = vpack.c.bf16 %v6178_v3, %v6177_v2  ;;  %v12127_v8 = vpack.c.bf16 %v6434_v4, %v6433_v53  ;;  %9823 = vmatprep.mubr.msk.bf16.mxu0 %vm3120_vm0, %v13364_v62  ;;  %9951 = vmatprep.mubr.msk.bf16.mxu1 %vm3120_vm0, %v13366_v1  ;;  %v4739_v11 = vadd.f32 %v14879_v23, %v4738_v29 }
 0x427   : > { %v4740_v9 = vpop.f32.mrf.mxu0  ;;  %v5764_v10 = vpop.f32.mrf.mxu1  ;;  %v5763_v12 = vadd.f32 %v14879_v23, %v5762_v5 }
 0x428   : > { %12363 = vst [vmem:[%s13748_s18 + $0x320] sm:$0xff] %v11487_v7   ;;  %12491 = vst [vmem:[%s13748_s18 + $0x720] sm:$0xff] %v12127_v8   ;;  %v6179_v22 = vmax.f32 %v4739_v11, 0.0 }
 0x429   : > { %v4741_v13 = vpop.f32.mrf.mxu0  ;;  %v5765_v14 = vpop.f32.mrf.mxu1  ;;  %v6435_v24 = vmax.f32 %v5763_v12, 0.0 }
 0x42a   : > { %v4742_v17 = vadd.f32 %v14879_v23, %v4741_v13  ;;  %v5766_v18 = vadd.f32 %v14879_v23, %v5765_v14 }
 0x42b   : > { %v4743_v20 = vpop.f32.mrf.mxu0  ;;  %v5767_v21 = vpop.f32.mrf.mxu1 }
 0x42c   : > { %v6180_v25 = vmax.f32 %v4742_v17, 0.0  ;;  %v6436_v26 = vmax.f32 %v5766_v18, 0.0 }
 0x42d   : > { %v4746_v27 = vpop.f32.mrf.mxu0  ;;  %4937 = vmatmul.mubr.bf16.gmra.mxu0 %v13368_v15  ;;  %v5770_v60 = vpop.f32.mrf.mxu1  ;;  %5961 = vmatmul.mubr.bf16.gmra.mxu1 %v13369_v16 }
 0x42e   : > { %v11492_v28 = vpack.c.bf16 %v6180_v25, %v6179_v22  ;;  %v12132_v30 = vpack.c.bf16 %v6436_v26, %v6435_v24  ;;  %9824 = vmatprep.mubr.msk.bf16.mxu0 %vm3120_vm0, %v13370_v19  ;;  %9952 = vmatprep.mubr.msk.bf16.mxu1 %vm3120_vm0, %v13372_v46  ;;  %v4747_v33 = vadd.f32 %v14879_v23, %v4746_v27 }
 0x42f   : > { %v4748_v31 = vpop.f32.mrf.mxu0  ;;  %v5772_v32 = vpop.f32.mrf.mxu1  ;;  %v5771_v34 = vadd.f32 %v14879_v23, %v5770_v60 }
 0x430   : > { %12364 = vst [vmem:[%s13748_s18 + $0x328] sm:$0xff] %v11492_v28   ;;  %12492 = vst [vmem:[%s13748_s18 + $0x728] sm:$0xff] %v12132_v30   ;;  %v6181_v43 = vmax.f32 %v4747_v33, 0.0 }
 0x431   : > { %v4749_v35 = vpop.f32.mrf.mxu0  ;;  %v5773_v36 = vpop.f32.mrf.mxu1  ;;  %v6437_v44 = vmax.f32 %v5771_v34, 0.0 }
 0x432   : > { %v4750_v39 = vadd.f32 %v14879_v23, %v4749_v35  ;;  %v5774_v40 = vadd.f32 %v14879_v23, %v5773_v36 }
 0x433   : > { %v4751_v41 = vpop.f32.mrf.mxu0  ;;  %v5775_v42 = vpop.f32.mrf.mxu1 }
 0x434   : > { %v6182_v6 = vmax.f32 %v4750_v39, 0.0  ;;  %v6438_v45 = vmax.f32 %v5774_v40, 0.0 }
 0x435   : > { %v4754_v47 = vpop.f32.mrf.mxu0  ;;  %4945 = vmatmul.mubr.bf16.gmra.mxu0 %v13374_v37  ;;  %v5778_v48 = vpop.f32.mrf.mxu1  ;;  %5969 = vmatmul.mubr.bf16.gmra.mxu1 %v13375_v38 }
 0x436   : > { %v11497_v49 = vpack.c.bf16 %v6182_v6, %v6181_v43  ;;  %v12137_v50 = vpack.c.bf16 %v6438_v45, %v6437_v44  ;;  %v4755_v54 = vadd.f32 %v14879_v23, %v4754_v47  ;;  %v5779_v55 = vadd.f32 %v14879_v23, %v5778_v48 }
 0x437   : > { %v4756_v51 = vpop.f32.mrf.mxu0  ;;  %v5780_v52 = vpop.f32.mrf.mxu1 }
 0x438   : > { %12365 = vst [vmem:[%s13748_s18 + $0x330] sm:$0xff] %v11497_v49   ;;  %12493 = vst [vmem:[%s13748_s18 + $0x730] sm:$0xff] %v12137_v50   ;;  %v6183_v63 = vmax.f32 %v4755_v54, 0.0  ;;  %v6439_v0 = vmax.f32 %v5779_v55, 0.0 }
 0x439   : > { %v4757_v56 = vpop.f32.mrf.mxu0  ;;  %v5781_v57 = vpop.f32.mrf.mxu1 }
 0x43a   : > { %v4758_v58 = vadd.f32 %v14879_v23, %v4757_v56  ;;  %v5782_v59 = vadd.f32 %v14879_v23, %v5781_v57 }
 0x43b   : > { %v4759_v61 = vpop.f32.mrf.mxu0  ;;  %v5783_v62 = vpop.f32.mrf.mxu1 }
 0x43c   : > { %v6184_v1 = vmax.f32 %v4758_v58, 0.0  ;;  %v6440_v2 = vmax.f32 %v5782_v59, 0.0 }
 0x43d   : > { %v4762_v53 = vpop.f32.mrf.mxu0  ;;  %v5786_v3 = vpop.f32.mrf.mxu1 }
 0x43e   : > { %v11502_v4 = vpack.c.bf16 %v6184_v1, %v6183_v63  ;;  %v12142_v29 = vpack.c.bf16 %v6440_v2, %v6439_v0  ;;  %v4763_v8 = vadd.f32 %v14879_v23, %v4762_v53  ;;  %v5787_v9 = vadd.f32 %v14879_v23, %v5786_v3 }
 0x43f   : > { %v4764_v5 = vpop.f32.mrf.mxu0  ;;  %v5788_v7 = vpop.f32.mrf.mxu1 }
 0x440   : > { %12366 = vst [vmem:[%s13748_s18 + $0x338] sm:$0xff] %v11502_v4   ;;  %12494 = vst [vmem:[%s13748_s18 + $0x738] sm:$0xff] %v12142_v29   ;;  %v6185_v16 = vmax.f32 %v4763_v8, 0.0  ;;  %v6441_v17 = vmax.f32 %v5787_v9, 0.0 }
 0x441   : > { %v4765_v10 = vpop.f32.mrf.mxu0  ;;  %v5789_v11 = vpop.f32.mrf.mxu1 }
 0x442   : > { %v4766_v12 = vadd.f32 %v14879_v23, %v4765_v10  ;;  %v5790_v13 = vadd.f32 %v14879_v23, %v5789_v11 }
 0x443   : > { %v4767_v14 = vpop.f32.mrf.mxu0  ;;  %v5791_v15 = vpop.f32.mrf.mxu1 }
 0x444   : > { %v6186_v18 = vmax.f32 %v4766_v12, 0.0  ;;  %v6442_v19 = vmax.f32 %v5790_v13, 0.0 }
 0x445   : > { %v4770_v20 = vpop.f32.mrf.mxu0  ;;  %v5794_v21 = vpop.f32.mrf.mxu1 }
 0x446   : > { %v11507_v46 = vpack.c.bf16 %v6186_v18, %v6185_v16  ;;  %v12147_v22 = vpack.c.bf16 %v6442_v19, %v6441_v17  ;;  %v4771_v26 = vadd.f32 %v14879_v23, %v4770_v20  ;;  %v5795_v27 = vadd.f32 %v14879_v23, %v5794_v21 }
 0x447   : > { %v4772_v24 = vpop.f32.mrf.mxu0  ;;  %v5796_v25 = vpop.f32.mrf.mxu1 }
 0x448   : > { %12367 = vst [vmem:[%s13748_s18 + $0x340] sm:$0xff] %v11507_v46   ;;  %12495 = vst [vmem:[%s13748_s18 + $0x740] sm:$0xff] %v12147_v22   ;;  %v6187_v34 = vmax.f32 %v4771_v26, 0.0  ;;  %v6443_v35 = vmax.f32 %v5795_v27, 0.0 }
 0x449   : > { %v4773_v60 = vpop.f32.mrf.mxu0  ;;  %v5797_v28 = vpop.f32.mrf.mxu1 }
 0x44a   : > { %v4774_v30 = vadd.f32 %v14879_v23, %v4773_v60  ;;  %v5798_v31 = vadd.f32 %v14879_v23, %v5797_v28 }
 0x44b   : > { %v4775_v32 = vpop.f32.mrf.mxu0  ;;  %v5799_v33 = vpop.f32.mrf.mxu1 }
 0x44c   : > { %v6188_v36 = vmax.f32 %v4774_v30, 0.0  ;;  %v6444_v37 = vmax.f32 %v5798_v31, 0.0 }
 0x44d   : > { %v4778_v38 = vpop.f32.mrf.mxu0  ;;  %v5802_v39 = vpop.f32.mrf.mxu1 }
 0x44e   : > { %v11512_v40 = vpack.c.bf16 %v6188_v36, %v6187_v34  ;;  %v12152_v41 = vpack.c.bf16 %v6444_v37, %v6443_v35  ;;  %v4779_v44 = vadd.f32 %v14879_v23, %v4778_v38  ;;  %v5803_v6 = vadd.f32 %v14879_v23, %v5802_v39 }
 0x44f   : > { %v4780_v42 = vpop.f32.mrf.mxu0  ;;  %v5804_v43 = vpop.f32.mrf.mxu1 }
 0x450   : > { %12368 = vst [vmem:[%s13748_s18 + $0x348] sm:$0xff] %v11512_v40   ;;  %12496 = vst [vmem:[%s13748_s18 + $0x748] sm:$0xff] %v12152_v41   ;;  %v6189_v52 = vmax.f32 %v4779_v44, 0.0  ;;  %v6445_v54 = vmax.f32 %v5803_v6, 0.0 }
 0x451   : > { %v4781_v45 = vpop.f32.mrf.mxu0  ;;  %v5805_v47 = vpop.f32.mrf.mxu1 }
 0x452   : > { %v4782_v48 = vadd.f32 %v14879_v23, %v4781_v45  ;;  %v5806_v49 = vadd.f32 %v14879_v23, %v5805_v47 }
 0x453   : > { %v4783_v50 = vpop.f32.mrf.mxu0  ;;  %v5807_v51 = vpop.f32.mrf.mxu1 }
 0x454   : > { %v6190_v55 = vmax.f32 %v4782_v48, 0.0  ;;  %v6446_v56 = vmax.f32 %v5806_v49, 0.0 }
 0x455   : > { %v4786_v57 = vpop.f32.mrf.mxu0  ;;  %v5810_v58 = vpop.f32.mrf.mxu1 }
 0x456   : > { %v11517_v59 = vpack.c.bf16 %v6190_v55, %v6189_v52  ;;  %v12157_v61 = vpack.c.bf16 %v6446_v56, %v6445_v54  ;;  %v4787_v0 = vadd.f32 %v14879_v23, %v4786_v57  ;;  %v5811_v1 = vadd.f32 %v14879_v23, %v5810_v58 }
 0x457   : > { %v4788_v62 = vpop.f32.mrf.mxu0  ;;  %v5812_v63 = vpop.f32.mrf.mxu1 }
 0x458   : > { %12369 = vst [vmem:[%s13748_s18 + $0x350] sm:$0xff] %v11517_v59   ;;  %12497 = vst [vmem:[%s13748_s18 + $0x750] sm:$0xff] %v12157_v61   ;;  %v6191_v7 = vmax.f32 %v4787_v0, 0.0  ;;  %v6447_v8 = vmax.f32 %v5811_v1, 0.0 }
 0x459   : > { %v4789_v2 = vpop.f32.mrf.mxu0  ;;  %v5813_v53 = vpop.f32.mrf.mxu1 }
 0x45a   : > { %v4790_v3 = vadd.f32 %v14879_v23, %v4789_v2  ;;  %v5814_v4 = vadd.f32 %v14879_v23, %v5813_v53 }
 0x45b   : > { %v4791_v29 = vpop.f32.mrf.mxu0  ;;  %v5815_v5 = vpop.f32.mrf.mxu1 }
 0x45c   : > { %v6192_v9 = vmax.f32 %v4790_v3, 0.0  ;;  %v6448_v10 = vmax.f32 %v5814_v4, 0.0 }
 0x45d   : > { %v4794_v11 = vpop.f32.mrf.mxu0  ;;  %v5818_v12 = vpop.f32.mrf.mxu1 }
 0x45e   : > { %v11522_v13 = vpack.c.bf16 %v6192_v9, %v6191_v7  ;;  %v12162_v14 = vpack.c.bf16 %v6448_v10, %v6447_v8  ;;  %v4795_v17 = vadd.f32 %v14879_v23, %v4794_v11  ;;  %v5819_v18 = vadd.f32 %v14879_v23, %v5818_v12 }
 0x45f   : > { %v4796_v15 = vpop.f32.mrf.mxu0  ;;  %v5820_v16 = vpop.f32.mrf.mxu1 }
 0x460   : > { %12370 = vst [vmem:[%s13748_s18 + $0x358] sm:$0xff] %v11522_v13   ;;  %12498 = vst [vmem:[%s13748_s18 + $0x758] sm:$0xff] %v12162_v14   ;;  %v6193_v25 = vmax.f32 %v4795_v17, 0.0  ;;  %v6449_v26 = vmax.f32 %v5819_v18, 0.0 }
 0x461   : > { %v4797_v19 = vpop.f32.mrf.mxu0  ;;  %v5821_v20 = vpop.f32.mrf.mxu1 }
 0x462   : > { %v4798_v21 = vadd.f32 %v14879_v23, %v4797_v19  ;;  %v5822_v46 = vadd.f32 %v14879_v23, %v5821_v20 }
 0x463   : > { %v4799_v22 = vpop.f32.mrf.mxu0  ;;  %v5823_v24 = vpop.f32.mrf.mxu1 }
 0x464   : > { %v6194_v27 = vmax.f32 %v4798_v21, 0.0  ;;  %v6450_v60 = vmax.f32 %v5822_v46, 0.0 }
 0x465   : > { %v4802_v28 = vpop.f32.mrf.mxu0  ;;  %v5826_v30 = vpop.f32.mrf.mxu1 }
 0x466   : > { %v11527_v31 = vpack.c.bf16 %v6194_v27, %v6193_v25  ;;  %v12167_v32 = vpack.c.bf16 %v6450_v60, %v6449_v26  ;;  %v4803_v35 = vadd.f32 %v14879_v23, %v4802_v28  ;;  %v5827_v36 = vadd.f32 %v14879_v23, %v5826_v30 }
 0x467   : > { %v4804_v33 = vpop.f32.mrf.mxu0  ;;  %v5828_v34 = vpop.f32.mrf.mxu1 }
 0x468   : > { %12371 = vst [vmem:[%s13748_s18 + $0x360] sm:$0xff] %v11527_v31   ;;  %12499 = vst [vmem:[%s13748_s18 + $0x760] sm:$0xff] %v12167_v32   ;;  %v6195_v43 = vmax.f32 %v4803_v35, 0.0  ;;  %v6451_v44 = vmax.f32 %v5827_v36, 0.0 }
 0x469   : > { %v4805_v37 = vpop.f32.mrf.mxu0  ;;  %v5829_v38 = vpop.f32.mrf.mxu1 }
 0x46a   : > { %v4806_v39 = vadd.f32 %v14879_v23, %v4805_v37  ;;  %v5830_v40 = vadd.f32 %v14879_v23, %v5829_v38 }
 0x46b   : > { %v4807_v41 = vpop.f32.mrf.mxu0  ;;  %v5831_v42 = vpop.f32.mrf.mxu1 }
 0x46c   : > { %v6196_v6 = vmax.f32 %v4806_v39, 0.0  ;;  %v6452_v45 = vmax.f32 %v5830_v40, 0.0 }
 0x46d   : > { %v4810_v47 = vpop.f32.mrf.mxu0  ;;  %v5834_v48 = vpop.f32.mrf.mxu1 }
 0x46e   : > { %v11532_v49 = vpack.c.bf16 %v6196_v6, %v6195_v43  ;;  %v12172_v50 = vpack.c.bf16 %v6452_v45, %v6451_v44  ;;  %v4811_v54 = vadd.f32 %v14879_v23, %v4810_v47  ;;  %v5835_v55 = vadd.f32 %v14879_v23, %v5834_v48 }
 0x46f   : > { %v4812_v51 = vpop.f32.mrf.mxu0  ;;  %v5836_v52 = vpop.f32.mrf.mxu1 }
 0x470   : > { %12372 = vst [vmem:[%s13748_s18 + $0x368] sm:$0xff] %v11532_v49   ;;  %12500 = vst [vmem:[%s13748_s18 + $0x768] sm:$0xff] %v12172_v50   ;;  %v6197_v63 = vmax.f32 %v4811_v54, 0.0  ;;  %v6453_v0 = vmax.f32 %v5835_v55, 0.0 }
 0x471   : > { %v4813_v56 = vpop.f32.mrf.mxu0  ;;  %v5837_v57 = vpop.f32.mrf.mxu1 }
 0x472   : > { %v4814_v58 = vadd.f32 %v14879_v23, %v4813_v56  ;;  %v5838_v59 = vadd.f32 %v14879_v23, %v5837_v57 }
 0x473   : > { %v4815_v61 = vpop.f32.mrf.mxu0  ;;  %v5839_v62 = vpop.f32.mrf.mxu1 }
 0x474   : > { %v6198_v1 = vmax.f32 %v4814_v58, 0.0  ;;  %v6454_v2 = vmax.f32 %v5838_v59, 0.0 }
 0x475   : > { %v4818_v53 = vpop.f32.mrf.mxu0  ;;  %v5842_v3 = vpop.f32.mrf.mxu1 }
 0x476   : > { %v11537_v4 = vpack.c.bf16 %v6198_v1, %v6197_v63  ;;  %v12177_v29 = vpack.c.bf16 %v6454_v2, %v6453_v0  ;;  %v4819_v8 = vadd.f32 %v14879_v23, %v4818_v53  ;;  %v5843_v9 = vadd.f32 %v14879_v23, %v5842_v3 }
 0x477   : > { %v4820_v5 = vpop.f32.mrf.mxu0  ;;  %v5844_v7 = vpop.f32.mrf.mxu1 }
 0x478   : > { %12373 = vst [vmem:[%s13748_s18 + $0x370] sm:$0xff] %v11537_v4   ;;  %12501 = vst [vmem:[%s13748_s18 + $0x770] sm:$0xff] %v12177_v29   ;;  %v6199_v16 = vmax.f32 %v4819_v8, 0.0  ;;  %v6455_v17 = vmax.f32 %v5843_v9, 0.0 }
 0x479   : > { %v4821_v10 = vpop.f32.mrf.mxu0  ;;  %v5845_v11 = vpop.f32.mrf.mxu1 }
 0x47a   : > { %v4822_v12 = vadd.f32 %v14879_v23, %v4821_v10  ;;  %v5846_v13 = vadd.f32 %v14879_v23, %v5845_v11 }
 0x47b   : > { %v4823_v14 = vpop.f32.mrf.mxu0  ;;  %v5847_v15 = vpop.f32.mrf.mxu1 }
 0x47c   : > { %v6200_v18 = vmax.f32 %v4822_v12, 0.0  ;;  %v6456_v19 = vmax.f32 %v5846_v13, 0.0 }
 0x47d   : > { %v4826_v20 = vpop.f32.mrf.mxu0  ;;  %v5850_v21 = vpop.f32.mrf.mxu1 }
 0x47e   : > { %v11542_v46 = vpack.c.bf16 %v6200_v18, %v6199_v16  ;;  %v12182_v22 = vpack.c.bf16 %v6456_v19, %v6455_v17  ;;  %v4827_v26 = vadd.f32 %v14879_v23, %v4826_v20  ;;  %v5851_v27 = vadd.f32 %v14879_v23, %v5850_v21  ;;  %v15072_v17 = vld [vmem:[%s15210_s2] ss:$0 sm:$0xff] }
 0x47f   : > { %v4828_v24 = vpop.f32.mrf.mxu0  ;;  %v5852_v25 = vpop.f32.mrf.mxu1 }
 0x480   : > { %12374 = vst [vmem:[%s13748_s18 + $0x378] sm:$0xff] %v11542_v46   ;;  %12502 = vst [vmem:[%s13748_s18 + $0x778] sm:$0xff] %v12182_v22   ;;  %v6201_v34 = vmax.f32 %v4827_v26, 0.0  ;;  %v6457_v35 = vmax.f32 %v5851_v27, 0.0 }
 0x481   : > { %v4829_v60 = vpop.f32.mrf.mxu0  ;;  %v5853_v28 = vpop.f32.mrf.mxu1 }
 0x482   : > { %v4830_v30 = vadd.f32 %v14879_v23, %v4829_v60  ;;  %v5854_v31 = vadd.f32 %v14879_v23, %v5853_v28 }
 0x483   : > { %v4831_v32 = vpop.f32.mrf.mxu0  ;;  %v5855_v33 = vpop.f32.mrf.mxu1 }
 0x484   : > { %v6202_v36 = vmax.f32 %v4830_v30, 0.0  ;;  %v6458_v37 = vmax.f32 %v5854_v31, 0.0 }
 0x485   : > { %v4834_v38 = vpop.f32.mrf.mxu0  ;;  %v5858_v39 = vpop.f32.mrf.mxu1 }
 0x486   : > { %v11547_v40 = vpack.c.bf16 %v6202_v36, %v6201_v34  ;;  %v12187_v41 = vpack.c.bf16 %v6458_v37, %v6457_v35  ;;  %v4835_v44 = vadd.f32 %v14879_v23, %v4834_v38  ;;  %v5859_v6 = vadd.f32 %v14879_v23, %v5858_v39 }
 0x487   : > { %v4836_v42 = vpop.f32.mrf.mxu0  ;;  %v5860_v43 = vpop.f32.mrf.mxu1 }
 0x488   : > { %12375 = vst [vmem:[%s13748_s18 + $0x380] sm:$0xff] %v11547_v40   ;;  %12503 = vst [vmem:[%s13748_s18 + $0x780] sm:$0xff] %v12187_v41   ;;  %v6203_v52 = vmax.f32 %v4835_v44, 0.0  ;;  %v6459_v54 = vmax.f32 %v5859_v6, 0.0 }
 0x489   : > { %v4837_v45 = vpop.f32.mrf.mxu0  ;;  %v5861_v47 = vpop.f32.mrf.mxu1 }
 0x48a   : > { %v4838_v48 = vadd.f32 %v14879_v23, %v4837_v45  ;;  %v5862_v49 = vadd.f32 %v14879_v23, %v5861_v47 }
 0x48b   : > { %v4839_v50 = vpop.f32.mrf.mxu0  ;;  %v5863_v51 = vpop.f32.mrf.mxu1 }
 0x48c   : > { %v6204_v55 = vmax.f32 %v4838_v48, 0.0  ;;  %v6460_v56 = vmax.f32 %v5862_v49, 0.0 }
 0x48d   : > { %v4842_v57 = vpop.f32.mrf.mxu0  ;;  %v5866_v58 = vpop.f32.mrf.mxu1 }
 0x48e   : > { %v11552_v59 = vpack.c.bf16 %v6204_v55, %v6203_v52  ;;  %v12192_v61 = vpack.c.bf16 %v6460_v56, %v6459_v54  ;;  %v4843_v0 = vadd.f32 %v14879_v23, %v4842_v57  ;;  %v5867_v1 = vadd.f32 %v14879_v23, %v5866_v58 }
 0x48f   : > { %v4844_v62 = vpop.f32.mrf.mxu0  ;;  %v5868_v63 = vpop.f32.mrf.mxu1 }
 0x490   : > { %12376 = vst [vmem:[%s13748_s18 + $0x388] sm:$0xff] %v11552_v59   ;;  %12504 = vst [vmem:[%s13748_s18 + $0x788] sm:$0xff] %v12192_v61   ;;  %v6205_v7 = vmax.f32 %v4843_v0, 0.0  ;;  %v6461_v8 = vmax.f32 %v5867_v1, 0.0 }
 0x491   : > { %v4845_v2 = vpop.f32.mrf.mxu0  ;;  %v5869_v53 = vpop.f32.mrf.mxu1 }
 0x492   : > { %v4846_v3 = vadd.f32 %v14879_v23, %v4845_v2  ;;  %v5870_v4 = vadd.f32 %v14879_v23, %v5869_v53 }
 0x493   : > { %v4847_v29 = vpop.f32.mrf.mxu0  ;;  %v5871_v5 = vpop.f32.mrf.mxu1 }
 0x494   : > { %v6206_v9 = vmax.f32 %v4846_v3, 0.0  ;;  %v6462_v10 = vmax.f32 %v5870_v4, 0.0 }
 0x495   : > { %v4850_v11 = vpop.f32.mrf.mxu0  ;;  %v5874_v12 = vpop.f32.mrf.mxu1 }
 0x496   : > { %v11557_v13 = vpack.c.bf16 %v6206_v9, %v6205_v7  ;;  %v12197_v14 = vpack.c.bf16 %v6462_v10, %v6461_v8  ;;  %v4851_v23 = vadd.f32 %v15072_v17, %v4850_v11  ;;  %v5875_v18 = vadd.f32 %v15072_v17, %v5874_v12 }
 0x497   : > { %v4852_v15 = vpop.f32.mrf.mxu0  ;;  %v5876_v16 = vpop.f32.mrf.mxu1 }
 0x498   : > { %12377 = vst [vmem:[%s13748_s18 + $0x390] sm:$0xff] %v11557_v13   ;;  %12505 = vst [vmem:[%s13748_s18 + $0x790] sm:$0xff] %v12197_v14   ;;  %v6207_v25 = vmax.f32 %v4851_v23, 0.0  ;;  %v6463_v26 = vmax.f32 %v5875_v18, 0.0 }
 0x499   : > { %v4853_v19 = vpop.f32.mrf.mxu0  ;;  %v5877_v20 = vpop.f32.mrf.mxu1 }
 0x49a   : > { %v4854_v21 = vadd.f32 %v15072_v17, %v4853_v19  ;;  %v5878_v46 = vadd.f32 %v15072_v17, %v5877_v20 }
 0x49b   : > { %v4855_v22 = vpop.f32.mrf.mxu0  ;;  %v5879_v24 = vpop.f32.mrf.mxu1 }
 0x49c   : > { %v6208_v27 = vmax.f32 %v4854_v21, 0.0  ;;  %v6464_v60 = vmax.f32 %v5878_v46, 0.0 }
 0x49d   : > { %v4858_v28 = vpop.f32.mrf.mxu0  ;;  %v5882_v30 = vpop.f32.mrf.mxu1 }
 0x49e   : > { %v11562_v31 = vpack.c.bf16 %v6208_v27, %v6207_v25  ;;  %v12202_v32 = vpack.c.bf16 %v6464_v60, %v6463_v26  ;;  %v4859_v35 = vadd.f32 %v15072_v17, %v4858_v28  ;;  %v5883_v36 = vadd.f32 %v15072_v17, %v5882_v30 }
 0x49f   : > { %v4860_v33 = vpop.f32.mrf.mxu0  ;;  %v5884_v34 = vpop.f32.mrf.mxu1 }
 0x4a0   : > { %12378 = vst [vmem:[%s13748_s18 + $0x398] sm:$0xff] %v11562_v31   ;;  %12506 = vst [vmem:[%s13748_s18 + $0x798] sm:$0xff] %v12202_v32   ;;  %v6209_v43 = vmax.f32 %v4859_v35, 0.0  ;;  %v6465_v44 = vmax.f32 %v5883_v36, 0.0 }
 0x4a1   : > { %v4861_v37 = vpop.f32.mrf.mxu0  ;;  %v5885_v38 = vpop.f32.mrf.mxu1 }
 0x4a2   : > { %v4862_v39 = vadd.f32 %v15072_v17, %v4861_v37  ;;  %v5886_v40 = vadd.f32 %v15072_v17, %v5885_v38 }
 0x4a3   : > { %v4863_v41 = vpop.f32.mrf.mxu0  ;;  %v5887_v42 = vpop.f32.mrf.mxu1 }
 0x4a4   : > { %v6210_v6 = vmax.f32 %v4862_v39, 0.0  ;;  %v6466_v45 = vmax.f32 %v5886_v40, 0.0 }
 0x4a5   : > { %v4866_v47 = vpop.f32.mrf.mxu0  ;;  %v5890_v48 = vpop.f32.mrf.mxu1 }
 0x4a6   : > { %v11567_v49 = vpack.c.bf16 %v6210_v6, %v6209_v43  ;;  %v12207_v50 = vpack.c.bf16 %v6466_v45, %v6465_v44  ;;  %v4867_v54 = vadd.f32 %v15072_v17, %v4866_v47  ;;  %v5891_v55 = vadd.f32 %v15072_v17, %v5890_v48 }
 0x4a7   : > { %v4868_v51 = vpop.f32.mrf.mxu0  ;;  %v5892_v52 = vpop.f32.mrf.mxu1 }
 0x4a8   : > { %12379 = vst [vmem:[%s13748_s18 + $0x3a0] sm:$0xff] %v11567_v49   ;;  %12507 = vst [vmem:[%s13748_s18 + $0x7a0] sm:$0xff] %v12207_v50   ;;  %v6211_v63 = vmax.f32 %v4867_v54, 0.0  ;;  %v6467_v0 = vmax.f32 %v5891_v55, 0.0 }
 0x4a9   : > { %v4869_v56 = vpop.f32.mrf.mxu0  ;;  %v5893_v57 = vpop.f32.mrf.mxu1 }
 0x4aa   : > { %v4870_v58 = vadd.f32 %v15072_v17, %v4869_v56  ;;  %v5894_v59 = vadd.f32 %v15072_v17, %v5893_v57 }
 0x4ab   : > { %v4871_v61 = vpop.f32.mrf.mxu0  ;;  %v5895_v62 = vpop.f32.mrf.mxu1 }
 0x4ac   : > { %v6212_v1 = vmax.f32 %v4870_v58, 0.0  ;;  %v6468_v2 = vmax.f32 %v5894_v59, 0.0 }
 0x4ad   : > { %v4874_v53 = vpop.f32.mrf.mxu0  ;;  %v5898_v3 = vpop.f32.mrf.mxu1 }
 0x4ae   : > { %v11572_v4 = vpack.c.bf16 %v6212_v1, %v6211_v63  ;;  %v12212_v29 = vpack.c.bf16 %v6468_v2, %v6467_v0  ;;  %v4875_v8 = vadd.f32 %v15072_v17, %v4874_v53  ;;  %v5899_v9 = vadd.f32 %v15072_v17, %v5898_v3 }
 0x4af   : > { %v4876_v5 = vpop.f32.mrf.mxu0  ;;  %v5900_v7 = vpop.f32.mrf.mxu1 }
 0x4b0   : > { %12380 = vst [vmem:[%s13748_s18 + $0x3a8] sm:$0xff] %v11572_v4   ;;  %12508 = vst [vmem:[%s13748_s18 + $0x7a8] sm:$0xff] %v12212_v29   ;;  %v6213_v16 = vmax.f32 %v4875_v8, 0.0  ;;  %v6469_v23 = vmax.f32 %v5899_v9, 0.0 }
 0x4b1   : > { %v4877_v10 = vpop.f32.mrf.mxu0  ;;  %v5901_v11 = vpop.f32.mrf.mxu1 }
 0x4b2   : > { %v4878_v12 = vadd.f32 %v15072_v17, %v4877_v10  ;;  %v5902_v13 = vadd.f32 %v15072_v17, %v5901_v11 }
 0x4b3   : > { %v4879_v14 = vpop.f32.mrf.mxu0  ;;  %v5903_v15 = vpop.f32.mrf.mxu1 }
 0x4b4   : > { %v6214_v18 = vmax.f32 %v4878_v12, 0.0  ;;  %v6470_v19 = vmax.f32 %v5902_v13, 0.0 }
 0x4b5   : > { %v4882_v20 = vpop.f32.mrf.mxu0  ;;  %v5906_v21 = vpop.f32.mrf.mxu1 }
 0x4b6   : > { %v11577_v46 = vpack.c.bf16 %v6214_v18, %v6213_v16  ;;  %v12217_v22 = vpack.c.bf16 %v6470_v19, %v6469_v23  ;;  %v4883_v26 = vadd.f32 %v15072_v17, %v4882_v20  ;;  %v5907_v27 = vadd.f32 %v15072_v17, %v5906_v21 }
 0x4b7   : > { %v4884_v24 = vpop.f32.mrf.mxu0  ;;  %v5908_v25 = vpop.f32.mrf.mxu1 }
 0x4b8   : > { %12381 = vst [vmem:[%s13748_s18 + $0x3b0] sm:$0xff] %v11577_v46   ;;  %12509 = vst [vmem:[%s13748_s18 + $0x7b0] sm:$0xff] %v12217_v22   ;;  %v6215_v34 = vmax.f32 %v4883_v26, 0.0  ;;  %v6471_v35 = vmax.f32 %v5907_v27, 0.0 }
 0x4b9   : > { %v4885_v60 = vpop.f32.mrf.mxu0  ;;  %v5909_v28 = vpop.f32.mrf.mxu1 }
 0x4ba   : > { %v4886_v30 = vadd.f32 %v15072_v17, %v4885_v60  ;;  %v5910_v31 = vadd.f32 %v15072_v17, %v5909_v28 }
 0x4bb   : > { %v4887_v32 = vpop.f32.mrf.mxu0  ;;  %v5911_v33 = vpop.f32.mrf.mxu1 }
 0x4bc   : > { %v6216_v36 = vmax.f32 %v4886_v30, 0.0  ;;  %v6472_v37 = vmax.f32 %v5910_v31, 0.0 }
 0x4bd   : > { %v4890_v38 = vpop.f32.mrf.mxu0  ;;  %v5914_v39 = vpop.f32.mrf.mxu1 }
 0x4be   : > { %v11582_v40 = vpack.c.bf16 %v6216_v36, %v6215_v34  ;;  %v12222_v41 = vpack.c.bf16 %v6472_v37, %v6471_v35  ;;  %v4891_v44 = vadd.f32 %v15072_v17, %v4890_v38  ;;  %v5915_v6 = vadd.f32 %v15072_v17, %v5914_v39 }
 0x4bf   : > { %v4892_v42 = vpop.f32.mrf.mxu0  ;;  %v5916_v43 = vpop.f32.mrf.mxu1 }
 0x4c0   : > { %12382 = vst [vmem:[%s13748_s18 + $0x3b8] sm:$0xff] %v11582_v40   ;;  %12510 = vst [vmem:[%s13748_s18 + $0x7b8] sm:$0xff] %v12222_v41   ;;  %v6217_v52 = vmax.f32 %v4891_v44, 0.0  ;;  %v6473_v54 = vmax.f32 %v5915_v6, 0.0 }
 0x4c1   : > { %v4893_v45 = vpop.f32.mrf.mxu0  ;;  %v5917_v47 = vpop.f32.mrf.mxu1 }
 0x4c2   : > { %v4894_v48 = vadd.f32 %v15072_v17, %v4893_v45  ;;  %v5918_v49 = vadd.f32 %v15072_v17, %v5917_v47 }
 0x4c3   : > { %v4895_v50 = vpop.f32.mrf.mxu0  ;;  %v5919_v51 = vpop.f32.mrf.mxu1 }
 0x4c4   : > { %v6218_v55 = vmax.f32 %v4894_v48, 0.0  ;;  %v6474_v56 = vmax.f32 %v5918_v49, 0.0 }
 0x4c5   : > { %v4898_v57 = vpop.f32.mrf.mxu0  ;;  %v5922_v58 = vpop.f32.mrf.mxu1 }
 0x4c6   : > { %v11587_v59 = vpack.c.bf16 %v6218_v55, %v6217_v52  ;;  %v12227_v61 = vpack.c.bf16 %v6474_v56, %v6473_v54  ;;  %v4899_v0 = vadd.f32 %v15072_v17, %v4898_v57  ;;  %v5923_v1 = vadd.f32 %v15072_v17, %v5922_v58 }
 0x4c7   : > { %v4900_v62 = vpop.f32.mrf.mxu0  ;;  %v5924_v63 = vpop.f32.mrf.mxu1 }
 0x4c8   : > { %12383 = vst [vmem:[%s13748_s18 + $0x3c0] sm:$0xff] %v11587_v59   ;;  %12511 = vst [vmem:[%s13748_s18 + $0x7c0] sm:$0xff] %v12227_v61   ;;  %v6219_v7 = vmax.f32 %v4899_v0, 0.0  ;;  %v6475_v8 = vmax.f32 %v5923_v1, 0.0 }
 0x4c9   : > { %v4901_v2 = vpop.f32.mrf.mxu0  ;;  %v5925_v53 = vpop.f32.mrf.mxu1 }
 0x4ca   : > { %v4902_v3 = vadd.f32 %v15072_v17, %v4901_v2  ;;  %v5926_v4 = vadd.f32 %v15072_v17, %v5925_v53 }
 0x4cb   : > { %v4903_v29 = vpop.f32.mrf.mxu0  ;;  %v5927_v5 = vpop.f32.mrf.mxu1 }
 0x4cc   : > { %v6220_v9 = vmax.f32 %v4902_v3, 0.0  ;;  %v6476_v10 = vmax.f32 %v5926_v4, 0.0 }
 0x4cd   : > { %v4906_v11 = vpop.f32.mrf.mxu0  ;;  %v5930_v12 = vpop.f32.mrf.mxu1 }
 0x4ce   : > { %v11592_v13 = vpack.c.bf16 %v6220_v9, %v6219_v7  ;;  %v12232_v14 = vpack.c.bf16 %v6476_v10, %v6475_v8  ;;  %v4907_v23 = vadd.f32 %v15072_v17, %v4906_v11  ;;  %v5931_v18 = vadd.f32 %v15072_v17, %v5930_v12 }
 0x4cf   : > { %v4908_v15 = vpop.f32.mrf.mxu0  ;;  %v5932_v16 = vpop.f32.mrf.mxu1 }
 0x4d0   : > { %12384 = vst [vmem:[%s13748_s18 + $0x3c8] sm:$0xff] %v11592_v13   ;;  %12512 = vst [vmem:[%s13748_s18 + $0x7c8] sm:$0xff] %v12232_v14   ;;  %v6221_v25 = vmax.f32 %v4907_v23, 0.0  ;;  %v6477_v26 = vmax.f32 %v5931_v18, 0.0 }
 0x4d1   : > { %v4909_v19 = vpop.f32.mrf.mxu0  ;;  %v5933_v20 = vpop.f32.mrf.mxu1 }
 0x4d2   : > { %v4910_v21 = vadd.f32 %v15072_v17, %v4909_v19  ;;  %v5934_v46 = vadd.f32 %v15072_v17, %v5933_v20 }
 0x4d3   : > { %v4911_v22 = vpop.f32.mrf.mxu0  ;;  %v5935_v24 = vpop.f32.mrf.mxu1 }
 0x4d4   : > { %v6222_v27 = vmax.f32 %v4910_v21, 0.0  ;;  %v6478_v60 = vmax.f32 %v5934_v46, 0.0 }
 0x4d5   : > { %v4914_v28 = vpop.f32.mrf.mxu0  ;;  %v5938_v30 = vpop.f32.mrf.mxu1 }
 0x4d6   : > { %v11597_v31 = vpack.c.bf16 %v6222_v27, %v6221_v25  ;;  %v12237_v32 = vpack.c.bf16 %v6478_v60, %v6477_v26  ;;  %v4915_v35 = vadd.f32 %v15072_v17, %v4914_v28  ;;  %v5939_v36 = vadd.f32 %v15072_v17, %v5938_v30 }
 0x4d7   : > { %v4916_v33 = vpop.f32.mrf.mxu0  ;;  %v5940_v34 = vpop.f32.mrf.mxu1 }
 0x4d8   : > { %12385 = vst [vmem:[%s13748_s18 + $0x3d0] sm:$0xff] %v11597_v31   ;;  %12513 = vst [vmem:[%s13748_s18 + $0x7d0] sm:$0xff] %v12237_v32   ;;  %v6223_v43 = vmax.f32 %v4915_v35, 0.0  ;;  %v6479_v44 = vmax.f32 %v5939_v36, 0.0 }
 0x4d9   : > { %v4917_v37 = vpop.f32.mrf.mxu0  ;;  %v5941_v38 = vpop.f32.mrf.mxu1 }
 0x4da   : > { %v4918_v39 = vadd.f32 %v15072_v17, %v4917_v37  ;;  %v5942_v40 = vadd.f32 %v15072_v17, %v5941_v38 }
 0x4db   : > { %v4919_v41 = vpop.f32.mrf.mxu0  ;;  %v5943_v42 = vpop.f32.mrf.mxu1 }
 0x4dc   : > { %v6224_v6 = vmax.f32 %v4918_v39, 0.0  ;;  %v6480_v45 = vmax.f32 %v5942_v40, 0.0 }
 0x4dd   : > { %v4922_v47 = vpop.f32.mrf.mxu0  ;;  %v5946_v48 = vpop.f32.mrf.mxu1 }
 0x4de   : > { %v11602_v49 = vpack.c.bf16 %v6224_v6, %v6223_v43  ;;  %v12242_v50 = vpack.c.bf16 %v6480_v45, %v6479_v44  ;;  %v4923_v54 = vadd.f32 %v15072_v17, %v4922_v47  ;;  %v5947_v55 = vadd.f32 %v15072_v17, %v5946_v48 }
 0x4df   : > { %v4924_v51 = vpop.f32.mrf.mxu0  ;;  %v5948_v52 = vpop.f32.mrf.mxu1 }
 0x4e0   : > { %12386 = vst [vmem:[%s13748_s18 + $0x3d8] sm:$0xff] %v11602_v49   ;;  %12514 = vst [vmem:[%s13748_s18 + $0x7d8] sm:$0xff] %v12242_v50   ;;  %v6225_v63 = vmax.f32 %v4923_v54, 0.0  ;;  %v6481_v0 = vmax.f32 %v5947_v55, 0.0 }
 0x4e1   : > { %v4925_v56 = vpop.f32.mrf.mxu0  ;;  %v5949_v57 = vpop.f32.mrf.mxu1 }
 0x4e2   : > { %v4926_v58 = vadd.f32 %v15072_v17, %v4925_v56  ;;  %v5950_v59 = vadd.f32 %v15072_v17, %v5949_v57 }
 0x4e3   : > { %v4927_v61 = vpop.f32.mrf.mxu0  ;;  %v5951_v62 = vpop.f32.mrf.mxu1 }
 0x4e4   : > { %v6226_v1 = vmax.f32 %v4926_v58, 0.0  ;;  %v6482_v2 = vmax.f32 %v5950_v59, 0.0 }
 0x4e5   : > { %v4930_v53 = vpop.f32.mrf.mxu0  ;;  %v5954_v3 = vpop.f32.mrf.mxu1 }
 0x4e6   : > { %v11607_v4 = vpack.c.bf16 %v6226_v1, %v6225_v63  ;;  %v12247_v29 = vpack.c.bf16 %v6482_v2, %v6481_v0  ;;  %v4931_v8 = vadd.f32 %v15072_v17, %v4930_v53  ;;  %v5955_v9 = vadd.f32 %v15072_v17, %v5954_v3 }
 0x4e7   : > { %v4932_v5 = vpop.f32.mrf.mxu0  ;;  %v5956_v7 = vpop.f32.mrf.mxu1 }
 0x4e8   : > { %12387 = vst [vmem:[%s13748_s18 + $0x3e0] sm:$0xff] %v11607_v4   ;;  %12515 = vst [vmem:[%s13748_s18 + $0x7e0] sm:$0xff] %v12247_v29   ;;  %v6227_v16 = vmax.f32 %v4931_v8, 0.0  ;;  %v6483_v23 = vmax.f32 %v5955_v9, 0.0 }
 0x4e9   : > { %v4933_v10 = vpop.f32.mrf.mxu0  ;;  %v5957_v11 = vpop.f32.mrf.mxu1 }
 0x4ea   : > { %v4934_v12 = vadd.f32 %v15072_v17, %v4933_v10  ;;  %v5958_v13 = vadd.f32 %v15072_v17, %v5957_v11 }
 0x4eb   : > { %v4935_v14 = vpop.f32.mrf.mxu0  ;;  %v5959_v15 = vpop.f32.mrf.mxu1 }
 0x4ec   : > { %v6228_v18 = vmax.f32 %v4934_v12, 0.0  ;;  %v6484_v19 = vmax.f32 %v5958_v13, 0.0 }
 0x4ed   : > { %v4938_v20 = vpop.f32.mrf.mxu0  ;;  %v5962_v21 = vpop.f32.mrf.mxu1 }
 0x4ee   : > { %v11612_v46 = vpack.c.bf16 %v6228_v18, %v6227_v16  ;;  %v12252_v22 = vpack.c.bf16 %v6484_v19, %v6483_v23  ;;  %v4939_v26 = vadd.f32 %v15072_v17, %v4938_v20  ;;  %v5963_v27 = vadd.f32 %v15072_v17, %v5962_v21 }
 0x4ef   : > { %v4940_v24 = vpop.f32.mrf.mxu0  ;;  %v5964_v25 = vpop.f32.mrf.mxu1 }
 0x4f0   : > { %12388 = vst [vmem:[%s13748_s18 + $0x3e8] sm:$0xff] %v11612_v46   ;;  %12516 = vst [vmem:[%s13748_s18 + $0x7e8] sm:$0xff] %v12252_v22   ;;  %v6229_v34 = vmax.f32 %v4939_v26, 0.0  ;;  %v6485_v35 = vmax.f32 %v5963_v27, 0.0 }
 0x4f1   : > { %v4941_v60 = vpop.f32.mrf.mxu0  ;;  %v5965_v28 = vpop.f32.mrf.mxu1 }
 0x4f2   : > { %v4942_v30 = vadd.f32 %v15072_v17, %v4941_v60  ;;  %v5966_v31 = vadd.f32 %v15072_v17, %v5965_v28 }
 0x4f3   : > { %v4943_v32 = vpop.f32.mrf.mxu0  ;;  %v5967_v33 = vpop.f32.mrf.mxu1 }
 0x4f4   : > { %v6230_v36 = vmax.f32 %v4942_v30, 0.0  ;;  %v6486_v37 = vmax.f32 %v5966_v31, 0.0 }
 0x4f5   : > { %v4946_v38 = vpop.f32.mrf.mxu0  ;;  %v5970_v39 = vpop.f32.mrf.mxu1 }
 0x4f6   : > { %v11617_v40 = vpack.c.bf16 %v6230_v36, %v6229_v34  ;;  %v12257_v41 = vpack.c.bf16 %v6486_v37, %v6485_v35  ;;  %v4947_v44 = vadd.f32 %v15072_v17, %v4946_v38  ;;  %v5971_v6 = vadd.f32 %v15072_v17, %v5970_v39 }
 0x4f7   : > { %v4948_v42 = vpop.f32.mrf.mxu0  ;;  %v5972_v43 = vpop.f32.mrf.mxu1 }
 0x4f8   : > { %12389 = vst [vmem:[%s13748_s18 + $0x3f0] sm:$0xff] %v11617_v40   ;;  %12517 = vst [vmem:[%s13748_s18 + $0x7f0] sm:$0xff] %v12257_v41   ;;  %v6231_v52 = vmax.f32 %v4947_v44, 0.0  ;;  %v6487_v54 = vmax.f32 %v5971_v6, 0.0 }
 0x4f9   : > { %v4949_v45 = vpop.f32.mrf.mxu0  ;;  %v5973_v47 = vpop.f32.mrf.mxu1 }
 0x4fa   : > { %v4950_v48 = vadd.f32 %v15072_v17, %v4949_v45  ;;  %v5974_v49 = vadd.f32 %v15072_v17, %v5973_v47 }
 0x4fb   : > { %v4951_v50 = vpop.f32.mrf.mxu0  ;;  %v5975_v51 = vpop.f32.mrf.mxu1 }
 0x4fc   : > { %v6232_v55 = vmax.f32 %v4950_v48, 0.0  ;;  %v6488_v56 = vmax.f32 %v5974_v49, 0.0 }
 0x4fe   : > { %v11622_v17 = vpack.c.bf16 %v6232_v55, %v6231_v52  ;;  %v12262_v57 = vpack.c.bf16 %v6488_v56, %v6487_v54 }
 0x500   : > { %12390 = vst [vmem:[%s13748_s18 + $0x3f8] sm:$0xff] %v11622_v17   ;;  %12518 = vst [vmem:[%s13748_s18 + $0x7f8] sm:$0xff] %v12262_v57  }
 0x501   : > { %13395 = shalt.err (!%p13392_p5)
}
 0x502   : > { %s13396_s9 = scalar_lea.hbm %s15155_s21, 32768  ;;  %s13400_s30 = scalar_lea.hbm %s15211_s3, 262144 }
 0x503   : > { %p13397_p6 = scmp.ne.s32.totalorder %s15155_s21, %s13396_s9  ;;  %p13401_p10 = scmp.lt.s32.totalorder %s15155_s21, %s15211_s3 }
 0x504   : > { %p13402_p11 = scmp.lt.s32.totalorder %s13400_s30, %s13396_s9 }
 0x505   : > { %p13398_p7 = pnand %p13397_p6, %p13525_p4 }
 0x506   : > { %p13403_p12 = por %p13402_p11, %p13401_p10 }
 0x507   : > { %p13399_p9 = pneg %p13398_p7 }
 0x509   : > { %p13404_p13 = pnand %p13403_p12, %p13399_p9 }
 0x50b   : > { %13407 = shalt.err (!%p13404_p13)
}
 0x50c   : > { %s13463_s11 = smov 64   ;;  %s13464_s6 = smov 4  }
 0x50d   : > { %12539 = dma.vmem_to_hbm [thread:$0]  (%p13525_p4), %s15157_s8, 32768, %s15155_s21, %s15163_s15, %s13463_s11, %s13463_s11, %s13464_s6  }
 0x50e PF: > { %p12545_p0 = scmp.ge.s32.totalorder %s13458_s17, 2  ;;  %s9079_s7 = sand.u32 1, %s13438_s12  }
 0x50f   : > { %s9080_s10 = scalar_lea.sflag [#allocation3], %s9079_s7 }
 0x510   : > { %p12542_p1 = pnand %p12545_p0, %p13532_p8 }
 0x512   : > { %p12543_p2 = pneg %p12542_p1 }
 0x514   : > { %13433 = dma.done.wait (%p12543_p2), %s9080_s10, 32768  }
 0x515   : > { %13435 = vsyncadd (%p12543_p2), %s9080_s10, 4294934528  ;;  %s16_s17 = sadd.s32 1, %s13458_s17   ;;  %s15214_s12 = smov %s13442_s13 }
 0x516   : > { %p13_p3 = scmp.ge.s32.totalorder %s16_s17, 10   ;;  %s15215_s13 = smov %s13446_s14 }
 0x517   : > { %s15216_s14 = smov %s13538_s25  ;;  %s15217_s15 = smov %s13454_s16 }
 0x518   : > { %s15218_s16 = smov %s15220_s20  ;;  %15 = sbr.rel (!%p13_p3) target bundleno = 4 (0x4), region = 73 }
 0x51d   :  { %9085 = vsyncpa [#allocation3], 1 }
 0x51e   :  { %9087 = vsyncpa [#allocation3 + $0x1], 1 }

</bundles_post_ra>
